<compile_context>
chip_gen: v5e
topology: v5e:2x2
jax: 0.10.0
libtpu: 0.0.40
codegen_flags: <defaults>
</compile_context>

<pallas_src>
import functools

import jax
import jax.numpy as jnp
from jax.experimental import pallas as pl
from jax.experimental.pallas import tpu as pltpu

C_IN, C_MID, C_OUT = 3, 6, 3
K = 3                       # kernel size of both convs
N_TAPS1 = C_IN * K * K      # 27
N_TAPS2 = C_MID * K * K     # 54


def conv_chain_kernel(x_ref, w1_ref, b1_ref, w2_ref, b2_ref, o_ref, *, img_w):
    # x_ref : (Nb, C_IN, Lpad)   VMEM f32  -- flat, zero-padded image planes
    # w1_ref: (C_MID*C_IN*K*K,)  SMEM      -- conv1 weights, flattened OIHW
    # b1_ref: (C_MID,)           SMEM
    # w2_ref: (C_OUT*C_MID*K*K,) SMEM      -- conv2 weights, flattened OIHW
    # b2_ref: (C_OUT,)           SMEM
    # o_ref : (Nb, C_OUT, Lout)  VMEM      -- flat conv2 output planes
    nb = x_ref.shape[0]
    lpad = x_ref.shape[2]
    lout = o_ref.shape[2]
    halo = (K - 1) * img_w + (K - 1)    # largest flat tap offset
    l1 = lpad - halo                    # flat length of the conv1 output
    assert lout + halo == l1            # trace-time sanity check

    # ---- conv1: 3 -> 6 --------------------------------------------------
    # Hoist the 27 shifted tap slices (one per (ci, kh, kw)); each is reused
    # by all 6 output channels.
    taps1 = []
    for ci in range(C_IN):
        xc = x_ref[:, ci, :]                          # (Nb, Lpad)
        for kh in range(K):
            for kw in range(K):
                s = kh * img_w + kw
                taps1.append(xc[:, s:s + l1])         # (Nb, L1)

    y1 = []
    for co in range(C_MID):
        acc = jnp.full((nb, l1), b1_ref[co], dtype=jnp.float32)
        for t in range(N_TAPS1):
            acc = acc + taps1[t] * w1_ref[co * N_TAPS1 + t]
        y1.append(acc)

    # ---- conv2: 6 -> 3 --------------------------------------------------
    taps2 = []
    for ci in range(C_MID):
        for kh in range(K):
            for kw in range(K):
                s = kh * img_w + kw
                taps2.append(y1[ci][:, s:s + lout])   # (Nb, Lout)

    for co in range(C_OUT):
        acc = jnp.full((nb, lout), b2_ref[co], dtype=jnp.float32)
        for t in range(N_TAPS2):
            acc = acc + taps2[t] * w2_ref[co * N_TAPS2 + t]
        o_ref[:, co, :] = acc.astype(o_ref.dtype)


@jax.jit
def nn_test_forward(x, w1, b1, w2, b2):
    """x: (N, 3, H, W) f32; w1: (6,3,3,3); b1: (6,); w2: (3,6,3,3); b2: (3,)."""
    N, _, H, W = x.shape
    H2 = H - 2 * (K - 1)
    W2 = W - 2 * (K - 1)

    halo = (K - 1) * W + (K - 1)
    L = H * W
    # Lane-dense output: round the flat output length up to a multiple of 128
    # so the final stores are unmasked full-vreg vst's.
    Lout = ((L + 127) // 128) * 128
    Lpad = Lout + 2 * halo

    # Batch elements per grid step: fill sublanes for large batches, but keep
    # >= 2 grid steps when possible so both v7x TensorCores get work.
    if N >= 16:
        Nb = 8
    elif N >= 2:
        Nb = N // 2
    else:
        Nb = 1
    Npad = pl.cdiv(N, Nb) * Nb

    xf = x.reshape(N, C_IN, L)
    xf = jnp.pad(xf, ((0, Npad - N), (0, 0), (0, Lpad - L)))

    out_flat = pl.pallas_call(
        functools.partial(conv_chain_kernel, img_w=W),
        out_shape=jax.ShapeDtypeStruct((Npad, C_OUT, Lout), x.dtype),
        grid=(Npad // Nb,),
        in_specs=[
            pl.BlockSpec((Nb, C_IN, Lpad), lambda n: (n, 0, 0)),
            pl.BlockSpec(memory_space=pltpu.MemorySpace.SMEM),
            pl.BlockSpec(memory_space=pltpu.MemorySpace.SMEM),
            pl.BlockSpec(memory_space=pltpu.MemorySpace.SMEM),
            pl.BlockSpec(memory_space=pltpu.MemorySpace.SMEM),
        ],
        out_specs=pl.BlockSpec((Nb, C_OUT, Lout), lambda n: (n, 0, 0)),
        compiler_params=pltpu.CompilerParams(
            dimension_semantics=("parallel",)),
    )(xf, w1.reshape(-1), b1, w2.reshape(-1), b2)

    # Un-flatten and crop to the valid (H2, W2) region.
    out = out_flat[:N, :, :L].reshape(N, C_OUT, H, W)
    return out[:, :, :H2, :W2]


def _ref_forward(x, w1, b1, w2, b2):
    """Pure-JAX reference matching PyTorch Conv2d semantics (NCHW / OIHW)."""
    dn = ("NCHW", "OIHW", "NCHW")
    y = jax.lax.conv_general_dilated(x, w1, (1, 1), "VALID",
                                     dimension_numbers=dn)
    y = y + b1[None, :, None, None]
    z = jax.lax.conv_general_dilated(y, w2, (1, 1), "VALID",
                                     dimension_numbers=dn)
    return z + b2[None, :, None, None]


def _init_params(key):
    """Deterministic Conv2d-style (uniform +/- 1/sqrt(fan_in)) init."""
    k1, k2, k3, k4 = jax.random.split(key, 4)
    fan1 = C_IN * K * K
    fan2 = C_MID * K * K
    b1_bound = 1.0 / jnp.sqrt(fan1)
    b2_bound = 1.0 / jnp.sqrt(fan2)
    w1 = jax.random.uniform(k1, (C_MID, C_IN, K, K), jnp.float32,
                            -b1_bound, b1_bound)
    b1 = jax.random.uniform(k2, (C_MID,), jnp.float32, -b1_bound, b1_bound)
    w2 = jax.random.uniform(k3, (C_OUT, C_MID, K, K), jnp.float32,
                            -b2_bound, b2_bound)
    b2 = jax.random.uniform(k4, (C_OUT,), jnp.float32, -b2_bound, b2_bound)
    return w1, b1, w2, b2


if __name__ == "__main__":
    key = jax.random.PRNGKey(0)
    k_x, k_p = jax.random.split(key)
    # batch=2, channels=3 (fixed by the module), spatial=16
    x = jax.random.normal(k_x, (2, 3, 16, 16), dtype=jnp.float32)
    w1, b1, w2, b2 = _init_params(k_p)

    out = nn_test_forward(x, w1, b1, w2, b2)
    out = jax.block_until_ready(out)

    ref = _ref_forward(x, w1, b1, w2, b2)
    assert out.shape == (2, 3, 12, 12), out.shape
    assert jnp.allclose(out, ref, atol=1e-4, rtol=1e-4), \
        float(jnp.max(jnp.abs(out - ref)))
    print("KERNEL_OK")
</pallas_src>

<mosaic_0001>
module attributes {stable_mosaic.version = 11 : i64} {
  func.func @conv_chain_kernel(%arg0: i32, %arg1: memref<1x3x324xf32, #tpu.memory_space<vmem>>, %arg2: memref<162xf32, #tpu.memory_space<smem>>, %arg3: memref<6xf32, #tpu.memory_space<smem>>, %arg4: memref<162xf32, #tpu.memory_space<smem>>, %arg5: memref<3xf32, #tpu.memory_space<smem>>, %arg6: memref<1x3x256xf32, #tpu.memory_space<vmem>>) attributes {dimension_semantics = [#tpu.dimension_semantics<parallel>], iteration_bounds = array<i64: 2>, scalar_prefetch = 0 : i64, scratch_operands = 0 : i64, tpu.core_type = #tpu.core_type<tc>, window_params = [{transform_indices = @transform_0, window_bounds = array<i64: 1, 3, 324>}, {transform_indices = @transform_1, window_bounds = array<i64: 162>}, {transform_indices = @transform_2, window_bounds = array<i64: 6>}, {transform_indices = @transform_3, window_bounds = array<i64: 162>}, {transform_indices = @transform_4, window_bounds = array<i64: 3>}, {transform_indices = @transform_5, window_bounds = array<i64: 1, 3, 256>}]} {
    %c0 = arith.constant 0 : index
    %c0_0 = arith.constant 0 : index
    %c0_1 = arith.constant 0 : index
    %0 = vector.load %arg1[%c0, %c0_0, %c0_1] : memref<1x3x324xf32, #tpu.memory_space<vmem>>, vector<1x1x324xf32>
    %1 = vector.shape_cast %0 : vector<1x1x324xf32> to vector<1x324xf32>
    %2 = vector.extract_strided_slice %1 {offsets = [0, 0], sizes = [1, 290], strides = [1, 1]} : vector<1x324xf32> to vector<1x290xf32>
    %3 = vector.extract_strided_slice %1 {offsets = [0, 1], sizes = [1, 290], strides = [1, 1]} : vector<1x324xf32> to vector<1x290xf32>
    %4 = vector.extract_strided_slice %1 {offsets = [0, 2], sizes = [1, 290], strides = [1, 1]} : vector<1x324xf32> to vector<1x290xf32>
    %5 = vector.extract_strided_slice %1 {offsets = [0, 16], sizes = [1, 290], strides = [1, 1]} : vector<1x324xf32> to vector<1x290xf32>
    %6 = vector.extract_strided_slice %1 {offsets = [0, 17], sizes = [1, 290], strides = [1, 1]} : vector<1x324xf32> to vector<1x290xf32>
    %7 = vector.extract_strided_slice %1 {offsets = [0, 18], sizes = [1, 290], strides = [1, 1]} : vector<1x324xf32> to vector<1x290xf32>
    %8 = vector.extract_strided_slice %1 {offsets = [0, 32], sizes = [1, 290], strides = [1, 1]} : vector<1x324xf32> to vector<1x290xf32>
    %9 = vector.extract_strided_slice %1 {offsets = [0, 33], sizes = [1, 290], strides = [1, 1]} : vector<1x324xf32> to vector<1x290xf32>
    %10 = vector.extract_strided_slice %1 {offsets = [0, 34], sizes = [1, 290], strides = [1, 1]} : vector<1x324xf32> to vector<1x290xf32>
    %c0_2 = arith.constant 0 : index
    %c1 = arith.constant 1 : index
    %c0_3 = arith.constant 0 : index
    %11 = vector.load %arg1[%c0_2, %c1, %c0_3] : memref<1x3x324xf32, #tpu.memory_space<vmem>>, vector<1x1x324xf32>
    %12 = vector.shape_cast %11 : vector<1x1x324xf32> to vector<1x324xf32>
    %13 = vector.extract_strided_slice %12 {offsets = [0, 0], sizes = [1, 290], strides = [1, 1]} : vector<1x324xf32> to vector<1x290xf32>
    %14 = vector.extract_strided_slice %12 {offsets = [0, 1], sizes = [1, 290], strides = [1, 1]} : vector<1x324xf32> to vector<1x290xf32>
    %15 = vector.extract_strided_slice %12 {offsets = [0, 2], sizes = [1, 290], strides = [1, 1]} : vector<1x324xf32> to vector<1x290xf32>
    %16 = vector.extract_strided_slice %12 {offsets = [0, 16], sizes = [1, 290], strides = [1, 1]} : vector<1x324xf32> to vector<1x290xf32>
    %17 = vector.extract_strided_slice %12 {offsets = [0, 17], sizes = [1, 290], strides = [1, 1]} : vector<1x324xf32> to vector<1x290xf32>
    %18 = vector.extract_strided_slice %12 {offsets = [0, 18], sizes = [1, 290], strides = [1, 1]} : vector<1x324xf32> to vector<1x290xf32>
    %19 = vector.extract_strided_slice %12 {offsets = [0, 32], sizes = [1, 290], strides = [1, 1]} : vector<1x324xf32> to vector<1x290xf32>
    %20 = vector.extract_strided_slice %12 {offsets = [0, 33], sizes = [1, 290], strides = [1, 1]} : vector<1x324xf32> to vector<1x290xf32>
    %21 = vector.extract_strided_slice %12 {offsets = [0, 34], sizes = [1, 290], strides = [1, 1]} : vector<1x324xf32> to vector<1x290xf32>
    %c0_4 = arith.constant 0 : index
    %c2 = arith.constant 2 : index
    %c0_5 = arith.constant 0 : index
    %22 = vector.load %arg1[%c0_4, %c2, %c0_5] : memref<1x3x324xf32, #tpu.memory_space<vmem>>, vector<1x1x324xf32>
    %23 = vector.shape_cast %22 : vector<1x1x324xf32> to vector<1x324xf32>
    %24 = vector.extract_strided_slice %23 {offsets = [0, 0], sizes = [1, 290], strides = [1, 1]} : vector<1x324xf32> to vector<1x290xf32>
    %25 = vector.extract_strided_slice %23 {offsets = [0, 1], sizes = [1, 290], strides = [1, 1]} : vector<1x324xf32> to vector<1x290xf32>
    %26 = vector.extract_strided_slice %23 {offsets = [0, 2], sizes = [1, 290], strides = [1, 1]} : vector<1x324xf32> to vector<1x290xf32>
    %27 = vector.extract_strided_slice %23 {offsets = [0, 16], sizes = [1, 290], strides = [1, 1]} : vector<1x324xf32> to vector<1x290xf32>
    %28 = vector.extract_strided_slice %23 {offsets = [0, 17], sizes = [1, 290], strides = [1, 1]} : vector<1x324xf32> to vector<1x290xf32>
    %29 = vector.extract_strided_slice %23 {offsets = [0, 18], sizes = [1, 290], strides = [1, 1]} : vector<1x324xf32> to vector<1x290xf32>
    %30 = vector.extract_strided_slice %23 {offsets = [0, 32], sizes = [1, 290], strides = [1, 1]} : vector<1x324xf32> to vector<1x290xf32>
    %31 = vector.extract_strided_slice %23 {offsets = [0, 33], sizes = [1, 290], strides = [1, 1]} : vector<1x324xf32> to vector<1x290xf32>
    %32 = vector.extract_strided_slice %23 {offsets = [0, 34], sizes = [1, 290], strides = [1, 1]} : vector<1x324xf32> to vector<1x290xf32>
    %c0_6 = arith.constant 0 : index
    %33 = memref.load %arg3[%c0_6] : memref<6xf32, #tpu.memory_space<smem>>
    %34 = vector.broadcast %33 : f32 to vector<1x290xf32>
    %c0_7 = arith.constant 0 : index
    %35 = memref.load %arg2[%c0_7] : memref<162xf32, #tpu.memory_space<smem>>
    %36 = vector.broadcast %35 : f32 to vector<1x290xf32>
    %37 = arith.mulf %2, %36 : vector<1x290xf32>
    %38 = arith.addf %34, %37 : vector<1x290xf32>
    %c1_8 = arith.constant 1 : index
    %39 = memref.load %arg2[%c1_8] : memref<162xf32, #tpu.memory_space<smem>>
    %40 = vector.broadcast %39 : f32 to vector<1x290xf32>
    %41 = arith.mulf %3, %40 : vector<1x290xf32>
    %42 = arith.addf %38, %41 : vector<1x290xf32>
    %c2_9 = arith.constant 2 : index
    %43 = memref.load %arg2[%c2_9] : memref<162xf32, #tpu.memory_space<smem>>
    %44 = vector.broadcast %43 : f32 to vector<1x290xf32>
    %45 = arith.mulf %4, %44 : vector<1x290xf32>
    %46 = arith.addf %42, %45 : vector<1x290xf32>
    %c3 = arith.constant 3 : index
    %47 = memref.load %arg2[%c3] : memref<162xf32, #tpu.memory_space<smem>>
    %48 = vector.broadcast %47 : f32 to vector<1x290xf32>
    %49 = arith.mulf %5, %48 : vector<1x290xf32>
    %50 = arith.addf %46, %49 : vector<1x290xf32>
    %c4 = arith.constant 4 : index
    %51 = memref.load %arg2[%c4] : memref<162xf32, #tpu.memory_space<smem>>
    %52 = vector.broadcast %51 : f32 to vector<1x290xf32>
    %53 = arith.mulf %6, %52 : vector<1x290xf32>
    %54 = arith.addf %50, %53 : vector<1x290xf32>
    %c5 = arith.constant 5 : index
    %55 = memref.load %arg2[%c5] : memref<162xf32, #tpu.memory_space<smem>>
    %56 = vector.broadcast %55 : f32 to vector<1x290xf32>
    %57 = arith.mulf %7, %56 : vector<1x290xf32>
    %58 = arith.addf %54, %57 : vector<1x290xf32>
    %c6 = arith.constant 6 : index
    %59 = memref.load %arg2[%c6] : memref<162xf32, #tpu.memory_space<smem>>
    %60 = vector.broadcast %59 : f32 to vector<1x290xf32>
    %61 = arith.mulf %8, %60 : vector<1x290xf32>
    %62 = arith.addf %58, %61 : vector<1x290xf32>
    %c7 = arith.constant 7 : index
    %63 = memref.load %arg2[%c7] : memref<162xf32, #tpu.memory_space<smem>>
    %64 = vector.broadcast %63 : f32 to vector<1x290xf32>
    %65 = arith.mulf %9, %64 : vector<1x290xf32>
    %66 = arith.addf %62, %65 : vector<1x290xf32>
    %c8 = arith.constant 8 : index
    %67 = memref.load %arg2[%c8] : memref<162xf32, #tpu.memory_space<smem>>
    %68 = vector.broadcast %67 : f32 to vector<1x290xf32>
    %69 = arith.mulf %10, %68 : vector<1x290xf32>
    %70 = arith.addf %66, %69 : vector<1x290xf32>
    %c9 = arith.constant 9 : index
    %71 = memref.load %arg2[%c9] : memref<162xf32, #tpu.memory_space<smem>>
    %72 = vector.broadcast %71 : f32 to vector<1x290xf32>
    %73 = arith.mulf %13, %72 : vector<1x290xf32>
    %74 = arith.addf %70, %73 : vector<1x290xf32>
    %c10 = arith.constant 10 : index
    %75 = memref.load %arg2[%c10] : memref<162xf32, #tpu.memory_space<smem>>
    %76 = vector.broadcast %75 : f32 to vector<1x290xf32>
    %77 = arith.mulf %14, %76 : vector<1x290xf32>
    %78 = arith.addf %74, %77 : vector<1x290xf32>
    %c11 = arith.constant 11 : index
    %79 = memref.load %arg2[%c11] : memref<162xf32, #tpu.memory_space<smem>>
    %80 = vector.broadcast %79 : f32 to vector<1x290xf32>
    %81 = arith.mulf %15, %80 : vector<1x290xf32>
    %82 = arith.addf %78, %81 : vector<1x290xf32>
    %c12 = arith.constant 12 : index
    %83 = memref.load %arg2[%c12] : memref<162xf32, #tpu.memory_space<smem>>
    %84 = vector.broadcast %83 : f32 to vector<1x290xf32>
    %85 = arith.mulf %16, %84 : vector<1x290xf32>
    %86 = arith.addf %82, %85 : vector<1x290xf32>
    %c13 = arith.constant 13 : index
    %87 = memref.load %arg2[%c13] : memref<162xf32, #tpu.memory_space<smem>>
    %88 = vector.broadcast %87 : f32 to vector<1x290xf32>
    %89 = arith.mulf %17, %88 : vector<1x290xf32>
    %90 = arith.addf %86, %89 : vector<1x290xf32>
    %c14 = arith.constant 14 : index
    %91 = memref.load %arg2[%c14] : memref<162xf32, #tpu.memory_space<smem>>
    %92 = vector.broadcast %91 : f32 to vector<1x290xf32>
    %93 = arith.mulf %18, %92 : vector<1x290xf32>
    %94 = arith.addf %90, %93 : vector<1x290xf32>
    %c15 = arith.constant 15 : index
    %95 = memref.load %arg2[%c15] : memref<162xf32, #tpu.memory_space<smem>>
    %96 = vector.broadcast %95 : f32 to vector<1x290xf32>
    %97 = arith.mulf %19, %96 : vector<1x290xf32>
    %98 = arith.addf %94, %97 : vector<1x290xf32>
    %c16 = arith.constant 16 : index
    %99 = memref.load %arg2[%c16] : memref<162xf32, #tpu.memory_space<smem>>
    %100 = vector.broadcast %99 : f32 to vector<1x290xf32>
    %101 = arith.mulf %20, %100 : vector<1x290xf32>
    %102 = arith.addf %98, %101 : vector<1x290xf32>
    %c17 = arith.constant 17 : index
    %103 = memref.load %arg2[%c17] : memref<162xf32, #tpu.memory_space<smem>>
    %104 = vector.broadcast %103 : f32 to vector<1x290xf32>
    %105 = arith.mulf %21, %104 : vector<1x290xf32>
    %106 = arith.addf %102, %105 : vector<1x290xf32>
    %c18 = arith.constant 18 : index
    %107 = memref.load %arg2[%c18] : memref<162xf32, #tpu.memory_space<smem>>
    %108 = vector.broadcast %107 : f32 to vector<1x290xf32>
    %109 = arith.mulf %24, %108 : vector<1x290xf32>
    %110 = arith.addf %106, %109 : vector<1x290xf32>
    %c19 = arith.constant 19 : index
    %111 = memref.load %arg2[%c19] : memref<162xf32, #tpu.memory_space<smem>>
    %112 = vector.broadcast %111 : f32 to vector<1x290xf32>
    %113 = arith.mulf %25, %112 : vector<1x290xf32>
    %114 = arith.addf %110, %113 : vector<1x290xf32>
    %c20 = arith.constant 20 : index
    %115 = memref.load %arg2[%c20] : memref<162xf32, #tpu.memory_space<smem>>
    %116 = vector.broadcast %115 : f32 to vector<1x290xf32>
    %117 = arith.mulf %26, %116 : vector<1x290xf32>
    %118 = arith.addf %114, %117 : vector<1x290xf32>
    %c21 = arith.constant 21 : index
    %119 = memref.load %arg2[%c21] : memref<162xf32, #tpu.memory_space<smem>>
    %120 = vector.broadcast %119 : f32 to vector<1x290xf32>
    %121 = arith.mulf %27, %120 : vector<1x290xf32>
    %122 = arith.addf %118, %121 : vector<1x290xf32>
    %c22 = arith.constant 22 : index
    %123 = memref.load %arg2[%c22] : memref<162xf32, #tpu.memory_space<smem>>
    %124 = vector.broadcast %123 : f32 to vector<1x290xf32>
    %125 = arith.mulf %28, %124 : vector<1x290xf32>
    %126 = arith.addf %122, %125 : vector<1x290xf32>
    %c23 = arith.constant 23 : index
    %127 = memref.load %arg2[%c23] : memref<162xf32, #tpu.memory_space<smem>>
    %128 = vector.broadcast %127 : f32 to vector<1x290xf32>
    %129 = arith.mulf %29, %128 : vector<1x290xf32>
    %130 = arith.addf %126, %129 : vector<1x290xf32>
    %c24 = arith.constant 24 : index
    %131 = memref.load %arg2[%c24] : memref<162xf32, #tpu.memory_space<smem>>
    %132 = vector.broadcast %131 : f32 to vector<1x290xf32>
    %133 = arith.mulf %30, %132 : vector<1x290xf32>
    %134 = arith.addf %130, %133 : vector<1x290xf32>
    %c25 = arith.constant 25 : index
    %135 = memref.load %arg2[%c25] : memref<162xf32, #tpu.memory_space<smem>>
    %136 = vector.broadcast %135 : f32 to vector<1x290xf32>
    %137 = arith.mulf %31, %136 : vector<1x290xf32>
    %138 = arith.addf %134, %137 : vector<1x290xf32>
    %c26 = arith.constant 26 : index
    %139 = memref.load %arg2[%c26] : memref<162xf32, #tpu.memory_space<smem>>
    %140 = vector.broadcast %139 : f32 to vector<1x290xf32>
    %141 = arith.mulf %32, %140 : vector<1x290xf32>
    %142 = arith.addf %138, %141 : vector<1x290xf32>
    %c1_10 = arith.constant 1 : index
    %143 = memref.load %arg3[%c1_10] : memref<6xf32, #tpu.memory_space<smem>>
    %144 = vector.broadcast %143 : f32 to vector<1x290xf32>
    %c27 = arith.constant 27 : index
    %145 = memref.load %arg2[%c27] : memref<162xf32, #tpu.memory_space<smem>>
    %146 = vector.broadcast %145 : f32 to vector<1x290xf32>
    %147 = arith.mulf %2, %146 : vector<1x290xf32>
    %148 = arith.addf %144, %147 : vector<1x290xf32>
    %c28 = arith.constant 28 : index
    %149 = memref.load %arg2[%c28] : memref<162xf32, #tpu.memory_space<smem>>
    %150 = vector.broadcast %149 : f32 to vector<1x290xf32>
    %151 = arith.mulf %3, %150 : vector<1x290xf32>
    %152 = arith.addf %148, %151 : vector<1x290xf32>
    %c29 = arith.constant 29 : index
    %153 = memref.load %arg2[%c29] : memref<162xf32, #tpu.memory_space<smem>>
    %154 = vector.broadcast %153 : f32 to vector<1x290xf32>
    %155 = arith.mulf %4, %154 : vector<1x290xf32>
    %156 = arith.addf %152, %155 : vector<1x290xf32>
    %c30 = arith.constant 30 : index
    %157 = memref.load %arg2[%c30] : memref<162xf32, #tpu.memory_space<smem>>
    %158 = vector.broadcast %157 : f32 to vector<1x290xf32>
    %159 = arith.mulf %5, %158 : vector<1x290xf32>
    %160 = arith.addf %156, %159 : vector<1x290xf32>
    %c31 = arith.constant 31 : index
    %161 = memref.load %arg2[%c31] : memref<162xf32, #tpu.memory_space<smem>>
    %162 = vector.broadcast %161 : f32 to vector<1x290xf32>
    %163 = arith.mulf %6, %162 : vector<1x290xf32>
    %164 = arith.addf %160, %163 : vector<1x290xf32>
    %c32 = arith.constant 32 : index
    %165 = memref.load %arg2[%c32] : memref<162xf32, #tpu.memory_space<smem>>
    %166 = vector.broadcast %165 : f32 to vector<1x290xf32>
    %167 = arith.mulf %7, %166 : vector<1x290xf32>
    %168 = arith.addf %164, %167 : vector<1x290xf32>
    %c33 = arith.constant 33 : index
    %169 = memref.load %arg2[%c33] : memref<162xf32, #tpu.memory_space<smem>>
    %170 = vector.broadcast %169 : f32 to vector<1x290xf32>
    %171 = arith.mulf %8, %170 : vector<1x290xf32>
    %172 = arith.addf %168, %171 : vector<1x290xf32>
    %c34 = arith.constant 34 : index
    %173 = memref.load %arg2[%c34] : memref<162xf32, #tpu.memory_space<smem>>
    %174 = vector.broadcast %173 : f32 to vector<1x290xf32>
    %175 = arith.mulf %9, %174 : vector<1x290xf32>
    %176 = arith.addf %172, %175 : vector<1x290xf32>
    %c35 = arith.constant 35 : index
    %177 = memref.load %arg2[%c35] : memref<162xf32, #tpu.memory_space<smem>>
    %178 = vector.broadcast %177 : f32 to vector<1x290xf32>
    %179 = arith.mulf %10, %178 : vector<1x290xf32>
    %180 = arith.addf %176, %179 : vector<1x290xf32>
    %c36 = arith.constant 36 : index
    %181 = memref.load %arg2[%c36] : memref<162xf32, #tpu.memory_space<smem>>
    %182 = vector.broadcast %181 : f32 to vector<1x290xf32>
    %183 = arith.mulf %13, %182 : vector<1x290xf32>
    %184 = arith.addf %180, %183 : vector<1x290xf32>
    %c37 = arith.constant 37 : index
    %185 = memref.load %arg2[%c37] : memref<162xf32, #tpu.memory_space<smem>>
    %186 = vector.broadcast %185 : f32 to vector<1x290xf32>
    %187 = arith.mulf %14, %186 : vector<1x290xf32>
    %188 = arith.addf %184, %187 : vector<1x290xf32>
    %c38 = arith.constant 38 : index
    %189 = memref.load %arg2[%c38] : memref<162xf32, #tpu.memory_space<smem>>
    %190 = vector.broadcast %189 : f32 to vector<1x290xf32>
    %191 = arith.mulf %15, %190 : vector<1x290xf32>
    %192 = arith.addf %188, %191 : vector<1x290xf32>
    %c39 = arith.constant 39 : index
    %193 = memref.load %arg2[%c39] : memref<162xf32, #tpu.memory_space<smem>>
    %194 = vector.broadcast %193 : f32 to vector<1x290xf32>
    %195 = arith.mulf %16, %194 : vector<1x290xf32>
    %196 = arith.addf %192, %195 : vector<1x290xf32>
    %c40 = arith.constant 40 : index
    %197 = memref.load %arg2[%c40] : memref<162xf32, #tpu.memory_space<smem>>
    %198 = vector.broadcast %197 : f32 to vector<1x290xf32>
    %199 = arith.mulf %17, %198 : vector<1x290xf32>
    %200 = arith.addf %196, %199 : vector<1x290xf32>
    %c41 = arith.constant 41 : index
    %201 = memref.load %arg2[%c41] : memref<162xf32, #tpu.memory_space<smem>>
    %202 = vector.broadcast %201 : f32 to vector<1x290xf32>
    %203 = arith.mulf %18, %202 : vector<1x290xf32>
    %204 = arith.addf %200, %203 : vector<1x290xf32>
    %c42 = arith.constant 42 : index
    %205 = memref.load %arg2[%c42] : memref<162xf32, #tpu.memory_space<smem>>
    %206 = vector.broadcast %205 : f32 to vector<1x290xf32>
    %207 = arith.mulf %19, %206 : vector<1x290xf32>
    %208 = arith.addf %204, %207 : vector<1x290xf32>
    %c43 = arith.constant 43 : index
    %209 = memref.load %arg2[%c43] : memref<162xf32, #tpu.memory_space<smem>>
    %210 = vector.broadcast %209 : f32 to vector<1x290xf32>
    %211 = arith.mulf %20, %210 : vector<1x290xf32>
    %212 = arith.addf %208, %211 : vector<1x290xf32>
    %c44 = arith.constant 44 : index
    %213 = memref.load %arg2[%c44] : memref<162xf32, #tpu.memory_space<smem>>
    %214 = vector.broadcast %213 : f32 to vector<1x290xf32>
    %215 = arith.mulf %21, %214 : vector<1x290xf32>
    %216 = arith.addf %212, %215 : vector<1x290xf32>
    %c45 = arith.constant 45 : index
    %217 = memref.load %arg2[%c45] : memref<162xf32, #tpu.memory_space<smem>>
    %218 = vector.broadcast %217 : f32 to vector<1x290xf32>
    %219 = arith.mulf %24, %218 : vector<1x290xf32>
    %220 = arith.addf %216, %219 : vector<1x290xf32>
    %c46 = arith.constant 46 : index
    %221 = memref.load %arg2[%c46] : memref<162xf32, #tpu.memory_space<smem>>
    %222 = vector.broadcast %221 : f32 to vector<1x290xf32>
    %223 = arith.mulf %25, %222 : vector<1x290xf32>
    %224 = arith.addf %220, %223 : vector<1x290xf32>
    %c47 = arith.constant 47 : index
    %225 = memref.load %arg2[%c47] : memref<162xf32, #tpu.memory_space<smem>>
    %226 = vector.broadcast %225 : f32 to vector<1x290xf32>
    %227 = arith.mulf %26, %226 : vector<1x290xf32>
    %228 = arith.addf %224, %227 : vector<1x290xf32>
    %c48 = arith.constant 48 : index
    %229 = memref.load %arg2[%c48] : memref<162xf32, #tpu.memory_space<smem>>
    %230 = vector.broadcast %229 : f32 to vector<1x290xf32>
    %231 = arith.mulf %27, %230 : vector<1x290xf32>
    %232 = arith.addf %228, %231 : vector<1x290xf32>
    %c49 = arith.constant 49 : index
    %233 = memref.load %arg2[%c49] : memref<162xf32, #tpu.memory_space<smem>>
    %234 = vector.broadcast %233 : f32 to vector<1x290xf32>
    %235 = arith.mulf %28, %234 : vector<1x290xf32>
    %236 = arith.addf %232, %235 : vector<1x290xf32>
    %c50 = arith.constant 50 : index
    %237 = memref.load %arg2[%c50] : memref<162xf32, #tpu.memory_space<smem>>
    %238 = vector.broadcast %237 : f32 to vector<1x290xf32>
    %239 = arith.mulf %29, %238 : vector<1x290xf32>
    %240 = arith.addf %236, %239 : vector<1x290xf32>
    %c51 = arith.constant 51 : index
    %241 = memref.load %arg2[%c51] : memref<162xf32, #tpu.memory_space<smem>>
    %242 = vector.broadcast %241 : f32 to vector<1x290xf32>
    %243 = arith.mulf %30, %242 : vector<1x290xf32>
    %244 = arith.addf %240, %243 : vector<1x290xf32>
    %c52 = arith.constant 52 : index
    %245 = memref.load %arg2[%c52] : memref<162xf32, #tpu.memory_space<smem>>
    %246 = vector.broadcast %245 : f32 to vector<1x290xf32>
    %247 = arith.mulf %31, %246 : vector<1x290xf32>
    %248 = arith.addf %244, %247 : vector<1x290xf32>
    %c53 = arith.constant 53 : index
    %249 = memref.load %arg2[%c53] : memref<162xf32, #tpu.memory_space<smem>>
    %250 = vector.broadcast %249 : f32 to vector<1x290xf32>
    %251 = arith.mulf %32, %250 : vector<1x290xf32>
    %252 = arith.addf %248, %251 : vector<1x290xf32>
    %c2_11 = arith.constant 2 : index
    %253 = memref.load %arg3[%c2_11] : memref<6xf32, #tpu.memory_space<smem>>
    %254 = vector.broadcast %253 : f32 to vector<1x290xf32>
    %c54 = arith.constant 54 : index
    %255 = memref.load %arg2[%c54] : memref<162xf32, #tpu.memory_space<smem>>
    %256 = vector.broadcast %255 : f32 to vector<1x290xf32>
    %257 = arith.mulf %2, %256 : vector<1x290xf32>
    %258 = arith.addf %254, %257 : vector<1x290xf32>
    %c55 = arith.constant 55 : index
    %259 = memref.load %arg2[%c55] : memref<162xf32, #tpu.memory_space<smem>>
    %260 = vector.broadcast %259 : f32 to vector<1x290xf32>
    %261 = arith.mulf %3, %260 : vector<1x290xf32>
    %262 = arith.addf %258, %261 : vector<1x290xf32>
    %c56 = arith.constant 56 : index
    %263 = memref.load %arg2[%c56] : memref<162xf32, #tpu.memory_space<smem>>
    %264 = vector.broadcast %263 : f32 to vector<1x290xf32>
    %265 = arith.mulf %4, %264 : vector<1x290xf32>
    %266 = arith.addf %262, %265 : vector<1x290xf32>
    %c57 = arith.constant 57 : index
    %267 = memref.load %arg2[%c57] : memref<162xf32, #tpu.memory_space<smem>>
    %268 = vector.broadcast %267 : f32 to vector<1x290xf32>
    %269 = arith.mulf %5, %268 : vector<1x290xf32>
    %270 = arith.addf %266, %269 : vector<1x290xf32>
    %c58 = arith.constant 58 : index
    %271 = memref.load %arg2[%c58] : memref<162xf32, #tpu.memory_space<smem>>
    %272 = vector.broadcast %271 : f32 to vector<1x290xf32>
    %273 = arith.mulf %6, %272 : vector<1x290xf32>
    %274 = arith.addf %270, %273 : vector<1x290xf32>
    %c59 = arith.constant 59 : index
    %275 = memref.load %arg2[%c59] : memref<162xf32, #tpu.memory_space<smem>>
    %276 = vector.broadcast %275 : f32 to vector<1x290xf32>
    %277 = arith.mulf %7, %276 : vector<1x290xf32>
    %278 = arith.addf %274, %277 : vector<1x290xf32>
    %c60 = arith.constant 60 : index
    %279 = memref.load %arg2[%c60] : memref<162xf32, #tpu.memory_space<smem>>
    %280 = vector.broadcast %279 : f32 to vector<1x290xf32>
    %281 = arith.mulf %8, %280 : vector<1x290xf32>
    %282 = arith.addf %278, %281 : vector<1x290xf32>
    %c61 = arith.constant 61 : index
    %283 = memref.load %arg2[%c61] : memref<162xf32, #tpu.memory_space<smem>>
    %284 = vector.broadcast %283 : f32 to vector<1x290xf32>
    %285 = arith.mulf %9, %284 : vector<1x290xf32>
    %286 = arith.addf %282, %285 : vector<1x290xf32>
    %c62 = arith.constant 62 : index
    %287 = memref.load %arg2[%c62] : memref<162xf32, #tpu.memory_space<smem>>
    %288 = vector.broadcast %287 : f32 to vector<1x290xf32>
    %289 = arith.mulf %10, %288 : vector<1x290xf32>
    %290 = arith.addf %286, %289 : vector<1x290xf32>
    %c63 = arith.constant 63 : index
    %291 = memref.load %arg2[%c63] : memref<162xf32, #tpu.memory_space<smem>>
    %292 = vector.broadcast %291 : f32 to vector<1x290xf32>
    %293 = arith.mulf %13, %292 : vector<1x290xf32>
    %294 = arith.addf %290, %293 : vector<1x290xf32>
    %c64 = arith.constant 64 : index
    %295 = memref.load %arg2[%c64] : memref<162xf32, #tpu.memory_space<smem>>
    %296 = vector.broadcast %295 : f32 to vector<1x290xf32>
    %297 = arith.mulf %14, %296 : vector<1x290xf32>
    %298 = arith.addf %294, %297 : vector<1x290xf32>
    %c65 = arith.constant 65 : index
    %299 = memref.load %arg2[%c65] : memref<162xf32, #tpu.memory_space<smem>>
    %300 = vector.broadcast %299 : f32 to vector<1x290xf32>
    %301 = arith.mulf %15, %300 : vector<1x290xf32>
    %302 = arith.addf %298, %301 : vector<1x290xf32>
    %c66 = arith.constant 66 : index
    %303 = memref.load %arg2[%c66] : memref<162xf32, #tpu.memory_space<smem>>
    %304 = vector.broadcast %303 : f32 to vector<1x290xf32>
    %305 = arith.mulf %16, %304 : vector<1x290xf32>
    %306 = arith.addf %302, %305 : vector<1x290xf32>
    %c67 = arith.constant 67 : index
    %307 = memref.load %arg2[%c67] : memref<162xf32, #tpu.memory_space<smem>>
    %308 = vector.broadcast %307 : f32 to vector<1x290xf32>
    %309 = arith.mulf %17, %308 : vector<1x290xf32>
    %310 = arith.addf %306, %309 : vector<1x290xf32>
    %c68 = arith.constant 68 : index
    %311 = memref.load %arg2[%c68] : memref<162xf32, #tpu.memory_space<smem>>
    %312 = vector.broadcast %311 : f32 to vector<1x290xf32>
    %313 = arith.mulf %18, %312 : vector<1x290xf32>
    %314 = arith.addf %310, %313 : vector<1x290xf32>
    %c69 = arith.constant 69 : index
    %315 = memref.load %arg2[%c69] : memref<162xf32, #tpu.memory_space<smem>>
    %316 = vector.broadcast %315 : f32 to vector<1x290xf32>
    %317 = arith.mulf %19, %316 : vector<1x290xf32>
    %318 = arith.addf %314, %317 : vector<1x290xf32>
    %c70 = arith.constant 70 : index
    %319 = memref.load %arg2[%c70] : memref<162xf32, #tpu.memory_space<smem>>
    %320 = vector.broadcast %319 : f32 to vector<1x290xf32>
    %321 = arith.mulf %20, %320 : vector<1x290xf32>
    %322 = arith.addf %318, %321 : vector<1x290xf32>
    %c71 = arith.constant 71 : index
    %323 = memref.load %arg2[%c71] : memref<162xf32, #tpu.memory_space<smem>>
    %324 = vector.broadcast %323 : f32 to vector<1x290xf32>
    %325 = arith.mulf %21, %324 : vector<1x290xf32>
    %326 = arith.addf %322, %325 : vector<1x290xf32>
    %c72 = arith.constant 72 : index
    %327 = memref.load %arg2[%c72] : memref<162xf32, #tpu.memory_space<smem>>
    %328 = vector.broadcast %327 : f32 to vector<1x290xf32>
    %329 = arith.mulf %24, %328 : vector<1x290xf32>
    %330 = arith.addf %326, %329 : vector<1x290xf32>
    %c73 = arith.constant 73 : index
    %331 = memref.load %arg2[%c73] : memref<162xf32, #tpu.memory_space<smem>>
    %332 = vector.broadcast %331 : f32 to vector<1x290xf32>
    %333 = arith.mulf %25, %332 : vector<1x290xf32>
    %334 = arith.addf %330, %333 : vector<1x290xf32>
    %c74 = arith.constant 74 : index
    %335 = memref.load %arg2[%c74] : memref<162xf32, #tpu.memory_space<smem>>
    %336 = vector.broadcast %335 : f32 to vector<1x290xf32>
    %337 = arith.mulf %26, %336 : vector<1x290xf32>
    %338 = arith.addf %334, %337 : vector<1x290xf32>
    %c75 = arith.constant 75 : index
    %339 = memref.load %arg2[%c75] : memref<162xf32, #tpu.memory_space<smem>>
    %340 = vector.broadcast %339 : f32 to vector<1x290xf32>
    %341 = arith.mulf %27, %340 : vector<1x290xf32>
    %342 = arith.addf %338, %341 : vector<1x290xf32>
    %c76 = arith.constant 76 : index
    %343 = memref.load %arg2[%c76] : memref<162xf32, #tpu.memory_space<smem>>
    %344 = vector.broadcast %343 : f32 to vector<1x290xf32>
    %345 = arith.mulf %28, %344 : vector<1x290xf32>
    %346 = arith.addf %342, %345 : vector<1x290xf32>
    %c77 = arith.constant 77 : index
    %347 = memref.load %arg2[%c77] : memref<162xf32, #tpu.memory_space<smem>>
    %348 = vector.broadcast %347 : f32 to vector<1x290xf32>
    %349 = arith.mulf %29, %348 : vector<1x290xf32>
    %350 = arith.addf %346, %349 : vector<1x290xf32>
    %c78 = arith.constant 78 : index
    %351 = memref.load %arg2[%c78] : memref<162xf32, #tpu.memory_space<smem>>
    %352 = vector.broadcast %351 : f32 to vector<1x290xf32>
    %353 = arith.mulf %30, %352 : vector<1x290xf32>
    %354 = arith.addf %350, %353 : vector<1x290xf32>
    %c79 = arith.constant 79 : index
    %355 = memref.load %arg2[%c79] : memref<162xf32, #tpu.memory_space<smem>>
    %356 = vector.broadcast %355 : f32 to vector<1x290xf32>
    %357 = arith.mulf %31, %356 : vector<1x290xf32>
    %358 = arith.addf %354, %357 : vector<1x290xf32>
    %c80 = arith.constant 80 : index
    %359 = memref.load %arg2[%c80] : memref<162xf32, #tpu.memory_space<smem>>
    %360 = vector.broadcast %359 : f32 to vector<1x290xf32>
    %361 = arith.mulf %32, %360 : vector<1x290xf32>
    %362 = arith.addf %358, %361 : vector<1x290xf32>
    %c3_12 = arith.constant 3 : index
    %363 = memref.load %arg3[%c3_12] : memref<6xf32, #tpu.memory_space<smem>>
    %364 = vector.broadcast %363 : f32 to vector<1x290xf32>
    %c81 = arith.constant 81 : index
    %365 = memref.load %arg2[%c81] : memref<162xf32, #tpu.memory_space<smem>>
    %366 = vector.broadcast %365 : f32 to vector<1x290xf32>
    %367 = arith.mulf %2, %366 : vector<1x290xf32>
    %368 = arith.addf %364, %367 : vector<1x290xf32>
    %c82 = arith.constant 82 : index
    %369 = memref.load %arg2[%c82] : memref<162xf32, #tpu.memory_space<smem>>
    %370 = vector.broadcast %369 : f32 to vector<1x290xf32>
    %371 = arith.mulf %3, %370 : vector<1x290xf32>
    %372 = arith.addf %368, %371 : vector<1x290xf32>
    %c83 = arith.constant 83 : index
    %373 = memref.load %arg2[%c83] : memref<162xf32, #tpu.memory_space<smem>>
    %374 = vector.broadcast %373 : f32 to vector<1x290xf32>
    %375 = arith.mulf %4, %374 : vector<1x290xf32>
    %376 = arith.addf %372, %375 : vector<1x290xf32>
    %c84 = arith.constant 84 : index
    %377 = memref.load %arg2[%c84] : memref<162xf32, #tpu.memory_space<smem>>
    %378 = vector.broadcast %377 : f32 to vector<1x290xf32>
    %379 = arith.mulf %5, %378 : vector<1x290xf32>
    %380 = arith.addf %376, %379 : vector<1x290xf32>
    %c85 = arith.constant 85 : index
    %381 = memref.load %arg2[%c85] : memref<162xf32, #tpu.memory_space<smem>>
    %382 = vector.broadcast %381 : f32 to vector<1x290xf32>
    %383 = arith.mulf %6, %382 : vector<1x290xf32>
    %384 = arith.addf %380, %383 : vector<1x290xf32>
    %c86 = arith.constant 86 : index
    %385 = memref.load %arg2[%c86] : memref<162xf32, #tpu.memory_space<smem>>
    %386 = vector.broadcast %385 : f32 to vector<1x290xf32>
    %387 = arith.mulf %7, %386 : vector<1x290xf32>
    %388 = arith.addf %384, %387 : vector<1x290xf32>
    %c87 = arith.constant 87 : index
    %389 = memref.load %arg2[%c87] : memref<162xf32, #tpu.memory_space<smem>>
    %390 = vector.broadcast %389 : f32 to vector<1x290xf32>
    %391 = arith.mulf %8, %390 : vector<1x290xf32>
    %392 = arith.addf %388, %391 : vector<1x290xf32>
    %c88 = arith.constant 88 : index
    %393 = memref.load %arg2[%c88] : memref<162xf32, #tpu.memory_space<smem>>
    %394 = vector.broadcast %393 : f32 to vector<1x290xf32>
    %395 = arith.mulf %9, %394 : vector<1x290xf32>
    %396 = arith.addf %392, %395 : vector<1x290xf32>
    %c89 = arith.constant 89 : index
    %397 = memref.load %arg2[%c89] : memref<162xf32, #tpu.memory_space<smem>>
    %398 = vector.broadcast %397 : f32 to vector<1x290xf32>
    %399 = arith.mulf %10, %398 : vector<1x290xf32>
    %400 = arith.addf %396, %399 : vector<1x290xf32>
    %c90 = arith.constant 90 : index
    %401 = memref.load %arg2[%c90] : memref<162xf32, #tpu.memory_space<smem>>
    %402 = vector.broadcast %401 : f32 to vector<1x290xf32>
    %403 = arith.mulf %13, %402 : vector<1x290xf32>
    %404 = arith.addf %400, %403 : vector<1x290xf32>
    %c91 = arith.constant 91 : index
    %405 = memref.load %arg2[%c91] : memref<162xf32, #tpu.memory_space<smem>>
    %406 = vector.broadcast %405 : f32 to vector<1x290xf32>
    %407 = arith.mulf %14, %406 : vector<1x290xf32>
    %408 = arith.addf %404, %407 : vector<1x290xf32>
    %c92 = arith.constant 92 : index
    %409 = memref.load %arg2[%c92] : memref<162xf32, #tpu.memory_space<smem>>
    %410 = vector.broadcast %409 : f32 to vector<1x290xf32>
    %411 = arith.mulf %15, %410 : vector<1x290xf32>
    %412 = arith.addf %408, %411 : vector<1x290xf32>
    %c93 = arith.constant 93 : index
    %413 = memref.load %arg2[%c93] : memref<162xf32, #tpu.memory_space<smem>>
    %414 = vector.broadcast %413 : f32 to vector<1x290xf32>
    %415 = arith.mulf %16, %414 : vector<1x290xf32>
    %416 = arith.addf %412, %415 : vector<1x290xf32>
    %c94 = arith.constant 94 : index
    %417 = memref.load %arg2[%c94] : memref<162xf32, #tpu.memory_space<smem>>
    %418 = vector.broadcast %417 : f32 to vector<1x290xf32>
    %419 = arith.mulf %17, %418 : vector<1x290xf32>
    %420 = arith.addf %416, %419 : vector<1x290xf32>
    %c95 = arith.constant 95 : index
    %421 = memref.load %arg2[%c95] : memref<162xf32, #tpu.memory_space<smem>>
    %422 = vector.broadcast %421 : f32 to vector<1x290xf32>
    %423 = arith.mulf %18, %422 : vector<1x290xf32>
    %424 = arith.addf %420, %423 : vector<1x290xf32>
    %c96 = arith.constant 96 : index
    %425 = memref.load %arg2[%c96] : memref<162xf32, #tpu.memory_space<smem>>
    %426 = vector.broadcast %425 : f32 to vector<1x290xf32>
    %427 = arith.mulf %19, %426 : vector<1x290xf32>
    %428 = arith.addf %424, %427 : vector<1x290xf32>
    %c97 = arith.constant 97 : index
    %429 = memref.load %arg2[%c97] : memref<162xf32, #tpu.memory_space<smem>>
    %430 = vector.broadcast %429 : f32 to vector<1x290xf32>
    %431 = arith.mulf %20, %430 : vector<1x290xf32>
    %432 = arith.addf %428, %431 : vector<1x290xf32>
    %c98 = arith.constant 98 : index
    %433 = memref.load %arg2[%c98] : memref<162xf32, #tpu.memory_space<smem>>
    %434 = vector.broadcast %433 : f32 to vector<1x290xf32>
    %435 = arith.mulf %21, %434 : vector<1x290xf32>
    %436 = arith.addf %432, %435 : vector<1x290xf32>
    %c99 = arith.constant 99 : index
    %437 = memref.load %arg2[%c99] : memref<162xf32, #tpu.memory_space<smem>>
    %438 = vector.broadcast %437 : f32 to vector<1x290xf32>
    %439 = arith.mulf %24, %438 : vector<1x290xf32>
    %440 = arith.addf %436, %439 : vector<1x290xf32>
    %c100 = arith.constant 100 : index
    %441 = memref.load %arg2[%c100] : memref<162xf32, #tpu.memory_space<smem>>
    %442 = vector.broadcast %441 : f32 to vector<1x290xf32>
    %443 = arith.mulf %25, %442 : vector<1x290xf32>
    %444 = arith.addf %440, %443 : vector<1x290xf32>
    %c101 = arith.constant 101 : index
    %445 = memref.load %arg2[%c101] : memref<162xf32, #tpu.memory_space<smem>>
    %446 = vector.broadcast %445 : f32 to vector<1x290xf32>
    %447 = arith.mulf %26, %446 : vector<1x290xf32>
    %448 = arith.addf %444, %447 : vector<1x290xf32>
    %c102 = arith.constant 102 : index
    %449 = memref.load %arg2[%c102] : memref<162xf32, #tpu.memory_space<smem>>
    %450 = vector.broadcast %449 : f32 to vector<1x290xf32>
    %451 = arith.mulf %27, %450 : vector<1x290xf32>
    %452 = arith.addf %448, %451 : vector<1x290xf32>
    %c103 = arith.constant 103 : index
    %453 = memref.load %arg2[%c103] : memref<162xf32, #tpu.memory_space<smem>>
    %454 = vector.broadcast %453 : f32 to vector<1x290xf32>
    %455 = arith.mulf %28, %454 : vector<1x290xf32>
    %456 = arith.addf %452, %455 : vector<1x290xf32>
    %c104 = arith.constant 104 : index
    %457 = memref.load %arg2[%c104] : memref<162xf32, #tpu.memory_space<smem>>
    %458 = vector.broadcast %457 : f32 to vector<1x290xf32>
    %459 = arith.mulf %29, %458 : vector<1x290xf32>
    %460 = arith.addf %456, %459 : vector<1x290xf32>
    %c105 = arith.constant 105 : index
    %461 = memref.load %arg2[%c105] : memref<162xf32, #tpu.memory_space<smem>>
    %462 = vector.broadcast %461 : f32 to vector<1x290xf32>
    %463 = arith.mulf %30, %462 : vector<1x290xf32>
    %464 = arith.addf %460, %463 : vector<1x290xf32>
    %c106 = arith.constant 106 : index
    %465 = memref.load %arg2[%c106] : memref<162xf32, #tpu.memory_space<smem>>
    %466 = vector.broadcast %465 : f32 to vector<1x290xf32>
    %467 = arith.mulf %31, %466 : vector<1x290xf32>
    %468 = arith.addf %464, %467 : vector<1x290xf32>
    %c107 = arith.constant 107 : index
    %469 = memref.load %arg2[%c107] : memref<162xf32, #tpu.memory_space<smem>>
    %470 = vector.broadcast %469 : f32 to vector<1x290xf32>
    %471 = arith.mulf %32, %470 : vector<1x290xf32>
    %472 = arith.addf %468, %471 : vector<1x290xf32>
    %c4_13 = arith.constant 4 : index
    %473 = memref.load %arg3[%c4_13] : memref<6xf32, #tpu.memory_space<smem>>
    %474 = vector.broadcast %473 : f32 to vector<1x290xf32>
    %c108 = arith.constant 108 : index
    %475 = memref.load %arg2[%c108] : memref<162xf32, #tpu.memory_space<smem>>
    %476 = vector.broadcast %475 : f32 to vector<1x290xf32>
    %477 = arith.mulf %2, %476 : vector<1x290xf32>
    %478 = arith.addf %474, %477 : vector<1x290xf32>
    %c109 = arith.constant 109 : index
    %479 = memref.load %arg2[%c109] : memref<162xf32, #tpu.memory_space<smem>>
    %480 = vector.broadcast %479 : f32 to vector<1x290xf32>
    %481 = arith.mulf %3, %480 : vector<1x290xf32>
    %482 = arith.addf %478, %481 : vector<1x290xf32>
    %c110 = arith.constant 110 : index
    %483 = memref.load %arg2[%c110] : memref<162xf32, #tpu.memory_space<smem>>
    %484 = vector.broadcast %483 : f32 to vector<1x290xf32>
    %485 = arith.mulf %4, %484 : vector<1x290xf32>
    %486 = arith.addf %482, %485 : vector<1x290xf32>
    %c111 = arith.constant 111 : index
    %487 = memref.load %arg2[%c111] : memref<162xf32, #tpu.memory_space<smem>>
    %488 = vector.broadcast %487 : f32 to vector<1x290xf32>
    %489 = arith.mulf %5, %488 : vector<1x290xf32>
    %490 = arith.addf %486, %489 : vector<1x290xf32>
    %c112 = arith.constant 112 : index
    %491 = memref.load %arg2[%c112] : memref<162xf32, #tpu.memory_space<smem>>
    %492 = vector.broadcast %491 : f32 to vector<1x290xf32>
    %493 = arith.mulf %6, %492 : vector<1x290xf32>
    %494 = arith.addf %490, %493 : vector<1x290xf32>
    %c113 = arith.constant 113 : index
    %495 = memref.load %arg2[%c113] : memref<162xf32, #tpu.memory_space<smem>>
    %496 = vector.broadcast %495 : f32 to vector<1x290xf32>
    %497 = arith.mulf %7, %496 : vector<1x290xf32>
    %498 = arith.addf %494, %497 : vector<1x290xf32>
    %c114 = arith.constant 114 : index
    %499 = memref.load %arg2[%c114] : memref<162xf32, #tpu.memory_space<smem>>
    %500 = vector.broadcast %499 : f32 to vector<1x290xf32>
    %501 = arith.mulf %8, %500 : vector<1x290xf32>
    %502 = arith.addf %498, %501 : vector<1x290xf32>
    %c115 = arith.constant 115 : index
    %503 = memref.load %arg2[%c115] : memref<162xf32, #tpu.memory_space<smem>>
    %504 = vector.broadcast %503 : f32 to vector<1x290xf32>
    %505 = arith.mulf %9, %504 : vector<1x290xf32>
    %506 = arith.addf %502, %505 : vector<1x290xf32>
    %c116 = arith.constant 116 : index
    %507 = memref.load %arg2[%c116] : memref<162xf32, #tpu.memory_space<smem>>
    %508 = vector.broadcast %507 : f32 to vector<1x290xf32>
    %509 = arith.mulf %10, %508 : vector<1x290xf32>
    %510 = arith.addf %506, %509 : vector<1x290xf32>
    %c117 = arith.constant 117 : index
    %511 = memref.load %arg2[%c117] : memref<162xf32, #tpu.memory_space<smem>>
    %512 = vector.broadcast %511 : f32 to vector<1x290xf32>
    %513 = arith.mulf %13, %512 : vector<1x290xf32>
    %514 = arith.addf %510, %513 : vector<1x290xf32>
    %c118 = arith.constant 118 : index
    %515 = memref.load %arg2[%c118] : memref<162xf32, #tpu.memory_space<smem>>
    %516 = vector.broadcast %515 : f32 to vector<1x290xf32>
    %517 = arith.mulf %14, %516 : vector<1x290xf32>
    %518 = arith.addf %514, %517 : vector<1x290xf32>
    %c119 = arith.constant 119 : index
    %519 = memref.load %arg2[%c119] : memref<162xf32, #tpu.memory_space<smem>>
    %520 = vector.broadcast %519 : f32 to vector<1x290xf32>
    %521 = arith.mulf %15, %520 : vector<1x290xf32>
    %522 = arith.addf %518, %521 : vector<1x290xf32>
    %c120 = arith.constant 120 : index
    %523 = memref.load %arg2[%c120] : memref<162xf32, #tpu.memory_space<smem>>
    %524 = vector.broadcast %523 : f32 to vector<1x290xf32>
    %525 = arith.mulf %16, %524 : vector<1x290xf32>
    %526 = arith.addf %522, %525 : vector<1x290xf32>
    %c121 = arith.constant 121 : index
    %527 = memref.load %arg2[%c121] : memref<162xf32, #tpu.memory_space<smem>>
    %528 = vector.broadcast %527 : f32 to vector<1x290xf32>
    %529 = arith.mulf %17, %528 : vector<1x290xf32>
    %530 = arith.addf %526, %529 : vector<1x290xf32>
    %c122 = arith.constant 122 : index
    %531 = memref.load %arg2[%c122] : memref<162xf32, #tpu.memory_space<smem>>
    %532 = vector.broadcast %531 : f32 to vector<1x290xf32>
    %533 = arith.mulf %18, %532 : vector<1x290xf32>
    %534 = arith.addf %530, %533 : vector<1x290xf32>
    %c123 = arith.constant 123 : index
    %535 = memref.load %arg2[%c123] : memref<162xf32, #tpu.memory_space<smem>>
    %536 = vector.broadcast %535 : f32 to vector<1x290xf32>
    %537 = arith.mulf %19, %536 : vector<1x290xf32>
    %538 = arith.addf %534, %537 : vector<1x290xf32>
    %c124 = arith.constant 124 : index
    %539 = memref.load %arg2[%c124] : memref<162xf32, #tpu.memory_space<smem>>
    %540 = vector.broadcast %539 : f32 to vector<1x290xf32>
    %541 = arith.mulf %20, %540 : vector<1x290xf32>
    %542 = arith.addf %538, %541 : vector<1x290xf32>
    %c125 = arith.constant 125 : index
    %543 = memref.load %arg2[%c125] : memref<162xf32, #tpu.memory_space<smem>>
    %544 = vector.broadcast %543 : f32 to vector<1x290xf32>
    %545 = arith.mulf %21, %544 : vector<1x290xf32>
    %546 = arith.addf %542, %545 : vector<1x290xf32>
    %c126 = arith.constant 126 : index
    %547 = memref.load %arg2[%c126] : memref<162xf32, #tpu.memory_space<smem>>
    %548 = vector.broadcast %547 : f32 to vector<1x290xf32>
    %549 = arith.mulf %24, %548 : vector<1x290xf32>
    %550 = arith.addf %546, %549 : vector<1x290xf32>
    %c127 = arith.constant 127 : index
    %551 = memref.load %arg2[%c127] : memref<162xf32, #tpu.memory_space<smem>>
    %552 = vector.broadcast %551 : f32 to vector<1x290xf32>
    %553 = arith.mulf %25, %552 : vector<1x290xf32>
    %554 = arith.addf %550, %553 : vector<1x290xf32>
    %c128 = arith.constant 128 : index
    %555 = memref.load %arg2[%c128] : memref<162xf32, #tpu.memory_space<smem>>
    %556 = vector.broadcast %555 : f32 to vector<1x290xf32>
    %557 = arith.mulf %26, %556 : vector<1x290xf32>
    %558 = arith.addf %554, %557 : vector<1x290xf32>
    %c129 = arith.constant 129 : index
    %559 = memref.load %arg2[%c129] : memref<162xf32, #tpu.memory_space<smem>>
    %560 = vector.broadcast %559 : f32 to vector<1x290xf32>
    %561 = arith.mulf %27, %560 : vector<1x290xf32>
    %562 = arith.addf %558, %561 : vector<1x290xf32>
    %c130 = arith.constant 130 : index
    %563 = memref.load %arg2[%c130] : memref<162xf32, #tpu.memory_space<smem>>
    %564 = vector.broadcast %563 : f32 to vector<1x290xf32>
    %565 = arith.mulf %28, %564 : vector<1x290xf32>
    %566 = arith.addf %562, %565 : vector<1x290xf32>
    %c131 = arith.constant 131 : index
    %567 = memref.load %arg2[%c131] : memref<162xf32, #tpu.memory_space<smem>>
    %568 = vector.broadcast %567 : f32 to vector<1x290xf32>
    %569 = arith.mulf %29, %568 : vector<1x290xf32>
    %570 = arith.addf %566, %569 : vector<1x290xf32>
    %c132 = arith.constant 132 : index
    %571 = memref.load %arg2[%c132] : memref<162xf32, #tpu.memory_space<smem>>
    %572 = vector.broadcast %571 : f32 to vector<1x290xf32>
    %573 = arith.mulf %30, %572 : vector<1x290xf32>
    %574 = arith.addf %570, %573 : vector<1x290xf32>
    %c133 = arith.constant 133 : index
    %575 = memref.load %arg2[%c133] : memref<162xf32, #tpu.memory_space<smem>>
    %576 = vector.broadcast %575 : f32 to vector<1x290xf32>
    %577 = arith.mulf %31, %576 : vector<1x290xf32>
    %578 = arith.addf %574, %577 : vector<1x290xf32>
    %c134 = arith.constant 134 : index
    %579 = memref.load %arg2[%c134] : memref<162xf32, #tpu.memory_space<smem>>
    %580 = vector.broadcast %579 : f32 to vector<1x290xf32>
    %581 = arith.mulf %32, %580 : vector<1x290xf32>
    %582 = arith.addf %578, %581 : vector<1x290xf32>
    %c5_14 = arith.constant 5 : index
    %583 = memref.load %arg3[%c5_14] : memref<6xf32, #tpu.memory_space<smem>>
    %584 = vector.broadcast %583 : f32 to vector<1x290xf32>
    %c135 = arith.constant 135 : index
    %585 = memref.load %arg2[%c135] : memref<162xf32, #tpu.memory_space<smem>>
    %586 = vector.broadcast %585 : f32 to vector<1x290xf32>
    %587 = arith.mulf %2, %586 : vector<1x290xf32>
    %588 = arith.addf %584, %587 : vector<1x290xf32>
    %c136 = arith.constant 136 : index
    %589 = memref.load %arg2[%c136] : memref<162xf32, #tpu.memory_space<smem>>
    %590 = vector.broadcast %589 : f32 to vector<1x290xf32>
    %591 = arith.mulf %3, %590 : vector<1x290xf32>
    %592 = arith.addf %588, %591 : vector<1x290xf32>
    %c137 = arith.constant 137 : index
    %593 = memref.load %arg2[%c137] : memref<162xf32, #tpu.memory_space<smem>>
    %594 = vector.broadcast %593 : f32 to vector<1x290xf32>
    %595 = arith.mulf %4, %594 : vector<1x290xf32>
    %596 = arith.addf %592, %595 : vector<1x290xf32>
    %c138 = arith.constant 138 : index
    %597 = memref.load %arg2[%c138] : memref<162xf32, #tpu.memory_space<smem>>
    %598 = vector.broadcast %597 : f32 to vector<1x290xf32>
    %599 = arith.mulf %5, %598 : vector<1x290xf32>
    %600 = arith.addf %596, %599 : vector<1x290xf32>
    %c139 = arith.constant 139 : index
    %601 = memref.load %arg2[%c139] : memref<162xf32, #tpu.memory_space<smem>>
    %602 = vector.broadcast %601 : f32 to vector<1x290xf32>
    %603 = arith.mulf %6, %602 : vector<1x290xf32>
    %604 = arith.addf %600, %603 : vector<1x290xf32>
    %c140 = arith.constant 140 : index
    %605 = memref.load %arg2[%c140] : memref<162xf32, #tpu.memory_space<smem>>
    %606 = vector.broadcast %605 : f32 to vector<1x290xf32>
    %607 = arith.mulf %7, %606 : vector<1x290xf32>
    %608 = arith.addf %604, %607 : vector<1x290xf32>
    %c141 = arith.constant 141 : index
    %609 = memref.load %arg2[%c141] : memref<162xf32, #tpu.memory_space<smem>>
    %610 = vector.broadcast %609 : f32 to vector<1x290xf32>
    %611 = arith.mulf %8, %610 : vector<1x290xf32>
    %612 = arith.addf %608, %611 : vector<1x290xf32>
    %c142 = arith.constant 142 : index
    %613 = memref.load %arg2[%c142] : memref<162xf32, #tpu.memory_space<smem>>
    %614 = vector.broadcast %613 : f32 to vector<1x290xf32>
    %615 = arith.mulf %9, %614 : vector<1x290xf32>
    %616 = arith.addf %612, %615 : vector<1x290xf32>
    %c143 = arith.constant 143 : index
    %617 = memref.load %arg2[%c143] : memref<162xf32, #tpu.memory_space<smem>>
    %618 = vector.broadcast %617 : f32 to vector<1x290xf32>
    %619 = arith.mulf %10, %618 : vector<1x290xf32>
    %620 = arith.addf %616, %619 : vector<1x290xf32>
    %c144 = arith.constant 144 : index
    %621 = memref.load %arg2[%c144] : memref<162xf32, #tpu.memory_space<smem>>
    %622 = vector.broadcast %621 : f32 to vector<1x290xf32>
    %623 = arith.mulf %13, %622 : vector<1x290xf32>
    %624 = arith.addf %620, %623 : vector<1x290xf32>
    %c145 = arith.constant 145 : index
    %625 = memref.load %arg2[%c145] : memref<162xf32, #tpu.memory_space<smem>>
    %626 = vector.broadcast %625 : f32 to vector<1x290xf32>
    %627 = arith.mulf %14, %626 : vector<1x290xf32>
    %628 = arith.addf %624, %627 : vector<1x290xf32>
    %c146 = arith.constant 146 : index
    %629 = memref.load %arg2[%c146] : memref<162xf32, #tpu.memory_space<smem>>
    %630 = vector.broadcast %629 : f32 to vector<1x290xf32>
    %631 = arith.mulf %15, %630 : vector<1x290xf32>
    %632 = arith.addf %628, %631 : vector<1x290xf32>
    %c147 = arith.constant 147 : index
    %633 = memref.load %arg2[%c147] : memref<162xf32, #tpu.memory_space<smem>>
    %634 = vector.broadcast %633 : f32 to vector<1x290xf32>
    %635 = arith.mulf %16, %634 : vector<1x290xf32>
    %636 = arith.addf %632, %635 : vector<1x290xf32>
    %c148 = arith.constant 148 : index
    %637 = memref.load %arg2[%c148] : memref<162xf32, #tpu.memory_space<smem>>
    %638 = vector.broadcast %637 : f32 to vector<1x290xf32>
    %639 = arith.mulf %17, %638 : vector<1x290xf32>
    %640 = arith.addf %636, %639 : vector<1x290xf32>
    %c149 = arith.constant 149 : index
    %641 = memref.load %arg2[%c149] : memref<162xf32, #tpu.memory_space<smem>>
    %642 = vector.broadcast %641 : f32 to vector<1x290xf32>
    %643 = arith.mulf %18, %642 : vector<1x290xf32>
    %644 = arith.addf %640, %643 : vector<1x290xf32>
    %c150 = arith.constant 150 : index
    %645 = memref.load %arg2[%c150] : memref<162xf32, #tpu.memory_space<smem>>
    %646 = vector.broadcast %645 : f32 to vector<1x290xf32>
    %647 = arith.mulf %19, %646 : vector<1x290xf32>
    %648 = arith.addf %644, %647 : vector<1x290xf32>
    %c151 = arith.constant 151 : index
    %649 = memref.load %arg2[%c151] : memref<162xf32, #tpu.memory_space<smem>>
    %650 = vector.broadcast %649 : f32 to vector<1x290xf32>
    %651 = arith.mulf %20, %650 : vector<1x290xf32>
    %652 = arith.addf %648, %651 : vector<1x290xf32>
    %c152 = arith.constant 152 : index
    %653 = memref.load %arg2[%c152] : memref<162xf32, #tpu.memory_space<smem>>
    %654 = vector.broadcast %653 : f32 to vector<1x290xf32>
    %655 = arith.mulf %21, %654 : vector<1x290xf32>
    %656 = arith.addf %652, %655 : vector<1x290xf32>
    %c153 = arith.constant 153 : index
    %657 = memref.load %arg2[%c153] : memref<162xf32, #tpu.memory_space<smem>>
    %658 = vector.broadcast %657 : f32 to vector<1x290xf32>
    %659 = arith.mulf %24, %658 : vector<1x290xf32>
    %660 = arith.addf %656, %659 : vector<1x290xf32>
    %c154 = arith.constant 154 : index
    %661 = memref.load %arg2[%c154] : memref<162xf32, #tpu.memory_space<smem>>
    %662 = vector.broadcast %661 : f32 to vector<1x290xf32>
    %663 = arith.mulf %25, %662 : vector<1x290xf32>
    %664 = arith.addf %660, %663 : vector<1x290xf32>
    %c155 = arith.constant 155 : index
    %665 = memref.load %arg2[%c155] : memref<162xf32, #tpu.memory_space<smem>>
    %666 = vector.broadcast %665 : f32 to vector<1x290xf32>
    %667 = arith.mulf %26, %666 : vector<1x290xf32>
    %668 = arith.addf %664, %667 : vector<1x290xf32>
    %c156 = arith.constant 156 : index
    %669 = memref.load %arg2[%c156] : memref<162xf32, #tpu.memory_space<smem>>
    %670 = vector.broadcast %669 : f32 to vector<1x290xf32>
    %671 = arith.mulf %27, %670 : vector<1x290xf32>
    %672 = arith.addf %668, %671 : vector<1x290xf32>
    %c157 = arith.constant 157 : index
    %673 = memref.load %arg2[%c157] : memref<162xf32, #tpu.memory_space<smem>>
    %674 = vector.broadcast %673 : f32 to vector<1x290xf32>
    %675 = arith.mulf %28, %674 : vector<1x290xf32>
    %676 = arith.addf %672, %675 : vector<1x290xf32>
    %c158 = arith.constant 158 : index
    %677 = memref.load %arg2[%c158] : memref<162xf32, #tpu.memory_space<smem>>
    %678 = vector.broadcast %677 : f32 to vector<1x290xf32>
    %679 = arith.mulf %29, %678 : vector<1x290xf32>
    %680 = arith.addf %676, %679 : vector<1x290xf32>
    %c159 = arith.constant 159 : index
    %681 = memref.load %arg2[%c159] : memref<162xf32, #tpu.memory_space<smem>>
    %682 = vector.broadcast %681 : f32 to vector<1x290xf32>
    %683 = arith.mulf %30, %682 : vector<1x290xf32>
    %684 = arith.addf %680, %683 : vector<1x290xf32>
    %c160 = arith.constant 160 : index
    %685 = memref.load %arg2[%c160] : memref<162xf32, #tpu.memory_space<smem>>
    %686 = vector.broadcast %685 : f32 to vector<1x290xf32>
    %687 = arith.mulf %31, %686 : vector<1x290xf32>
    %688 = arith.addf %684, %687 : vector<1x290xf32>
    %c161 = arith.constant 161 : index
    %689 = memref.load %arg2[%c161] : memref<162xf32, #tpu.memory_space<smem>>
    %690 = vector.broadcast %689 : f32 to vector<1x290xf32>
    %691 = arith.mulf %32, %690 : vector<1x290xf32>
    %692 = arith.addf %688, %691 : vector<1x290xf32>
    %693 = vector.extract_strided_slice %142 {offsets = [0, 0], sizes = [1, 256], strides = [1, 1]} : vector<1x290xf32> to vector<1x256xf32>
    %694 = vector.extract_strided_slice %142 {offsets = [0, 1], sizes = [1, 256], strides = [1, 1]} : vector<1x290xf32> to vector<1x256xf32>
    %695 = vector.extract_strided_slice %142 {offsets = [0, 2], sizes = [1, 256], strides = [1, 1]} : vector<1x290xf32> to vector<1x256xf32>
    %696 = vector.extract_strided_slice %142 {offsets = [0, 16], sizes = [1, 256], strides = [1, 1]} : vector<1x290xf32> to vector<1x256xf32>
    %697 = vector.extract_strided_slice %142 {offsets = [0, 17], sizes = [1, 256], strides = [1, 1]} : vector<1x290xf32> to vector<1x256xf32>
    %698 = vector.extract_strided_slice %142 {offsets = [0, 18], sizes = [1, 256], strides = [1, 1]} : vector<1x290xf32> to vector<1x256xf32>
    %699 = vector.extract_strided_slice %142 {offsets = [0, 32], sizes = [1, 256], strides = [1, 1]} : vector<1x290xf32> to vector<1x256xf32>
    %700 = vector.extract_strided_slice %142 {offsets = [0, 33], sizes = [1, 256], strides = [1, 1]} : vector<1x290xf32> to vector<1x256xf32>
    %701 = vector.extract_strided_slice %142 {offsets = [0, 34], sizes = [1, 256], strides = [1, 1]} : vector<1x290xf32> to vector<1x256xf32>
    %702 = vector.extract_strided_slice %252 {offsets = [0, 0], sizes = [1, 256], strides = [1, 1]} : vector<1x290xf32> to vector<1x256xf32>
    %703 = vector.extract_strided_slice %252 {offsets = [0, 1], sizes = [1, 256], strides = [1, 1]} : vector<1x290xf32> to vector<1x256xf32>
    %704 = vector.extract_strided_slice %252 {offsets = [0, 2], sizes = [1, 256], strides = [1, 1]} : vector<1x290xf32> to vector<1x256xf32>
    %705 = vector.extract_strided_slice %252 {offsets = [0, 16], sizes = [1, 256], strides = [1, 1]} : vector<1x290xf32> to vector<1x256xf32>
    %706 = vector.extract_strided_slice %252 {offsets = [0, 17], sizes = [1, 256], strides = [1, 1]} : vector<1x290xf32> to vector<1x256xf32>
    %707 = vector.extract_strided_slice %252 {offsets = [0, 18], sizes = [1, 256], strides = [1, 1]} : vector<1x290xf32> to vector<1x256xf32>
    %708 = vector.extract_strided_slice %252 {offsets = [0, 32], sizes = [1, 256], strides = [1, 1]} : vector<1x290xf32> to vector<1x256xf32>
    %709 = vector.extract_strided_slice %252 {offsets = [0, 33], sizes = [1, 256], strides = [1, 1]} : vector<1x290xf32> to vector<1x256xf32>
    %710 = vector.extract_strided_slice %252 {offsets = [0, 34], sizes = [1, 256], strides = [1, 1]} : vector<1x290xf32> to vector<1x256xf32>
    %711 = vector.extract_strided_slice %362 {offsets = [0, 0], sizes = [1, 256], strides = [1, 1]} : vector<1x290xf32> to vector<1x256xf32>
    %712 = vector.extract_strided_slice %362 {offsets = [0, 1], sizes = [1, 256], strides = [1, 1]} : vector<1x290xf32> to vector<1x256xf32>
    %713 = vector.extract_strided_slice %362 {offsets = [0, 2], sizes = [1, 256], strides = [1, 1]} : vector<1x290xf32> to vector<1x256xf32>
    %714 = vector.extract_strided_slice %362 {offsets = [0, 16], sizes = [1, 256], strides = [1, 1]} : vector<1x290xf32> to vector<1x256xf32>
    %715 = vector.extract_strided_slice %362 {offsets = [0, 17], sizes = [1, 256], strides = [1, 1]} : vector<1x290xf32> to vector<1x256xf32>
    %716 = vector.extract_strided_slice %362 {offsets = [0, 18], sizes = [1, 256], strides = [1, 1]} : vector<1x290xf32> to vector<1x256xf32>
    %717 = vector.extract_strided_slice %362 {offsets = [0, 32], sizes = [1, 256], strides = [1, 1]} : vector<1x290xf32> to vector<1x256xf32>
    %718 = vector.extract_strided_slice %362 {offsets = [0, 33], sizes = [1, 256], strides = [1, 1]} : vector<1x290xf32> to vector<1x256xf32>
    %719 = vector.extract_strided_slice %362 {offsets = [0, 34], sizes = [1, 256], strides = [1, 1]} : vector<1x290xf32> to vector<1x256xf32>
    %720 = vector.extract_strided_slice %472 {offsets = [0, 0], sizes = [1, 256], strides = [1, 1]} : vector<1x290xf32> to vector<1x256xf32>
    %721 = vector.extract_strided_slice %472 {offsets = [0, 1], sizes = [1, 256], strides = [1, 1]} : vector<1x290xf32> to vector<1x256xf32>
    %722 = vector.extract_strided_slice %472 {offsets = [0, 2], sizes = [1, 256], strides = [1, 1]} : vector<1x290xf32> to vector<1x256xf32>
    %723 = vector.extract_strided_slice %472 {offsets = [0, 16], sizes = [1, 256], strides = [1, 1]} : vector<1x290xf32> to vector<1x256xf32>
    %724 = vector.extract_strided_slice %472 {offsets = [0, 17], sizes = [1, 256], strides = [1, 1]} : vector<1x290xf32> to vector<1x256xf32>
    %725 = vector.extract_strided_slice %472 {offsets = [0, 18], sizes = [1, 256], strides = [1, 1]} : vector<1x290xf32> to vector<1x256xf32>
    %726 = vector.extract_strided_slice %472 {offsets = [0, 32], sizes = [1, 256], strides = [1, 1]} : vector<1x290xf32> to vector<1x256xf32>
    %727 = vector.extract_strided_slice %472 {offsets = [0, 33], sizes = [1, 256], strides = [1, 1]} : vector<1x290xf32> to vector<1x256xf32>
    %728 = vector.extract_strided_slice %472 {offsets = [0, 34], sizes = [1, 256], strides = [1, 1]} : vector<1x290xf32> to vector<1x256xf32>
    %729 = vector.extract_strided_slice %582 {offsets = [0, 0], sizes = [1, 256], strides = [1, 1]} : vector<1x290xf32> to vector<1x256xf32>
    %730 = vector.extract_strided_slice %582 {offsets = [0, 1], sizes = [1, 256], strides = [1, 1]} : vector<1x290xf32> to vector<1x256xf32>
    %731 = vector.extract_strided_slice %582 {offsets = [0, 2], sizes = [1, 256], strides = [1, 1]} : vector<1x290xf32> to vector<1x256xf32>
    %732 = vector.extract_strided_slice %582 {offsets = [0, 16], sizes = [1, 256], strides = [1, 1]} : vector<1x290xf32> to vector<1x256xf32>
    %733 = vector.extract_strided_slice %582 {offsets = [0, 17], sizes = [1, 256], strides = [1, 1]} : vector<1x290xf32> to vector<1x256xf32>
    %734 = vector.extract_strided_slice %582 {offsets = [0, 18], sizes = [1, 256], strides = [1, 1]} : vector<1x290xf32> to vector<1x256xf32>
    %735 = vector.extract_strided_slice %582 {offsets = [0, 32], sizes = [1, 256], strides = [1, 1]} : vector<1x290xf32> to vector<1x256xf32>
    %736 = vector.extract_strided_slice %582 {offsets = [0, 33], sizes = [1, 256], strides = [1, 1]} : vector<1x290xf32> to vector<1x256xf32>
    %737 = vector.extract_strided_slice %582 {offsets = [0, 34], sizes = [1, 256], strides = [1, 1]} : vector<1x290xf32> to vector<1x256xf32>
    %738 = vector.extract_strided_slice %692 {offsets = [0, 0], sizes = [1, 256], strides = [1, 1]} : vector<1x290xf32> to vector<1x256xf32>
    %739 = vector.extract_strided_slice %692 {offsets = [0, 1], sizes = [1, 256], strides = [1, 1]} : vector<1x290xf32> to vector<1x256xf32>
    %740 = vector.extract_strided_slice %692 {offsets = [0, 2], sizes = [1, 256], strides = [1, 1]} : vector<1x290xf32> to vector<1x256xf32>
    %741 = vector.extract_strided_slice %692 {offsets = [0, 16], sizes = [1, 256], strides = [1, 1]} : vector<1x290xf32> to vector<1x256xf32>
    %742 = vector.extract_strided_slice %692 {offsets = [0, 17], sizes = [1, 256], strides = [1, 1]} : vector<1x290xf32> to vector<1x256xf32>
    %743 = vector.extract_strided_slice %692 {offsets = [0, 18], sizes = [1, 256], strides = [1, 1]} : vector<1x290xf32> to vector<1x256xf32>
    %744 = vector.extract_strided_slice %692 {offsets = [0, 32], sizes = [1, 256], strides = [1, 1]} : vector<1x290xf32> to vector<1x256xf32>
    %745 = vector.extract_strided_slice %692 {offsets = [0, 33], sizes = [1, 256], strides = [1, 1]} : vector<1x290xf32> to vector<1x256xf32>
    %746 = vector.extract_strided_slice %692 {offsets = [0, 34], sizes = [1, 256], strides = [1, 1]} : vector<1x290xf32> to vector<1x256xf32>
    %c0_15 = arith.constant 0 : index
    %747 = memref.load %arg5[%c0_15] : memref<3xf32, #tpu.memory_space<smem>>
    %748 = vector.broadcast %747 : f32 to vector<1x256xf32>
    %c0_16 = arith.constant 0 : index
    %749 = memref.load %arg4[%c0_16] : memref<162xf32, #tpu.memory_space<smem>>
    %750 = vector.broadcast %749 : f32 to vector<1x256xf32>
    %751 = arith.mulf %693, %750 : vector<1x256xf32>
    %752 = arith.addf %748, %751 : vector<1x256xf32>
    %c1_17 = arith.constant 1 : index
    %753 = memref.load %arg4[%c1_17] : memref<162xf32, #tpu.memory_space<smem>>
    %754 = vector.broadcast %753 : f32 to vector<1x256xf32>
    %755 = arith.mulf %694, %754 : vector<1x256xf32>
    %756 = arith.addf %752, %755 : vector<1x256xf32>
    %c2_18 = arith.constant 2 : index
    %757 = memref.load %arg4[%c2_18] : memref<162xf32, #tpu.memory_space<smem>>
    %758 = vector.broadcast %757 : f32 to vector<1x256xf32>
    %759 = arith.mulf %695, %758 : vector<1x256xf32>
    %760 = arith.addf %756, %759 : vector<1x256xf32>
    %c3_19 = arith.constant 3 : index
    %761 = memref.load %arg4[%c3_19] : memref<162xf32, #tpu.memory_space<smem>>
    %762 = vector.broadcast %761 : f32 to vector<1x256xf32>
    %763 = arith.mulf %696, %762 : vector<1x256xf32>
    %764 = arith.addf %760, %763 : vector<1x256xf32>
    %c4_20 = arith.constant 4 : index
    %765 = memref.load %arg4[%c4_20] : memref<162xf32, #tpu.memory_space<smem>>
    %766 = vector.broadcast %765 : f32 to vector<1x256xf32>
    %767 = arith.mulf %697, %766 : vector<1x256xf32>
    %768 = arith.addf %764, %767 : vector<1x256xf32>
    %c5_21 = arith.constant 5 : index
    %769 = memref.load %arg4[%c5_21] : memref<162xf32, #tpu.memory_space<smem>>
    %770 = vector.broadcast %769 : f32 to vector<1x256xf32>
    %771 = arith.mulf %698, %770 : vector<1x256xf32>
    %772 = arith.addf %768, %771 : vector<1x256xf32>
    %c6_22 = arith.constant 6 : index
    %773 = memref.load %arg4[%c6_22] : memref<162xf32, #tpu.memory_space<smem>>
    %774 = vector.broadcast %773 : f32 to vector<1x256xf32>
    %775 = arith.mulf %699, %774 : vector<1x256xf32>
    %776 = arith.addf %772, %775 : vector<1x256xf32>
    %c7_23 = arith.constant 7 : index
    %777 = memref.load %arg4[%c7_23] : memref<162xf32, #tpu.memory_space<smem>>
    %778 = vector.broadcast %777 : f32 to vector<1x256xf32>
    %779 = arith.mulf %700, %778 : vector<1x256xf32>
    %780 = arith.addf %776, %779 : vector<1x256xf32>
    %c8_24 = arith.constant 8 : index
    %781 = memref.load %arg4[%c8_24] : memref<162xf32, #tpu.memory_space<smem>>
    %782 = vector.broadcast %781 : f32 to vector<1x256xf32>
    %783 = arith.mulf %701, %782 : vector<1x256xf32>
    %784 = arith.addf %780, %783 : vector<1x256xf32>
    %c9_25 = arith.constant 9 : index
    %785 = memref.load %arg4[%c9_25] : memref<162xf32, #tpu.memory_space<smem>>
    %786 = vector.broadcast %785 : f32 to vector<1x256xf32>
    %787 = arith.mulf %702, %786 : vector<1x256xf32>
    %788 = arith.addf %784, %787 : vector<1x256xf32>
    %c10_26 = arith.constant 10 : index
    %789 = memref.load %arg4[%c10_26] : memref<162xf32, #tpu.memory_space<smem>>
    %790 = vector.broadcast %789 : f32 to vector<1x256xf32>
    %791 = arith.mulf %703, %790 : vector<1x256xf32>
    %792 = arith.addf %788, %791 : vector<1x256xf32>
    %c11_27 = arith.constant 11 : index
    %793 = memref.load %arg4[%c11_27] : memref<162xf32, #tpu.memory_space<smem>>
    %794 = vector.broadcast %793 : f32 to vector<1x256xf32>
    %795 = arith.mulf %704, %794 : vector<1x256xf32>
    %796 = arith.addf %792, %795 : vector<1x256xf32>
    %c12_28 = arith.constant 12 : index
    %797 = memref.load %arg4[%c12_28] : memref<162xf32, #tpu.memory_space<smem>>
    %798 = vector.broadcast %797 : f32 to vector<1x256xf32>
    %799 = arith.mulf %705, %798 : vector<1x256xf32>
    %800 = arith.addf %796, %799 : vector<1x256xf32>
    %c13_29 = arith.constant 13 : index
    %801 = memref.load %arg4[%c13_29] : memref<162xf32, #tpu.memory_space<smem>>
    %802 = vector.broadcast %801 : f32 to vector<1x256xf32>
    %803 = arith.mulf %706, %802 : vector<1x256xf32>
    %804 = arith.addf %800, %803 : vector<1x256xf32>
    %c14_30 = arith.constant 14 : index
    %805 = memref.load %arg4[%c14_30] : memref<162xf32, #tpu.memory_space<smem>>
    %806 = vector.broadcast %805 : f32 to vector<1x256xf32>
    %807 = arith.mulf %707, %806 : vector<1x256xf32>
    %808 = arith.addf %804, %807 : vector<1x256xf32>
    %c15_31 = arith.constant 15 : index
    %809 = memref.load %arg4[%c15_31] : memref<162xf32, #tpu.memory_space<smem>>
    %810 = vector.broadcast %809 : f32 to vector<1x256xf32>
    %811 = arith.mulf %708, %810 : vector<1x256xf32>
    %812 = arith.addf %808, %811 : vector<1x256xf32>
    %c16_32 = arith.constant 16 : index
    %813 = memref.load %arg4[%c16_32] : memref<162xf32, #tpu.memory_space<smem>>
    %814 = vector.broadcast %813 : f32 to vector<1x256xf32>
    %815 = arith.mulf %709, %814 : vector<1x256xf32>
    %816 = arith.addf %812, %815 : vector<1x256xf32>
    %c17_33 = arith.constant 17 : index
    %817 = memref.load %arg4[%c17_33] : memref<162xf32, #tpu.memory_space<smem>>
    %818 = vector.broadcast %817 : f32 to vector<1x256xf32>
    %819 = arith.mulf %710, %818 : vector<1x256xf32>
    %820 = arith.addf %816, %819 : vector<1x256xf32>
    %c18_34 = arith.constant 18 : index
    %821 = memref.load %arg4[%c18_34] : memref<162xf32, #tpu.memory_space<smem>>
    %822 = vector.broadcast %821 : f32 to vector<1x256xf32>
    %823 = arith.mulf %711, %822 : vector<1x256xf32>
    %824 = arith.addf %820, %823 : vector<1x256xf32>
    %c19_35 = arith.constant 19 : index
    %825 = memref.load %arg4[%c19_35] : memref<162xf32, #tpu.memory_space<smem>>
    %826 = vector.broadcast %825 : f32 to vector<1x256xf32>
    %827 = arith.mulf %712, %826 : vector<1x256xf32>
    %828 = arith.addf %824, %827 : vector<1x256xf32>
    %c20_36 = arith.constant 20 : index
    %829 = memref.load %arg4[%c20_36] : memref<162xf32, #tpu.memory_space<smem>>
    %830 = vector.broadcast %829 : f32 to vector<1x256xf32>
    %831 = arith.mulf %713, %830 : vector<1x256xf32>
    %832 = arith.addf %828, %831 : vector<1x256xf32>
    %c21_37 = arith.constant 21 : index
    %833 = memref.load %arg4[%c21_37] : memref<162xf32, #tpu.memory_space<smem>>
    %834 = vector.broadcast %833 : f32 to vector<1x256xf32>
    %835 = arith.mulf %714, %834 : vector<1x256xf32>
    %836 = arith.addf %832, %835 : vector<1x256xf32>
    %c22_38 = arith.constant 22 : index
    %837 = memref.load %arg4[%c22_38] : memref<162xf32, #tpu.memory_space<smem>>
    %838 = vector.broadcast %837 : f32 to vector<1x256xf32>
    %839 = arith.mulf %715, %838 : vector<1x256xf32>
    %840 = arith.addf %836, %839 : vector<1x256xf32>
    %c23_39 = arith.constant 23 : index
    %841 = memref.load %arg4[%c23_39] : memref<162xf32, #tpu.memory_space<smem>>
    %842 = vector.broadcast %841 : f32 to vector<1x256xf32>
    %843 = arith.mulf %716, %842 : vector<1x256xf32>
    %844 = arith.addf %840, %843 : vector<1x256xf32>
    %c24_40 = arith.constant 24 : index
    %845 = memref.load %arg4[%c24_40] : memref<162xf32, #tpu.memory_space<smem>>
    %846 = vector.broadcast %845 : f32 to vector<1x256xf32>
    %847 = arith.mulf %717, %846 : vector<1x256xf32>
    %848 = arith.addf %844, %847 : vector<1x256xf32>
    %c25_41 = arith.constant 25 : index
    %849 = memref.load %arg4[%c25_41] : memref<162xf32, #tpu.memory_space<smem>>
    %850 = vector.broadcast %849 : f32 to vector<1x256xf32>
    %851 = arith.mulf %718, %850 : vector<1x256xf32>
    %852 = arith.addf %848, %851 : vector<1x256xf32>
    %c26_42 = arith.constant 26 : index
    %853 = memref.load %arg4[%c26_42] : memref<162xf32, #tpu.memory_space<smem>>
    %854 = vector.broadcast %853 : f32 to vector<1x256xf32>
    %855 = arith.mulf %719, %854 : vector<1x256xf32>
    %856 = arith.addf %852, %855 : vector<1x256xf32>
    %c27_43 = arith.constant 27 : index
    %857 = memref.load %arg4[%c27_43] : memref<162xf32, #tpu.memory_space<smem>>
    %858 = vector.broadcast %857 : f32 to vector<1x256xf32>
    %859 = arith.mulf %720, %858 : vector<1x256xf32>
    %860 = arith.addf %856, %859 : vector<1x256xf32>
    %c28_44 = arith.constant 28 : index
    %861 = memref.load %arg4[%c28_44] : memref<162xf32, #tpu.memory_space<smem>>
    %862 = vector.broadcast %861 : f32 to vector<1x256xf32>
    %863 = arith.mulf %721, %862 : vector<1x256xf32>
    %864 = arith.addf %860, %863 : vector<1x256xf32>
    %c29_45 = arith.constant 29 : index
    %865 = memref.load %arg4[%c29_45] : memref<162xf32, #tpu.memory_space<smem>>
    %866 = vector.broadcast %865 : f32 to vector<1x256xf32>
    %867 = arith.mulf %722, %866 : vector<1x256xf32>
    %868 = arith.addf %864, %867 : vector<1x256xf32>
    %c30_46 = arith.constant 30 : index
    %869 = memref.load %arg4[%c30_46] : memref<162xf32, #tpu.memory_space<smem>>
    %870 = vector.broadcast %869 : f32 to vector<1x256xf32>
    %871 = arith.mulf %723, %870 : vector<1x256xf32>
    %872 = arith.addf %868, %871 : vector<1x256xf32>
    %c31_47 = arith.constant 31 : index
    %873 = memref.load %arg4[%c31_47] : memref<162xf32, #tpu.memory_space<smem>>
    %874 = vector.broadcast %873 : f32 to vector<1x256xf32>
    %875 = arith.mulf %724, %874 : vector<1x256xf32>
    %876 = arith.addf %872, %875 : vector<1x256xf32>
    %c32_48 = arith.constant 32 : index
    %877 = memref.load %arg4[%c32_48] : memref<162xf32, #tpu.memory_space<smem>>
    %878 = vector.broadcast %877 : f32 to vector<1x256xf32>
    %879 = arith.mulf %725, %878 : vector<1x256xf32>
    %880 = arith.addf %876, %879 : vector<1x256xf32>
    %c33_49 = arith.constant 33 : index
    %881 = memref.load %arg4[%c33_49] : memref<162xf32, #tpu.memory_space<smem>>
    %882 = vector.broadcast %881 : f32 to vector<1x256xf32>
    %883 = arith.mulf %726, %882 : vector<1x256xf32>
    %884 = arith.addf %880, %883 : vector<1x256xf32>
    %c34_50 = arith.constant 34 : index
    %885 = memref.load %arg4[%c34_50] : memref<162xf32, #tpu.memory_space<smem>>
    %886 = vector.broadcast %885 : f32 to vector<1x256xf32>
    %887 = arith.mulf %727, %886 : vector<1x256xf32>
    %888 = arith.addf %884, %887 : vector<1x256xf32>
    %c35_51 = arith.constant 35 : index
    %889 = memref.load %arg4[%c35_51] : memref<162xf32, #tpu.memory_space<smem>>
    %890 = vector.broadcast %889 : f32 to vector<1x256xf32>
    %891 = arith.mulf %728, %890 : vector<1x256xf32>
    %892 = arith.addf %888, %891 : vector<1x256xf32>
    %c36_52 = arith.constant 36 : index
    %893 = memref.load %arg4[%c36_52] : memref<162xf32, #tpu.memory_space<smem>>
    %894 = vector.broadcast %893 : f32 to vector<1x256xf32>
    %895 = arith.mulf %729, %894 : vector<1x256xf32>
    %896 = arith.addf %892, %895 : vector<1x256xf32>
    %c37_53 = arith.constant 37 : index
    %897 = memref.load %arg4[%c37_53] : memref<162xf32, #tpu.memory_space<smem>>
    %898 = vector.broadcast %897 : f32 to vector<1x256xf32>
    %899 = arith.mulf %730, %898 : vector<1x256xf32>
    %900 = arith.addf %896, %899 : vector<1x256xf32>
    %c38_54 = arith.constant 38 : index
    %901 = memref.load %arg4[%c38_54] : memref<162xf32, #tpu.memory_space<smem>>
    %902 = vector.broadcast %901 : f32 to vector<1x256xf32>
    %903 = arith.mulf %731, %902 : vector<1x256xf32>
    %904 = arith.addf %900, %903 : vector<1x256xf32>
    %c39_55 = arith.constant 39 : index
    %905 = memref.load %arg4[%c39_55] : memref<162xf32, #tpu.memory_space<smem>>
    %906 = vector.broadcast %905 : f32 to vector<1x256xf32>
    %907 = arith.mulf %732, %906 : vector<1x256xf32>
    %908 = arith.addf %904, %907 : vector<1x256xf32>
    %c40_56 = arith.constant 40 : index
    %909 = memref.load %arg4[%c40_56] : memref<162xf32, #tpu.memory_space<smem>>
    %910 = vector.broadcast %909 : f32 to vector<1x256xf32>
    %911 = arith.mulf %733, %910 : vector<1x256xf32>
    %912 = arith.addf %908, %911 : vector<1x256xf32>
    %c41_57 = arith.constant 41 : index
    %913 = memref.load %arg4[%c41_57] : memref<162xf32, #tpu.memory_space<smem>>
    %914 = vector.broadcast %913 : f32 to vector<1x256xf32>
    %915 = arith.mulf %734, %914 : vector<1x256xf32>
    %916 = arith.addf %912, %915 : vector<1x256xf32>
    %c42_58 = arith.constant 42 : index
    %917 = memref.load %arg4[%c42_58] : memref<162xf32, #tpu.memory_space<smem>>
    %918 = vector.broadcast %917 : f32 to vector<1x256xf32>
    %919 = arith.mulf %735, %918 : vector<1x256xf32>
    %920 = arith.addf %916, %919 : vector<1x256xf32>
    %c43_59 = arith.constant 43 : index
    %921 = memref.load %arg4[%c43_59] : memref<162xf32, #tpu.memory_space<smem>>
    %922 = vector.broadcast %921 : f32 to vector<1x256xf32>
    %923 = arith.mulf %736, %922 : vector<1x256xf32>
    %924 = arith.addf %920, %923 : vector<1x256xf32>
    %c44_60 = arith.constant 44 : index
    %925 = memref.load %arg4[%c44_60] : memref<162xf32, #tpu.memory_space<smem>>
    %926 = vector.broadcast %925 : f32 to vector<1x256xf32>
    %927 = arith.mulf %737, %926 : vector<1x256xf32>
    %928 = arith.addf %924, %927 : vector<1x256xf32>
    %c45_61 = arith.constant 45 : index
    %929 = memref.load %arg4[%c45_61] : memref<162xf32, #tpu.memory_space<smem>>
    %930 = vector.broadcast %929 : f32 to vector<1x256xf32>
    %931 = arith.mulf %738, %930 : vector<1x256xf32>
    %932 = arith.addf %928, %931 : vector<1x256xf32>
    %c46_62 = arith.constant 46 : index
    %933 = memref.load %arg4[%c46_62] : memref<162xf32, #tpu.memory_space<smem>>
    %934 = vector.broadcast %933 : f32 to vector<1x256xf32>
    %935 = arith.mulf %739, %934 : vector<1x256xf32>
    %936 = arith.addf %932, %935 : vector<1x256xf32>
    %c47_63 = arith.constant 47 : index
    %937 = memref.load %arg4[%c47_63] : memref<162xf32, #tpu.memory_space<smem>>
    %938 = vector.broadcast %937 : f32 to vector<1x256xf32>
    %939 = arith.mulf %740, %938 : vector<1x256xf32>
    %940 = arith.addf %936, %939 : vector<1x256xf32>
    %c48_64 = arith.constant 48 : index
    %941 = memref.load %arg4[%c48_64] : memref<162xf32, #tpu.memory_space<smem>>
    %942 = vector.broadcast %941 : f32 to vector<1x256xf32>
    %943 = arith.mulf %741, %942 : vector<1x256xf32>
    %944 = arith.addf %940, %943 : vector<1x256xf32>
    %c49_65 = arith.constant 49 : index
    %945 = memref.load %arg4[%c49_65] : memref<162xf32, #tpu.memory_space<smem>>
    %946 = vector.broadcast %945 : f32 to vector<1x256xf32>
    %947 = arith.mulf %742, %946 : vector<1x256xf32>
    %948 = arith.addf %944, %947 : vector<1x256xf32>
    %c50_66 = arith.constant 50 : index
    %949 = memref.load %arg4[%c50_66] : memref<162xf32, #tpu.memory_space<smem>>
    %950 = vector.broadcast %949 : f32 to vector<1x256xf32>
    %951 = arith.mulf %743, %950 : vector<1x256xf32>
    %952 = arith.addf %948, %951 : vector<1x256xf32>
    %c51_67 = arith.constant 51 : index
    %953 = memref.load %arg4[%c51_67] : memref<162xf32, #tpu.memory_space<smem>>
    %954 = vector.broadcast %953 : f32 to vector<1x256xf32>
    %955 = arith.mulf %744, %954 : vector<1x256xf32>
    %956 = arith.addf %952, %955 : vector<1x256xf32>
    %c52_68 = arith.constant 52 : index
    %957 = memref.load %arg4[%c52_68] : memref<162xf32, #tpu.memory_space<smem>>
    %958 = vector.broadcast %957 : f32 to vector<1x256xf32>
    %959 = arith.mulf %745, %958 : vector<1x256xf32>
    %960 = arith.addf %956, %959 : vector<1x256xf32>
    %c53_69 = arith.constant 53 : index
    %961 = memref.load %arg4[%c53_69] : memref<162xf32, #tpu.memory_space<smem>>
    %962 = vector.broadcast %961 : f32 to vector<1x256xf32>
    %963 = arith.mulf %746, %962 : vector<1x256xf32>
    %964 = arith.addf %960, %963 : vector<1x256xf32>
    %c0_70 = arith.constant 0 : index
    %c0_71 = arith.constant 0 : index
    %c0_72 = arith.constant 0 : index
    %965 = vector.load %arg6[%c0_70, %c0_71, %c0_72] : memref<1x3x256xf32, #tpu.memory_space<vmem>>, vector<1x1x256xf32>
    %966 = vector.shape_cast %965 : vector<1x1x256xf32> to vector<1x256xf32>
    %967 = vector.shape_cast %964 : vector<1x256xf32> to vector<1x1x256xf32>
    tpu.vector_store %arg6[%c0_70, %c0_71, %c0_72], %967 {strides = array<i32>} : memref<1x3x256xf32, #tpu.memory_space<vmem>>, vector<1x1x256xf32>,
    %c1_73 = arith.constant 1 : index
    %968 = memref.load %arg5[%c1_73] : memref<3xf32, #tpu.memory_space<smem>>
    %969 = vector.broadcast %968 : f32 to vector<1x256xf32>
    %c54_74 = arith.constant 54 : index
    %970 = memref.load %arg4[%c54_74] : memref<162xf32, #tpu.memory_space<smem>>
    %971 = vector.broadcast %970 : f32 to vector<1x256xf32>
    %972 = arith.mulf %693, %971 : vector<1x256xf32>
    %973 = arith.addf %969, %972 : vector<1x256xf32>
    %c55_75 = arith.constant 55 : index
    %974 = memref.load %arg4[%c55_75] : memref<162xf32, #tpu.memory_space<smem>>
    %975 = vector.broadcast %974 : f32 to vector<1x256xf32>
    %976 = arith.mulf %694, %975 : vector<1x256xf32>
    %977 = arith.addf %973, %976 : vector<1x256xf32>
    %c56_76 = arith.constant 56 : index
    %978 = memref.load %arg4[%c56_76] : memref<162xf32, #tpu.memory_space<smem>>
    %979 = vector.broadcast %978 : f32 to vector<1x256xf32>
    %980 = arith.mulf %695, %979 : vector<1x256xf32>
    %981 = arith.addf %977, %980 : vector<1x256xf32>
    %c57_77 = arith.constant 57 : index
    %982 = memref.load %arg4[%c57_77] : memref<162xf32, #tpu.memory_space<smem>>
    %983 = vector.broadcast %982 : f32 to vector<1x256xf32>
    %984 = arith.mulf %696, %983 : vector<1x256xf32>
    %985 = arith.addf %981, %984 : vector<1x256xf32>
    %c58_78 = arith.constant 58 : index
    %986 = memref.load %arg4[%c58_78] : memref<162xf32, #tpu.memory_space<smem>>
    %987 = vector.broadcast %986 : f32 to vector<1x256xf32>
    %988 = arith.mulf %697, %987 : vector<1x256xf32>
    %989 = arith.addf %985, %988 : vector<1x256xf32>
    %c59_79 = arith.constant 59 : index
    %990 = memref.load %arg4[%c59_79] : memref<162xf32, #tpu.memory_space<smem>>
    %991 = vector.broadcast %990 : f32 to vector<1x256xf32>
    %992 = arith.mulf %698, %991 : vector<1x256xf32>
    %993 = arith.addf %989, %992 : vector<1x256xf32>
    %c60_80 = arith.constant 60 : index
    %994 = memref.load %arg4[%c60_80] : memref<162xf32, #tpu.memory_space<smem>>
    %995 = vector.broadcast %994 : f32 to vector<1x256xf32>
    %996 = arith.mulf %699, %995 : vector<1x256xf32>
    %997 = arith.addf %993, %996 : vector<1x256xf32>
    %c61_81 = arith.constant 61 : index
    %998 = memref.load %arg4[%c61_81] : memref<162xf32, #tpu.memory_space<smem>>
    %999 = vector.broadcast %998 : f32 to vector<1x256xf32>
    %1000 = arith.mulf %700, %999 : vector<1x256xf32>
    %1001 = arith.addf %997, %1000 : vector<1x256xf32>
    %c62_82 = arith.constant 62 : index
    %1002 = memref.load %arg4[%c62_82] : memref<162xf32, #tpu.memory_space<smem>>
    %1003 = vector.broadcast %1002 : f32 to vector<1x256xf32>
    %1004 = arith.mulf %701, %1003 : vector<1x256xf32>
    %1005 = arith.addf %1001, %1004 : vector<1x256xf32>
    %c63_83 = arith.constant 63 : index
    %1006 = memref.load %arg4[%c63_83] : memref<162xf32, #tpu.memory_space<smem>>
    %1007 = vector.broadcast %1006 : f32 to vector<1x256xf32>
    %1008 = arith.mulf %702, %1007 : vector<1x256xf32>
    %1009 = arith.addf %1005, %1008 : vector<1x256xf32>
    %c64_84 = arith.constant 64 : index
    %1010 = memref.load %arg4[%c64_84] : memref<162xf32, #tpu.memory_space<smem>>
    %1011 = vector.broadcast %1010 : f32 to vector<1x256xf32>
    %1012 = arith.mulf %703, %1011 : vector<1x256xf32>
    %1013 = arith.addf %1009, %1012 : vector<1x256xf32>
    %c65_85 = arith.constant 65 : index
    %1014 = memref.load %arg4[%c65_85] : memref<162xf32, #tpu.memory_space<smem>>
    %1015 = vector.broadcast %1014 : f32 to vector<1x256xf32>
    %1016 = arith.mulf %704, %1015 : vector<1x256xf32>
    %1017 = arith.addf %1013, %1016 : vector<1x256xf32>
    %c66_86 = arith.constant 66 : index
    %1018 = memref.load %arg4[%c66_86] : memref<162xf32, #tpu.memory_space<smem>>
    %1019 = vector.broadcast %1018 : f32 to vector<1x256xf32>
    %1020 = arith.mulf %705, %1019 : vector<1x256xf32>
    %1021 = arith.addf %1017, %1020 : vector<1x256xf32>
    %c67_87 = arith.constant 67 : index
    %1022 = memref.load %arg4[%c67_87] : memref<162xf32, #tpu.memory_space<smem>>
    %1023 = vector.broadcast %1022 : f32 to vector<1x256xf32>
    %1024 = arith.mulf %706, %1023 : vector<1x256xf32>
    %1025 = arith.addf %1021, %1024 : vector<1x256xf32>
    %c68_88 = arith.constant 68 : index
    %1026 = memref.load %arg4[%c68_88] : memref<162xf32, #tpu.memory_space<smem>>
    %1027 = vector.broadcast %1026 : f32 to vector<1x256xf32>
    %1028 = arith.mulf %707, %1027 : vector<1x256xf32>
    %1029 = arith.addf %1025, %1028 : vector<1x256xf32>
    %c69_89 = arith.constant 69 : index
    %1030 = memref.load %arg4[%c69_89] : memref<162xf32, #tpu.memory_space<smem>>
    %1031 = vector.broadcast %1030 : f32 to vector<1x256xf32>
    %1032 = arith.mulf %708, %1031 : vector<1x256xf32>
    %1033 = arith.addf %1029, %1032 : vector<1x256xf32>
    %c70_90 = arith.constant 70 : index
    %1034 = memref.load %arg4[%c70_90] : memref<162xf32, #tpu.memory_space<smem>>
    %1035 = vector.broadcast %1034 : f32 to vector<1x256xf32>
    %1036 = arith.mulf %709, %1035 : vector<1x256xf32>
    %1037 = arith.addf %1033, %1036 : vector<1x256xf32>
    %c71_91 = arith.constant 71 : index
    %1038 = memref.load %arg4[%c71_91] : memref<162xf32, #tpu.memory_space<smem>>
    %1039 = vector.broadcast %1038 : f32 to vector<1x256xf32>
    %1040 = arith.mulf %710, %1039 : vector<1x256xf32>
    %1041 = arith.addf %1037, %1040 : vector<1x256xf32>
    %c72_92 = arith.constant 72 : index
    %1042 = memref.load %arg4[%c72_92] : memref<162xf32, #tpu.memory_space<smem>>
    %1043 = vector.broadcast %1042 : f32 to vector<1x256xf32>
    %1044 = arith.mulf %711, %1043 : vector<1x256xf32>
    %1045 = arith.addf %1041, %1044 : vector<1x256xf32>
    %c73_93 = arith.constant 73 : index
    %1046 = memref.load %arg4[%c73_93] : memref<162xf32, #tpu.memory_space<smem>>
    %1047 = vector.broadcast %1046 : f32 to vector<1x256xf32>
    %1048 = arith.mulf %712, %1047 : vector<1x256xf32>
    %1049 = arith.addf %1045, %1048 : vector<1x256xf32>
    %c74_94 = arith.constant 74 : index
    %1050 = memref.load %arg4[%c74_94] : memref<162xf32, #tpu.memory_space<smem>>
    %1051 = vector.broadcast %1050 : f32 to vector<1x256xf32>
    %1052 = arith.mulf %713, %1051 : vector<1x256xf32>
    %1053 = arith.addf %1049, %1052 : vector<1x256xf32>
    %c75_95 = arith.constant 75 : index
    %1054 = memref.load %arg4[%c75_95] : memref<162xf32, #tpu.memory_space<smem>>
    %1055 = vector.broadcast %1054 : f32 to vector<1x256xf32>
    %1056 = arith.mulf %714, %1055 : vector<1x256xf32>
    %1057 = arith.addf %1053, %1056 : vector<1x256xf32>
    %c76_96 = arith.constant 76 : index
    %1058 = memref.load %arg4[%c76_96] : memref<162xf32, #tpu.memory_space<smem>>
    %1059 = vector.broadcast %1058 : f32 to vector<1x256xf32>
    %1060 = arith.mulf %715, %1059 : vector<1x256xf32>
    %1061 = arith.addf %1057, %1060 : vector<1x256xf32>
    %c77_97 = arith.constant 77 : index
    %1062 = memref.load %arg4[%c77_97] : memref<162xf32, #tpu.memory_space<smem>>
    %1063 = vector.broadcast %1062 : f32 to vector<1x256xf32>
    %1064 = arith.mulf %716, %1063 : vector<1x256xf32>
    %1065 = arith.addf %1061, %1064 : vector<1x256xf32>
    %c78_98 = arith.constant 78 : index
    %1066 = memref.load %arg4[%c78_98] : memref<162xf32, #tpu.memory_space<smem>>
    %1067 = vector.broadcast %1066 : f32 to vector<1x256xf32>
    %1068 = arith.mulf %717, %1067 : vector<1x256xf32>
    %1069 = arith.addf %1065, %1068 : vector<1x256xf32>
    %c79_99 = arith.constant 79 : index
    %1070 = memref.load %arg4[%c79_99] : memref<162xf32, #tpu.memory_space<smem>>
    %1071 = vector.broadcast %1070 : f32 to vector<1x256xf32>
    %1072 = arith.mulf %718, %1071 : vector<1x256xf32>
    %1073 = arith.addf %1069, %1072 : vector<1x256xf32>
    %c80_100 = arith.constant 80 : index
    %1074 = memref.load %arg4[%c80_100] : memref<162xf32, #tpu.memory_space<smem>>
    %1075 = vector.broadcast %1074 : f32 to vector<1x256xf32>
    %1076 = arith.mulf %719, %1075 : vector<1x256xf32>
    %1077 = arith.addf %1073, %1076 : vector<1x256xf32>
    %c81_101 = arith.constant 81 : index
    %1078 = memref.load %arg4[%c81_101] : memref<162xf32, #tpu.memory_space<smem>>
    %1079 = vector.broadcast %1078 : f32 to vector<1x256xf32>
    %1080 = arith.mulf %720, %1079 : vector<1x256xf32>
    %1081 = arith.addf %1077, %1080 : vector<1x256xf32>
    %c82_102 = arith.constant 82 : index
    %1082 = memref.load %arg4[%c82_102] : memref<162xf32, #tpu.memory_space<smem>>
    %1083 = vector.broadcast %1082 : f32 to vector<1x256xf32>
    %1084 = arith.mulf %721, %1083 : vector<1x256xf32>
    %1085 = arith.addf %1081, %1084 : vector<1x256xf32>
    %c83_103 = arith.constant 83 : index
    %1086 = memref.load %arg4[%c83_103] : memref<162xf32, #tpu.memory_space<smem>>
    %1087 = vector.broadcast %1086 : f32 to vector<1x256xf32>
    %1088 = arith.mulf %722, %1087 : vector<1x256xf32>
    %1089 = arith.addf %1085, %1088 : vector<1x256xf32>
    %c84_104 = arith.constant 84 : index
    %1090 = memref.load %arg4[%c84_104] : memref<162xf32, #tpu.memory_space<smem>>
    %1091 = vector.broadcast %1090 : f32 to vector<1x256xf32>
    %1092 = arith.mulf %723, %1091 : vector<1x256xf32>
    %1093 = arith.addf %1089, %1092 : vector<1x256xf32>
    %c85_105 = arith.constant 85 : index
    %1094 = memref.load %arg4[%c85_105] : memref<162xf32, #tpu.memory_space<smem>>
    %1095 = vector.broadcast %1094 : f32 to vector<1x256xf32>
    %1096 = arith.mulf %724, %1095 : vector<1x256xf32>
    %1097 = arith.addf %1093, %1096 : vector<1x256xf32>
    %c86_106 = arith.constant 86 : index
    %1098 = memref.load %arg4[%c86_106] : memref<162xf32, #tpu.memory_space<smem>>
    %1099 = vector.broadcast %1098 : f32 to vector<1x256xf32>
    %1100 = arith.mulf %725, %1099 : vector<1x256xf32>
    %1101 = arith.addf %1097, %1100 : vector<1x256xf32>
    %c87_107 = arith.constant 87 : index
    %1102 = memref.load %arg4[%c87_107] : memref<162xf32, #tpu.memory_space<smem>>
    %1103 = vector.broadcast %1102 : f32 to vector<1x256xf32>
    %1104 = arith.mulf %726, %1103 : vector<1x256xf32>
    %1105 = arith.addf %1101, %1104 : vector<1x256xf32>
    %c88_108 = arith.constant 88 : index
    %1106 = memref.load %arg4[%c88_108] : memref<162xf32, #tpu.memory_space<smem>>
    %1107 = vector.broadcast %1106 : f32 to vector<1x256xf32>
    %1108 = arith.mulf %727, %1107 : vector<1x256xf32>
    %1109 = arith.addf %1105, %1108 : vector<1x256xf32>
    %c89_109 = arith.constant 89 : index
    %1110 = memref.load %arg4[%c89_109] : memref<162xf32, #tpu.memory_space<smem>>
    %1111 = vector.broadcast %1110 : f32 to vector<1x256xf32>
    %1112 = arith.mulf %728, %1111 : vector<1x256xf32>
    %1113 = arith.addf %1109, %1112 : vector<1x256xf32>
    %c90_110 = arith.constant 90 : index
    %1114 = memref.load %arg4[%c90_110] : memref<162xf32, #tpu.memory_space<smem>>
    %1115 = vector.broadcast %1114 : f32 to vector<1x256xf32>
    %1116 = arith.mulf %729, %1115 : vector<1x256xf32>
    %1117 = arith.addf %1113, %1116 : vector<1x256xf32>
    %c91_111 = arith.constant 91 : index
    %1118 = memref.load %arg4[%c91_111] : memref<162xf32, #tpu.memory_space<smem>>
    %1119 = vector.broadcast %1118 : f32 to vector<1x256xf32>
    %1120 = arith.mulf %730, %1119 : vector<1x256xf32>
    %1121 = arith.addf %1117, %1120 : vector<1x256xf32>
    %c92_112 = arith.constant 92 : index
    %1122 = memref.load %arg4[%c92_112] : memref<162xf32, #tpu.memory_space<smem>>
    %1123 = vector.broadcast %1122 : f32 to vector<1x256xf32>
    %1124 = arith.mulf %731, %1123 : vector<1x256xf32>
    %1125 = arith.addf %1121, %1124 : vector<1x256xf32>
    %c93_113 = arith.constant 93 : index
    %1126 = memref.load %arg4[%c93_113] : memref<162xf32, #tpu.memory_space<smem>>
    %1127 = vector.broadcast %1126 : f32 to vector<1x256xf32>
    %1128 = arith.mulf %732, %1127 : vector<1x256xf32>
    %1129 = arith.addf %1125, %1128 : vector<1x256xf32>
    %c94_114 = arith.constant 94 : index
    %1130 = memref.load %arg4[%c94_114] : memref<162xf32, #tpu.memory_space<smem>>
    %1131 = vector.broadcast %1130 : f32 to vector<1x256xf32>
    %1132 = arith.mulf %733, %1131 : vector<1x256xf32>
    %1133 = arith.addf %1129, %1132 : vector<1x256xf32>
    %c95_115 = arith.constant 95 : index
    %1134 = memref.load %arg4[%c95_115] : memref<162xf32, #tpu.memory_space<smem>>
    %1135 = vector.broadcast %1134 : f32 to vector<1x256xf32>
    %1136 = arith.mulf %734, %1135 : vector<1x256xf32>
    %1137 = arith.addf %1133, %1136 : vector<1x256xf32>
    %c96_116 = arith.constant 96 : index
    %1138 = memref.load %arg4[%c96_116] : memref<162xf32, #tpu.memory_space<smem>>
    %1139 = vector.broadcast %1138 : f32 to vector<1x256xf32>
    %1140 = arith.mulf %735, %1139 : vector<1x256xf32>
    %1141 = arith.addf %1137, %1140 : vector<1x256xf32>
    %c97_117 = arith.constant 97 : index
    %1142 = memref.load %arg4[%c97_117] : memref<162xf32, #tpu.memory_space<smem>>
    %1143 = vector.broadcast %1142 : f32 to vector<1x256xf32>
    %1144 = arith.mulf %736, %1143 : vector<1x256xf32>
    %1145 = arith.addf %1141, %1144 : vector<1x256xf32>
    %c98_118 = arith.constant 98 : index
    %1146 = memref.load %arg4[%c98_118] : memref<162xf32, #tpu.memory_space<smem>>
    %1147 = vector.broadcast %1146 : f32 to vector<1x256xf32>
    %1148 = arith.mulf %737, %1147 : vector<1x256xf32>
    %1149 = arith.addf %1145, %1148 : vector<1x256xf32>
    %c99_119 = arith.constant 99 : index
    %1150 = memref.load %arg4[%c99_119] : memref<162xf32, #tpu.memory_space<smem>>
    %1151 = vector.broadcast %1150 : f32 to vector<1x256xf32>
    %1152 = arith.mulf %738, %1151 : vector<1x256xf32>
    %1153 = arith.addf %1149, %1152 : vector<1x256xf32>
    %c100_120 = arith.constant 100 : index
    %1154 = memref.load %arg4[%c100_120] : memref<162xf32, #tpu.memory_space<smem>>
    %1155 = vector.broadcast %1154 : f32 to vector<1x256xf32>
    %1156 = arith.mulf %739, %1155 : vector<1x256xf32>
    %1157 = arith.addf %1153, %1156 : vector<1x256xf32>
    %c101_121 = arith.constant 101 : index
    %1158 = memref.load %arg4[%c101_121] : memref<162xf32, #tpu.memory_space<smem>>
    %1159 = vector.broadcast %1158 : f32 to vector<1x256xf32>
    %1160 = arith.mulf %740, %1159 : vector<1x256xf32>
    %1161 = arith.addf %1157, %1160 : vector<1x256xf32>
    %c102_122 = arith.constant 102 : index
    %1162 = memref.load %arg4[%c102_122] : memref<162xf32, #tpu.memory_space<smem>>
    %1163 = vector.broadcast %1162 : f32 to vector<1x256xf32>
    %1164 = arith.mulf %741, %1163 : vector<1x256xf32>
    %1165 = arith.addf %1161, %1164 : vector<1x256xf32>
    %c103_123 = arith.constant 103 : index
    %1166 = memref.load %arg4[%c103_123] : memref<162xf32, #tpu.memory_space<smem>>
    %1167 = vector.broadcast %1166 : f32 to vector<1x256xf32>
    %1168 = arith.mulf %742, %1167 : vector<1x256xf32>
    %1169 = arith.addf %1165, %1168 : vector<1x256xf32>
    %c104_124 = arith.constant 104 : index
    %1170 = memref.load %arg4[%c104_124] : memref<162xf32, #tpu.memory_space<smem>>
    %1171 = vector.broadcast %1170 : f32 to vector<1x256xf32>
    %1172 = arith.mulf %743, %1171 : vector<1x256xf32>
    %1173 = arith.addf %1169, %1172 : vector<1x256xf32>
    %c105_125 = arith.constant 105 : index
    %1174 = memref.load %arg4[%c105_125] : memref<162xf32, #tpu.memory_space<smem>>
    %1175 = vector.broadcast %1174 : f32 to vector<1x256xf32>
    %1176 = arith.mulf %744, %1175 : vector<1x256xf32>
    %1177 = arith.addf %1173, %1176 : vector<1x256xf32>
    %c106_126 = arith.constant 106 : index
    %1178 = memref.load %arg4[%c106_126] : memref<162xf32, #tpu.memory_space<smem>>
    %1179 = vector.broadcast %1178 : f32 to vector<1x256xf32>
    %1180 = arith.mulf %745, %1179 : vector<1x256xf32>
    %1181 = arith.addf %1177, %1180 : vector<1x256xf32>
    %c107_127 = arith.constant 107 : index
    %1182 = memref.load %arg4[%c107_127] : memref<162xf32, #tpu.memory_space<smem>>
    %1183 = vector.broadcast %1182 : f32 to vector<1x256xf32>
    %1184 = arith.mulf %746, %1183 : vector<1x256xf32>
    %1185 = arith.addf %1181, %1184 : vector<1x256xf32>
    %c0_128 = arith.constant 0 : index
    %c1_129 = arith.constant 1 : index
    %c0_130 = arith.constant 0 : index
    %1186 = vector.load %arg6[%c0_128, %c1_129, %c0_130] : memref<1x3x256xf32, #tpu.memory_space<vmem>>, vector<1x1x256xf32>
    %1187 = vector.shape_cast %1186 : vector<1x1x256xf32> to vector<1x256xf32>
    %1188 = vector.shape_cast %1185 : vector<1x256xf32> to vector<1x1x256xf32>
    tpu.vector_store %arg6[%c0_128, %c1_129, %c0_130], %1188 {strides = array<i32>} : memref<1x3x256xf32, #tpu.memory_space<vmem>>, vector<1x1x256xf32>,
    %c2_131 = arith.constant 2 : index
    %1189 = memref.load %arg5[%c2_131] : memref<3xf32, #tpu.memory_space<smem>>
    %1190 = vector.broadcast %1189 : f32 to vector<1x256xf32>
    %c108_132 = arith.constant 108 : index
    %1191 = memref.load %arg4[%c108_132] : memref<162xf32, #tpu.memory_space<smem>>
    %1192 = vector.broadcast %1191 : f32 to vector<1x256xf32>
    %1193 = arith.mulf %693, %1192 : vector<1x256xf32>
    %1194 = arith.addf %1190, %1193 : vector<1x256xf32>
    %c109_133 = arith.constant 109 : index
    %1195 = memref.load %arg4[%c109_133] : memref<162xf32, #tpu.memory_space<smem>>
    %1196 = vector.broadcast %1195 : f32 to vector<1x256xf32>
    %1197 = arith.mulf %694, %1196 : vector<1x256xf32>
    %1198 = arith.addf %1194, %1197 : vector<1x256xf32>
    %c110_134 = arith.constant 110 : index
    %1199 = memref.load %arg4[%c110_134] : memref<162xf32, #tpu.memory_space<smem>>
    %1200 = vector.broadcast %1199 : f32 to vector<1x256xf32>
    %1201 = arith.mulf %695, %1200 : vector<1x256xf32>
    %1202 = arith.addf %1198, %1201 : vector<1x256xf32>
    %c111_135 = arith.constant 111 : index
    %1203 = memref.load %arg4[%c111_135] : memref<162xf32, #tpu.memory_space<smem>>
    %1204 = vector.broadcast %1203 : f32 to vector<1x256xf32>
    %1205 = arith.mulf %696, %1204 : vector<1x256xf32>
    %1206 = arith.addf %1202, %1205 : vector<1x256xf32>
    %c112_136 = arith.constant 112 : index
    %1207 = memref.load %arg4[%c112_136] : memref<162xf32, #tpu.memory_space<smem>>
    %1208 = vector.broadcast %1207 : f32 to vector<1x256xf32>
    %1209 = arith.mulf %697, %1208 : vector<1x256xf32>
    %1210 = arith.addf %1206, %1209 : vector<1x256xf32>
    %c113_137 = arith.constant 113 : index
    %1211 = memref.load %arg4[%c113_137] : memref<162xf32, #tpu.memory_space<smem>>
    %1212 = vector.broadcast %1211 : f32 to vector<1x256xf32>
    %1213 = arith.mulf %698, %1212 : vector<1x256xf32>
    %1214 = arith.addf %1210, %1213 : vector<1x256xf32>
    %c114_138 = arith.constant 114 : index
    %1215 = memref.load %arg4[%c114_138] : memref<162xf32, #tpu.memory_space<smem>>
    %1216 = vector.broadcast %1215 : f32 to vector<1x256xf32>
    %1217 = arith.mulf %699, %1216 : vector<1x256xf32>
    %1218 = arith.addf %1214, %1217 : vector<1x256xf32>
    %c115_139 = arith.constant 115 : index
    %1219 = memref.load %arg4[%c115_139] : memref<162xf32, #tpu.memory_space<smem>>
    %1220 = vector.broadcast %1219 : f32 to vector<1x256xf32>
    %1221 = arith.mulf %700, %1220 : vector<1x256xf32>
    %1222 = arith.addf %1218, %1221 : vector<1x256xf32>
    %c116_140 = arith.constant 116 : index
    %1223 = memref.load %arg4[%c116_140] : memref<162xf32, #tpu.memory_space<smem>>
    %1224 = vector.broadcast %1223 : f32 to vector<1x256xf32>
    %1225 = arith.mulf %701, %1224 : vector<1x256xf32>
    %1226 = arith.addf %1222, %1225 : vector<1x256xf32>
    %c117_141 = arith.constant 117 : index
    %1227 = memref.load %arg4[%c117_141] : memref<162xf32, #tpu.memory_space<smem>>
    %1228 = vector.broadcast %1227 : f32 to vector<1x256xf32>
    %1229 = arith.mulf %702, %1228 : vector<1x256xf32>
    %1230 = arith.addf %1226, %1229 : vector<1x256xf32>
    %c118_142 = arith.constant 118 : index
    %1231 = memref.load %arg4[%c118_142] : memref<162xf32, #tpu.memory_space<smem>>
    %1232 = vector.broadcast %1231 : f32 to vector<1x256xf32>
    %1233 = arith.mulf %703, %1232 : vector<1x256xf32>
    %1234 = arith.addf %1230, %1233 : vector<1x256xf32>
    %c119_143 = arith.constant 119 : index
    %1235 = memref.load %arg4[%c119_143] : memref<162xf32, #tpu.memory_space<smem>>
    %1236 = vector.broadcast %1235 : f32 to vector<1x256xf32>
    %1237 = arith.mulf %704, %1236 : vector<1x256xf32>
    %1238 = arith.addf %1234, %1237 : vector<1x256xf32>
    %c120_144 = arith.constant 120 : index
    %1239 = memref.load %arg4[%c120_144] : memref<162xf32, #tpu.memory_space<smem>>
    %1240 = vector.broadcast %1239 : f32 to vector<1x256xf32>
    %1241 = arith.mulf %705, %1240 : vector<1x256xf32>
    %1242 = arith.addf %1238, %1241 : vector<1x256xf32>
    %c121_145 = arith.constant 121 : index
    %1243 = memref.load %arg4[%c121_145] : memref<162xf32, #tpu.memory_space<smem>>
    %1244 = vector.broadcast %1243 : f32 to vector<1x256xf32>
    %1245 = arith.mulf %706, %1244 : vector<1x256xf32>
    %1246 = arith.addf %1242, %1245 : vector<1x256xf32>
    %c122_146 = arith.constant 122 : index
    %1247 = memref.load %arg4[%c122_146] : memref<162xf32, #tpu.memory_space<smem>>
    %1248 = vector.broadcast %1247 : f32 to vector<1x256xf32>
    %1249 = arith.mulf %707, %1248 : vector<1x256xf32>
    %1250 = arith.addf %1246, %1249 : vector<1x256xf32>
    %c123_147 = arith.constant 123 : index
    %1251 = memref.load %arg4[%c123_147] : memref<162xf32, #tpu.memory_space<smem>>
    %1252 = vector.broadcast %1251 : f32 to vector<1x256xf32>
    %1253 = arith.mulf %708, %1252 : vector<1x256xf32>
    %1254 = arith.addf %1250, %1253 : vector<1x256xf32>
    %c124_148 = arith.constant 124 : index
    %1255 = memref.load %arg4[%c124_148] : memref<162xf32, #tpu.memory_space<smem>>
    %1256 = vector.broadcast %1255 : f32 to vector<1x256xf32>
    %1257 = arith.mulf %709, %1256 : vector<1x256xf32>
    %1258 = arith.addf %1254, %1257 : vector<1x256xf32>
    %c125_149 = arith.constant 125 : index
    %1259 = memref.load %arg4[%c125_149] : memref<162xf32, #tpu.memory_space<smem>>
    %1260 = vector.broadcast %1259 : f32 to vector<1x256xf32>
    %1261 = arith.mulf %710, %1260 : vector<1x256xf32>
    %1262 = arith.addf %1258, %1261 : vector<1x256xf32>
    %c126_150 = arith.constant 126 : index
    %1263 = memref.load %arg4[%c126_150] : memref<162xf32, #tpu.memory_space<smem>>
    %1264 = vector.broadcast %1263 : f32 to vector<1x256xf32>
    %1265 = arith.mulf %711, %1264 : vector<1x256xf32>
    %1266 = arith.addf %1262, %1265 : vector<1x256xf32>
    %c127_151 = arith.constant 127 : index
    %1267 = memref.load %arg4[%c127_151] : memref<162xf32, #tpu.memory_space<smem>>
    %1268 = vector.broadcast %1267 : f32 to vector<1x256xf32>
    %1269 = arith.mulf %712, %1268 : vector<1x256xf32>
    %1270 = arith.addf %1266, %1269 : vector<1x256xf32>
    %c128_152 = arith.constant 128 : index
    %1271 = memref.load %arg4[%c128_152] : memref<162xf32, #tpu.memory_space<smem>>
    %1272 = vector.broadcast %1271 : f32 to vector<1x256xf32>
    %1273 = arith.mulf %713, %1272 : vector<1x256xf32>
    %1274 = arith.addf %1270, %1273 : vector<1x256xf32>
    %c129_153 = arith.constant 129 : index
    %1275 = memref.load %arg4[%c129_153] : memref<162xf32, #tpu.memory_space<smem>>
    %1276 = vector.broadcast %1275 : f32 to vector<1x256xf32>
    %1277 = arith.mulf %714, %1276 : vector<1x256xf32>
    %1278 = arith.addf %1274, %1277 : vector<1x256xf32>
    %c130_154 = arith.constant 130 : index
    %1279 = memref.load %arg4[%c130_154] : memref<162xf32, #tpu.memory_space<smem>>
    %1280 = vector.broadcast %1279 : f32 to vector<1x256xf32>
    %1281 = arith.mulf %715, %1280 : vector<1x256xf32>
    %1282 = arith.addf %1278, %1281 : vector<1x256xf32>
    %c131_155 = arith.constant 131 : index
    %1283 = memref.load %arg4[%c131_155] : memref<162xf32, #tpu.memory_space<smem>>
    %1284 = vector.broadcast %1283 : f32 to vector<1x256xf32>
    %1285 = arith.mulf %716, %1284 : vector<1x256xf32>
    %1286 = arith.addf %1282, %1285 : vector<1x256xf32>
    %c132_156 = arith.constant 132 : index
    %1287 = memref.load %arg4[%c132_156] : memref<162xf32, #tpu.memory_space<smem>>
    %1288 = vector.broadcast %1287 : f32 to vector<1x256xf32>
    %1289 = arith.mulf %717, %1288 : vector<1x256xf32>
    %1290 = arith.addf %1286, %1289 : vector<1x256xf32>
    %c133_157 = arith.constant 133 : index
    %1291 = memref.load %arg4[%c133_157] : memref<162xf32, #tpu.memory_space<smem>>
    %1292 = vector.broadcast %1291 : f32 to vector<1x256xf32>
    %1293 = arith.mulf %718, %1292 : vector<1x256xf32>
    %1294 = arith.addf %1290, %1293 : vector<1x256xf32>
    %c134_158 = arith.constant 134 : index
    %1295 = memref.load %arg4[%c134_158] : memref<162xf32, #tpu.memory_space<smem>>
    %1296 = vector.broadcast %1295 : f32 to vector<1x256xf32>
    %1297 = arith.mulf %719, %1296 : vector<1x256xf32>
    %1298 = arith.addf %1294, %1297 : vector<1x256xf32>
    %c135_159 = arith.constant 135 : index
    %1299 = memref.load %arg4[%c135_159] : memref<162xf32, #tpu.memory_space<smem>>
    %1300 = vector.broadcast %1299 : f32 to vector<1x256xf32>
    %1301 = arith.mulf %720, %1300 : vector<1x256xf32>
    %1302 = arith.addf %1298, %1301 : vector<1x256xf32>
    %c136_160 = arith.constant 136 : index
    %1303 = memref.load %arg4[%c136_160] : memref<162xf32, #tpu.memory_space<smem>>
    %1304 = vector.broadcast %1303 : f32 to vector<1x256xf32>
    %1305 = arith.mulf %721, %1304 : vector<1x256xf32>
    %1306 = arith.addf %1302, %1305 : vector<1x256xf32>
    %c137_161 = arith.constant 137 : index
    %1307 = memref.load %arg4[%c137_161] : memref<162xf32, #tpu.memory_space<smem>>
    %1308 = vector.broadcast %1307 : f32 to vector<1x256xf32>
    %1309 = arith.mulf %722, %1308 : vector<1x256xf32>
    %1310 = arith.addf %1306, %1309 : vector<1x256xf32>
    %c138_162 = arith.constant 138 : index
    %1311 = memref.load %arg4[%c138_162] : memref<162xf32, #tpu.memory_space<smem>>
    %1312 = vector.broadcast %1311 : f32 to vector<1x256xf32>
    %1313 = arith.mulf %723, %1312 : vector<1x256xf32>
    %1314 = arith.addf %1310, %1313 : vector<1x256xf32>
    %c139_163 = arith.constant 139 : index
    %1315 = memref.load %arg4[%c139_163] : memref<162xf32, #tpu.memory_space<smem>>
    %1316 = vector.broadcast %1315 : f32 to vector<1x256xf32>
    %1317 = arith.mulf %724, %1316 : vector<1x256xf32>
    %1318 = arith.addf %1314, %1317 : vector<1x256xf32>
    %c140_164 = arith.constant 140 : index
    %1319 = memref.load %arg4[%c140_164] : memref<162xf32, #tpu.memory_space<smem>>
    %1320 = vector.broadcast %1319 : f32 to vector<1x256xf32>
    %1321 = arith.mulf %725, %1320 : vector<1x256xf32>
    %1322 = arith.addf %1318, %1321 : vector<1x256xf32>
    %c141_165 = arith.constant 141 : index
    %1323 = memref.load %arg4[%c141_165] : memref<162xf32, #tpu.memory_space<smem>>
    %1324 = vector.broadcast %1323 : f32 to vector<1x256xf32>
    %1325 = arith.mulf %726, %1324 : vector<1x256xf32>
    %1326 = arith.addf %1322, %1325 : vector<1x256xf32>
    %c142_166 = arith.constant 142 : index
    %1327 = memref.load %arg4[%c142_166] : memref<162xf32, #tpu.memory_space<smem>>
    %1328 = vector.broadcast %1327 : f32 to vector<1x256xf32>
    %1329 = arith.mulf %727, %1328 : vector<1x256xf32>
    %1330 = arith.addf %1326, %1329 : vector<1x256xf32>
    %c143_167 = arith.constant 143 : index
    %1331 = memref.load %arg4[%c143_167] : memref<162xf32, #tpu.memory_space<smem>>
    %1332 = vector.broadcast %1331 : f32 to vector<1x256xf32>
    %1333 = arith.mulf %728, %1332 : vector<1x256xf32>
    %1334 = arith.addf %1330, %1333 : vector<1x256xf32>
    %c144_168 = arith.constant 144 : index
    %1335 = memref.load %arg4[%c144_168] : memref<162xf32, #tpu.memory_space<smem>>
    %1336 = vector.broadcast %1335 : f32 to vector<1x256xf32>
    %1337 = arith.mulf %729, %1336 : vector<1x256xf32>
    %1338 = arith.addf %1334, %1337 : vector<1x256xf32>
    %c145_169 = arith.constant 145 : index
    %1339 = memref.load %arg4[%c145_169] : memref<162xf32, #tpu.memory_space<smem>>
    %1340 = vector.broadcast %1339 : f32 to vector<1x256xf32>
    %1341 = arith.mulf %730, %1340 : vector<1x256xf32>
    %1342 = arith.addf %1338, %1341 : vector<1x256xf32>
    %c146_170 = arith.constant 146 : index
    %1343 = memref.load %arg4[%c146_170] : memref<162xf32, #tpu.memory_space<smem>>
    %1344 = vector.broadcast %1343 : f32 to vector<1x256xf32>
    %1345 = arith.mulf %731, %1344 : vector<1x256xf32>
    %1346 = arith.addf %1342, %1345 : vector<1x256xf32>
    %c147_171 = arith.constant 147 : index
    %1347 = memref.load %arg4[%c147_171] : memref<162xf32, #tpu.memory_space<smem>>
    %1348 = vector.broadcast %1347 : f32 to vector<1x256xf32>
    %1349 = arith.mulf %732, %1348 : vector<1x256xf32>
    %1350 = arith.addf %1346, %1349 : vector<1x256xf32>
    %c148_172 = arith.constant 148 : index
    %1351 = memref.load %arg4[%c148_172] : memref<162xf32, #tpu.memory_space<smem>>
    %1352 = vector.broadcast %1351 : f32 to vector<1x256xf32>
    %1353 = arith.mulf %733, %1352 : vector<1x256xf32>
    %1354 = arith.addf %1350, %1353 : vector<1x256xf32>
    %c149_173 = arith.constant 149 : index
    %1355 = memref.load %arg4[%c149_173] : memref<162xf32, #tpu.memory_space<smem>>
    %1356 = vector.broadcast %1355 : f32 to vector<1x256xf32>
    %1357 = arith.mulf %734, %1356 : vector<1x256xf32>
    %1358 = arith.addf %1354, %1357 : vector<1x256xf32>
    %c150_174 = arith.constant 150 : index
    %1359 = memref.load %arg4[%c150_174] : memref<162xf32, #tpu.memory_space<smem>>
    %1360 = vector.broadcast %1359 : f32 to vector<1x256xf32>
    %1361 = arith.mulf %735, %1360 : vector<1x256xf32>
    %1362 = arith.addf %1358, %1361 : vector<1x256xf32>
    %c151_175 = arith.constant 151 : index
    %1363 = memref.load %arg4[%c151_175] : memref<162xf32, #tpu.memory_space<smem>>
    %1364 = vector.broadcast %1363 : f32 to vector<1x256xf32>
    %1365 = arith.mulf %736, %1364 : vector<1x256xf32>
    %1366 = arith.addf %1362, %1365 : vector<1x256xf32>
    %c152_176 = arith.constant 152 : index
    %1367 = memref.load %arg4[%c152_176] : memref<162xf32, #tpu.memory_space<smem>>
    %1368 = vector.broadcast %1367 : f32 to vector<1x256xf32>
    %1369 = arith.mulf %737, %1368 : vector<1x256xf32>
    %1370 = arith.addf %1366, %1369 : vector<1x256xf32>
    %c153_177 = arith.constant 153 : index
    %1371 = memref.load %arg4[%c153_177] : memref<162xf32, #tpu.memory_space<smem>>
    %1372 = vector.broadcast %1371 : f32 to vector<1x256xf32>
    %1373 = arith.mulf %738, %1372 : vector<1x256xf32>
    %1374 = arith.addf %1370, %1373 : vector<1x256xf32>
    %c154_178 = arith.constant 154 : index
    %1375 = memref.load %arg4[%c154_178] : memref<162xf32, #tpu.memory_space<smem>>
    %1376 = vector.broadcast %1375 : f32 to vector<1x256xf32>
    %1377 = arith.mulf %739, %1376 : vector<1x256xf32>
    %1378 = arith.addf %1374, %1377 : vector<1x256xf32>
    %c155_179 = arith.constant 155 : index
    %1379 = memref.load %arg4[%c155_179] : memref<162xf32, #tpu.memory_space<smem>>
    %1380 = vector.broadcast %1379 : f32 to vector<1x256xf32>
    %1381 = arith.mulf %740, %1380 : vector<1x256xf32>
    %1382 = arith.addf %1378, %1381 : vector<1x256xf32>
    %c156_180 = arith.constant 156 : index
    %1383 = memref.load %arg4[%c156_180] : memref<162xf32, #tpu.memory_space<smem>>
    %1384 = vector.broadcast %1383 : f32 to vector<1x256xf32>
    %1385 = arith.mulf %741, %1384 : vector<1x256xf32>
    %1386 = arith.addf %1382, %1385 : vector<1x256xf32>
    %c157_181 = arith.constant 157 : index
    %1387 = memref.load %arg4[%c157_181] : memref<162xf32, #tpu.memory_space<smem>>
    %1388 = vector.broadcast %1387 : f32 to vector<1x256xf32>
    %1389 = arith.mulf %742, %1388 : vector<1x256xf32>
    %1390 = arith.addf %1386, %1389 : vector<1x256xf32>
    %c158_182 = arith.constant 158 : index
    %1391 = memref.load %arg4[%c158_182] : memref<162xf32, #tpu.memory_space<smem>>
    %1392 = vector.broadcast %1391 : f32 to vector<1x256xf32>
    %1393 = arith.mulf %743, %1392 : vector<1x256xf32>
    %1394 = arith.addf %1390, %1393 : vector<1x256xf32>
    %c159_183 = arith.constant 159 : index
    %1395 = memref.load %arg4[%c159_183] : memref<162xf32, #tpu.memory_space<smem>>
    %1396 = vector.broadcast %1395 : f32 to vector<1x256xf32>
    %1397 = arith.mulf %744, %1396 : vector<1x256xf32>
    %1398 = arith.addf %1394, %1397 : vector<1x256xf32>
    %c160_184 = arith.constant 160 : index
    %1399 = memref.load %arg4[%c160_184] : memref<162xf32, #tpu.memory_space<smem>>
    %1400 = vector.broadcast %1399 : f32 to vector<1x256xf32>
    %1401 = arith.mulf %745, %1400 : vector<1x256xf32>
    %1402 = arith.addf %1398, %1401 : vector<1x256xf32>
    %c161_185 = arith.constant 161 : index
    %1403 = memref.load %arg4[%c161_185] : memref<162xf32, #tpu.memory_space<smem>>
    %1404 = vector.broadcast %1403 : f32 to vector<1x256xf32>
    %1405 = arith.mulf %746, %1404 : vector<1x256xf32>
    %1406 = arith.addf %1402, %1405 : vector<1x256xf32>
    %c0_186 = arith.constant 0 : index
    %c2_187 = arith.constant 2 : index
    %c0_188 = arith.constant 0 : index
    %1407 = vector.load %arg6[%c0_186, %c2_187, %c0_188] : memref<1x3x256xf32, #tpu.memory_space<vmem>>, vector<1x1x256xf32>
    %1408 = vector.shape_cast %1407 : vector<1x1x256xf32> to vector<1x256xf32>
    %1409 = vector.shape_cast %1406 : vector<1x256xf32> to vector<1x1x256xf32>
    tpu.vector_store %arg6[%c0_186, %c2_187, %c0_188], %1409 {strides = array<i32>} : memref<1x3x256xf32, #tpu.memory_space<vmem>>, vector<1x1x256xf32>,
    return
  }
  func.func @transform_0(%arg0: i32) -> (i32, i32, i32) {
    %c0_i32 = arith.constant 0 : i32
    %c0_i32_0 = arith.constant 0 : i32
    %c0_i32_1 = arith.constant 0 : i32
    return %arg0, %c0_i32, %c0_i32_0 : i32, i32, i32
  }
  func.func @transform_1(%arg0: i32) -> i32 {
    %c0_i32 = arith.constant 0 : i32
    %c0_i32_0 = arith.constant 0 : i32
    return %c0_i32 : i32
  }
  func.func @transform_2(%arg0: i32) -> i32 {
    %c0_i32 = arith.constant 0 : i32
    %c0_i32_0 = arith.constant 0 : i32
    return %c0_i32 : i32
  }
  func.func @transform_3(%arg0: i32) -> i32 {
    %c0_i32 = arith.constant 0 : i32
    %c0_i32_0 = arith.constant 0 : i32
    return %c0_i32 : i32
  }
  func.func @transform_4(%arg0: i32) -> i32 {
    %c0_i32 = arith.constant 0 : i32
    %c0_i32_0 = arith.constant 0 : i32
    return %c0_i32 : i32
  }
  func.func @transform_5(%arg0: i32) -> (i32, i32, i32) {
    %c0_i32 = arith.constant 0 : i32
    %c0_i32_0 = arith.constant 0 : i32
    %c0_i32_1 = arith.constant 0 : i32
    return %arg0, %c0_i32, %c0_i32_0 : i32, i32, i32
  }
}

</mosaic_0001>

<bundles_post_ra>
// kernel: nn_test_forward.1
= control target key start
LH: loop header
LB: loop body
LE: loop exit
PB: predicated region body
PF: predicated region fallthrough
CT: control target
= control target key end

     0   :  { %10 = vsyncpa [#allocation3], 0  ;;  %s6236_s0 = inlined_call_operand.vmem [shape: f32[2,3,324], index: 0, kind: input, shape index: {}]   ;;  %s6237_s1 = inlined_call_operand.vmem [shape: f32[162], index: 1, kind: input, shape index: {}]   ;;  %s6238_s2 = inlined_call_operand.vmem [shape: f32[6], index: 2, kind: input, shape index: {}]   ;;  %s6239_s3 = inlined_call_operand.vmem [shape: f32[162], index: 3, kind: input, shape index: {}]   ;;  %s6240_s4 = inlined_call_operand.vmem [shape: f32[3], index: 4, kind: input, shape index: {}]   ;;  %s6241_s5 = inlined_call_operand.vmem [shape: f32[2,3,256], index: 5, kind: output, shape index: {}]  }
   0x1   :  { %11 = vsyncpa [#allocation5], 0 }
   0x2   :  { %12 = vsyncpa [#allocation8], 0  ;;  %s3975_s18 = smov 0  }
   0x3 LB: > { %s181_s21 = sshll.u32 %s6238_s2, 4  ;;  %s3984_s22 = sadd.s32 4294967295, %s3931_s18   ;;  %s3931_s18 = sphi %s3975_s18, %s18_s18   ;;  %s182_s21 = int_to_ptr.vmem [resolvable:$true] %s181_s21 }
   0x4   : > { %p3439_p0 = scmp.ge.s32.totalorder %s3931_s18, 1  ;;  %p159_p1 = scmp.lt.s32.totalorder %s3931_s18, 3 }
   0x5   : > { %p3819_p2 = scmp.eq.s32.totalorder %s3984_s22, 0  ;;  %s171_s26 = sshll.u32 %s6237_s1, 4  ;;  %s172_s26 = int_to_ptr.vmem [resolvable:$true] %s171_s26 }
   0x6   : > { %p3989_p3 = pnand %p3439_p0, %p159_p1  ;;  %s191_s29 = sshll.u32 %s6239_s3, 4  ;;  %s192_s29 = int_to_ptr.vmem [resolvable:$true] %s191_s29 }
   0x7   : > { %s201_s7 = sshll.u32 %s6240_s4, 4  ;;  %s3933_s8 = smov [#allocation4]   ;;  %s202_s7 = int_to_ptr.vmem [resolvable:$true] %s201_s7 }
   0x8   : > { %p3806_p4 = pneg %p3989_p3  ;;  %s3934_s9 = smov [#allocation2]  }
   0x9   : > { %s3935_s10 = smov [#allocation6]   ;;  %s3936_s11 = smov [#allocation7]  }
   0xa   : > { %p3807_p5 = pnand %p3819_p2, %p3806_p4 }
   0xb   : > { %222 = sbr.rel (%p3989_p3) target bundleno = 929 (0x3a1), region = 40 }
   0xc   : > { %3812 = dma.vmem_to_smem (!%p3807_p5), %s182_s21, 16, %s3933_s8, [#allocation5]  }
   0xd   : > { %3809 = dma.vmem_to_smem (!%p3807_p5), %s172_s26, 32, %s3934_s9, [#allocation3]  }
   0xe   : > { %3815 = dma.vmem_to_smem (!%p3807_p5), %s192_s29, 32, %s3935_s10, [#allocation5]  }
   0xf   : > { %3818 = dma.vmem_to_smem (!%p3807_p5), %s202_s7, 16, %s3936_s11, [#allocation8]  }
  0x10   : > { %3918 = dma.done.wait (%p3819_p2), [#allocation3], 32  }
  0x11   : > { %3920 = vsyncadd (%p3819_p2), [#allocation3], 4294967264 }
  0x12   : > { %3922 = dma.done.wait (%p3819_p2), [#allocation5], 48  }
  0x13   : > { %3924 = vsyncadd (%p3819_p2), [#allocation5], 4294967248 }
  0x14   : > { %3926 = dma.done.wait (%p3819_p2), [#allocation8], 16  }
  0x15   : > { %3928 = vsyncadd (%p3819_p2), [#allocation8], 4294967280 }
  0x16   : > { %244 = sfence }
  0x17   : > { %p267_p6 = scmp.lt.s32.totalorder %s3984_s22, 1  ;;  %s3459_s12 = sld [smem:[#allocation2 + $0x5]]  ;;  %vm295_vm0 = vcmask 1039360   ;;  %vm306_vm1 = vcmask 1031168   ;;  %vm317_vm2 = vcmask 916480   ;;  %vm328_vm3 = vcmask 908288  }
  0x18   : > { %s3457_s13 = sld [smem:[#allocation2 + $0x3]]  ;;  %s3937_s24 = smov 110   ;;  %vm339_vm4 = vcmask 900096   ;;  %vm350_vm5 = vcmask 785408   ;;  %vm361_vm6 = vcmask 777216   ;;  %vm372_vm7 = vcmask 769024  }
  0x19   : > { %s6312_s22 = smov (!%p267_p6, %s3984_s22), 1  ;;  %s3455_s14 = sld [smem:[#allocation2 + $0x1]] }
  0x1a   : > { %s3789_s15 = smul.u32 12, %s6312_s22  ;;  %s3460_s16 = sld [smem:[#allocation2 + $0x6]] }
  0x1b   : > { %s3458_s21 = sld [smem:[#allocation2 + $0x4]]  ;;  %s3938_s25 = smov 112  }
  0x1c   : > { %s4028_s20 = scalar_lea.vmem %s6236_s0, %s3789_s15  ;;  %s3456_s23 = sld [smem:[#allocation2 + $0x2]] }
  0x1d   : > { %v333_v0 = vstv %s3459_s12  ;;  %v4031_v1 = vld [vmem:[%s4028_s20] ss:$4 sm:$0x7]  ;;  %s3464_s26 = sld [smem:[#allocation2 + $0xa]]  ;;  %s3939_s28 = smov 127  }
  0x1e   : > { %v311_v2 = vstv %s3457_s13  ;;  %v334_v3 = vmul.f32 %v333_v0, %v4031_v1  ;;  %s3462_s27 = sld [smem:[#allocation2 + $0x8]]  ;;  %s3940_s30 = smov 96   ;;  %v4045_v13 = vld [vmem:[%s4028_s20 + $0x1] ss:$4 sm:$0x7] }
  0x1f   : > { %v312_v4 = vmul.f32 %v311_v2, %v4031_v1  ;;  %v289_v5 = vstv %s3455_s14  ;;  %s3461_s29 = sld [smem:[#allocation2 + $0x7]]  ;;  %s3941_s6 = smov 111   ;;  %v4066_v32 = vld [vmem:[%s4028_s20 + $0x2] ss:$4 sm:$0x7] }
  0x20   : > { %336 = vrot.lane.b32.xlu2 %v334_v3, %s3937_s24  ;;  %v290_v6 = vmul.f32 %v289_v5, %v4031_v1  ;;  %v344_v7 = vstv %s3460_s16  ;;  %s3467_s7 = sld [smem:[#allocation2 + $0xd]]  ;;  %s3942_s9 = smov 126  }
  0x21   : > { %314 = vrot.lane.b32.xlu1 %v312_v4, %s3938_s25  ;;  %v322_v8 = vstv %s3458_s21  ;;  %v345_v10 = vmul.f32 %v344_v7, %v4031_v1  ;;  %s3466_s8 = sld [smem:[#allocation2 + $0xc]]  ;;  %s3943_s11 = smov 94  }
  0x22   : > { %292 = vrot.lane.b32.xlu0 %v290_v6, %s3939_s28  ;;  %v300_v9 = vstv %s3456_s23  ;;  %v323_v11 = vmul.f32 %v322_v8, %v4031_v1  ;;  %s3465_s10 = sld [smem:[#allocation2 + $0xb]]  ;;  %s3944_s14 = smov 95  }
  0x23   : > { %v301_v12 = vmul.f32 %v300_v9, %v4031_v1  ;;  %v381_v14 = vstv %s3464_s26  ;;  %s3470_s12 = sld [smem:[#allocation2 + $0x10]] }
  0x24   : > { %v366_v15 = vstv %s3462_s27  ;;  %v382_v17 = vmul.f32 %v4045_v13, %v381_v14  ;;  %s3469_s13 = sld [smem:[#allocation2 + $0xf]] }
  0x25   : > { %v355_v16 = vstv %s3461_s29  ;;  %v367_v18 = vmul.f32 %v366_v15, %v4031_v1  ;;  %s3468_s15 = sld [smem:[#allocation2 + $0xe]] }
  0x26   : > { %v356_v19 = vmul.f32 %v355_v16, %v4031_v1  ;;  %v411_v20 = vstv %s3467_s7  ;;  %s3474_s16 = sld [smem:[#allocation2 + $0x14]] }
  0x27   : > { %v401_v21 = vstv %s3466_s8  ;;  %v412_v23 = vmul.f32 %v4045_v13, %v411_v20  ;;  %s3473_s17 = sld [smem:[#allocation2 + $0x13]] }
  0x28   : > { %347 = vrot.lane.b32.xlu2 %v345_v10, %s3940_s30  ;;  %v391_v22 = vstv %s3465_s10  ;;  %v402_v24 = vmul.f32 %v4045_v13, %v401_v21  ;;  %s3471_s19 = sld [smem:[#allocation2 + $0x11]] }
  0x29   : > { %325 = vrot.lane.b32.xlu1 %v323_v11, %s3941_s6  ;;  %v392_v25 = vmul.f32 %v4045_v13, %v391_v22  ;;  %v441_v26 = vstv %s3470_s12  ;;  %s3477_s21 = sld [smem:[#allocation2 + $0x17]] }
  0x2a   : > { %303 = vrot.lane.b32.xlu0 %v301_v12, %s3942_s9  ;;  %v431_v27 = vstv %s3469_s13  ;;  %v442_v29 = vmul.f32 %v4045_v13, %v441_v26  ;;  %s3476_s23 = sld [smem:[#allocation2 + $0x16]] }
  0x2b   : > { %v421_v28 = vstv %s3468_s15  ;;  %v432_v30 = vmul.f32 %v4045_v13, %v431_v27  ;;  %s3475_s26 = sld [smem:[#allocation2 + $0x15]] }
  0x2c   : > { %v422_v31 = vmul.f32 %v4045_v13, %v421_v28  ;;  %v475_v33 = vstv %s3474_s16  ;;  %s3480_s27 = sld [smem:[#allocation2 + $0x1a]] }
  0x2d   : > { %v465_v34 = vstv %s3473_s17  ;;  %v476_v36 = vmul.f32 %v4066_v32, %v475_v33  ;;  %s3479_s29 = sld [smem:[#allocation2 + $0x19]] }
  0x2e   : > { %v451_v35 = vstv %s3471_s19  ;;  %v466_v37 = vmul.f32 %v4066_v32, %v465_v34  ;;  %s3478_s7 = sld [smem:[#allocation2 + $0x18]] }
  0x2f   : > { %v452_v38 = vmul.f32 %v4045_v13, %v451_v35  ;;  %v505_v39 = vstv %s3477_s21  ;;  %s3485_s8 = sld [smem:[#allocation2 + $0x1e]] }
  0x30   : > { %384 = vrot.lane.b32.xlu2 %v382_v17, %s3939_s28  ;;  %v495_v40 = vstv %s3476_s23  ;;  %v506_v42 = vmul.f32 %v4066_v32, %v505_v39  ;;  %s3484_s10 = sld [smem:[#allocation2 + $0x1d]] }
  0x31   : > { %369 = vrot.lane.b32.xlu1 %v367_v18, %s3943_s11  ;;  %v485_v41 = vstv %s3475_s26  ;;  %v496_v43 = vmul.f32 %v4066_v32, %v495_v40  ;;  %s3483_s12 = sld [smem:[#allocation2 + $0x1c]] }
  0x32   : > { %358 = vrot.lane.b32.xlu0 %v356_v19, %s3944_s14  ;;  %v486_v44 = vmul.f32 %v4066_v32, %v485_v41  ;;  %v535_v45 = vstv %s3480_s27  ;;  %s3488_s13 = sld [smem:[#allocation2 + $0x21]] }
  0x33   : > { %v525_v46 = vstv %s3479_s29  ;;  %v536_v48 = vmul.f32 %v4066_v32, %v535_v45  ;;  %s3487_s15 = sld [smem:[#allocation2 + $0x20]] }
  0x34   : > { %v515_v47 = vstv %s3478_s7  ;;  %v526_v49 = vmul.f32 %v4066_v32, %v525_v46  ;;  %s3486_s16 = sld [smem:[#allocation2 + $0x1f]] }
  0x35   : > { %v516_v50 = vmul.f32 %v4066_v32, %v515_v47  ;;  %v571_v51 = vstv %s3485_s8  ;;  %s3492_s17 = sld [smem:[#allocation2 + $0x25]] }
  0x36   : > { %v561_v52 = vstv %s3484_s10  ;;  %v572_v54 = vmul.f32 %v571_v51, %v4031_v1  ;;  %s3490_s19 = sld [smem:[#allocation2 + $0x23]] }
  0x37   : > { %v551_v53 = vstv %s3483_s12  ;;  %v562_v55 = vmul.f32 %v561_v52, %v4031_v1  ;;  %s3489_s21 = sld [smem:[#allocation2 + $0x22]] }
  0x38   : > { %414 = vrot.lane.b32.xlu2 %v412_v23, %s3941_s6  ;;  %v552_v56 = vmul.f32 %v551_v53, %v4031_v1  ;;  %v601_v57 = vstv %s3488_s13  ;;  %s3495_s23 = sld [smem:[#allocation2 + $0x28]] }
  0x39   : > { %404 = vrot.lane.b32.xlu1 %v402_v24, %s3938_s25  ;;  %v591_v58 = vstv %s3487_s15  ;;  %v602_v60 = vmul.f32 %v601_v57, %v4031_v1  ;;  %s3494_s26 = sld [smem:[#allocation2 + $0x27]] }
  0x3a   : > { %394 = vrot.lane.b32.xlu0 %v392_v25, %s3942_s9  ;;  %v581_v59 = vstv %s3486_s16  ;;  %v592_v61 = vmul.f32 %v591_v58, %v4031_v1  ;;  %s3493_s27 = sld [smem:[#allocation2 + $0x26]] }
  0x3b   : > { %v582_v62 = vmul.f32 %v581_v59, %v4031_v1  ;;  %v635_v63 = vstv %s3492_s17  ;;  %s3498_s29 = sld [smem:[#allocation2 + $0x2b]] }
  0x3c   : > { %v621_v0 = vstv %s3490_s19  ;;  %v636_v3 = vmul.f32 %v4045_v13, %v635_v63  ;;  %s3497_s7 = sld [smem:[#allocation2 + $0x2a]] }
  0x3d   : > { %v611_v2 = vstv %s3489_s21  ;;  %v622_v4 = vmul.f32 %v621_v0, %v4031_v1  ;;  %s3496_s8 = sld [smem:[#allocation2 + $0x29]] }
  0x3e   : > { %v612_v5 = vmul.f32 %v611_v2, %v4031_v1  ;;  %v665_v6 = vstv %s3495_s23  ;;  %s3502_s10 = sld [smem:[#allocation2 + $0x2f]] }
  0x3f   : > { %v655_v7 = vstv %s3494_s26  ;;  %v666_v9 = vmul.f32 %v4045_v13, %v665_v6  ;;  %s3501_s12 = sld [smem:[#allocation2 + $0x2e]] }
  0x40   : > { %444 = vrot.lane.b32.xlu2 %v442_v29, %s3944_s14  ;;  %v645_v8 = vstv %s3493_s27  ;;  %v656_v10 = vmul.f32 %v4045_v13, %v655_v7  ;;  %s3499_s13 = sld [smem:[#allocation2 + $0x2c]] }
  0x41   : > { %434 = vrot.lane.b32.xlu1 %v432_v30, %s3940_s30  ;;  %v646_v11 = vmul.f32 %v4045_v13, %v645_v8  ;;  %v695_v12 = vstv %s3498_s29  ;;  %s3505_s15 = sld [smem:[#allocation2 + $0x32]] }
  0x42   : > { %424 = vrot.lane.b32.xlu0 %v422_v31, %s3937_s24  ;;  %v685_v14 = vstv %s3497_s7  ;;  %v696_v17 = vmul.f32 %v4045_v13, %v695_v12  ;;  %s3504_s16 = sld [smem:[#allocation2 + $0x31]] }
  0x43   : > { %v675_v16 = vstv %s3496_s8  ;;  %v686_v18 = vmul.f32 %v4045_v13, %v685_v14  ;;  %s3503_s17 = sld [smem:[#allocation2 + $0x30]] }
  0x44   : > { %v676_v19 = vmul.f32 %v4045_v13, %v675_v16  ;;  %v729_v20 = vstv %s3502_s10  ;;  %s3508_s19 = sld [smem:[#allocation2 + $0x35]] }
  0x45   : > { %v719_v21 = vstv %s3501_s12  ;;  %v730_v24 = vmul.f32 %v4066_v32, %v729_v20  ;;  %s3507_s21 = sld [smem:[#allocation2 + $0x34]] }
  0x46   : > { %v705_v23 = vstv %s3499_s13  ;;  %v720_v25 = vmul.f32 %v4066_v32, %v719_v21  ;;  %s3506_s23 = sld [smem:[#allocation2 + $0x33]] }
  0x47   : > { %v706_v26 = vmul.f32 %v4045_v13, %v705_v23  ;;  %v759_v27 = vstv %s3505_s15  ;;  %s3513_s26 = sld [smem:[#allocation2 + $0x39]] }
  0x48   : > { %478 = vrot.lane.b32.xlu2 %v476_v36, %s3942_s9  ;;  %v749_v28 = vstv %s3504_s16  ;;  %v760_v31 = vmul.f32 %v4066_v32, %v759_v27  ;;  %s3512_s27 = sld [smem:[#allocation2 + $0x38]] }
  0x49   : > { %468 = vrot.lane.b32.xlu1 %v466_v37, %s3939_s28  ;;  %v739_v30 = vstv %s3503_s17  ;;  %v750_v33 = vmul.f32 %v4066_v32, %v749_v28  ;;  %s3511_s29 = sld [smem:[#allocation2 + $0x37]] }
  0x4a   : > { %454 = vrot.lane.b32.xlu0 %v452_v38, %s3943_s11  ;;  %v740_v34 = vmul.f32 %v4066_v32, %v739_v30  ;;  %v789_v35 = vstv %s3508_s19  ;;  %s3516_s7 = sld [smem:[#allocation2 + $0x3c]] }
  0x4b   : > { %v779_v36 = vstv %s3507_s21  ;;  %v790_v41 = vmul.f32 %v4066_v32, %v789_v35  ;;  %s3515_s8 = sld [smem:[#allocation2 + $0x3b]] }
  0x4c   : > { %v769_v39 = vstv %s3506_s23  ;;  %s3514_s10 = sld [smem:[#allocation2 + $0x3a]] }
  0x4d   : > { %s3520_s12 = sld [smem:[#allocation2 + $0x40]] }
  0x4e   : > { %v815_v45 = vstv %s3512_s27  ;;  %s3518_s13 = sld [smem:[#allocation2 + $0x3e]] }
  0x4f   : > { %v816_v51 = vmul.f32 %v815_v45, %v4031_v1  ;;  %s3517_s15 = sld [smem:[#allocation2 + $0x3d]] }
  0x50   : > { %508 = vrot.lane.b32.xlu2 %v506_v42, %s3937_s24  ;;  %v780_v42 = vmul.f32 %v4066_v32, %v779_v36  ;;  %v855_v53 = vstv %s3516_s7  ;;  %s3523_s16 = sld [smem:[#allocation2 + $0x43]] }
  0x51   : > { %498 = vrot.lane.b32.xlu1 %v496_v43, %s3941_s6  ;;  %v770_v43 = vmul.f32 %v4066_v32, %v769_v39  ;;  %v856_v59 = vmul.f32 %v855_v53, %v4031_v1  ;;  %s3522_s17 = sld [smem:[#allocation2 + $0x42]] }
  0x52   : > { %488 = vrot.lane.b32.xlu0 %v486_v44, %s3938_s25  ;;  %v825_v44 = vstv %s3513_s26  ;;  %v835_v57 = vstv %s3514_s10  ;;  %s3521_s19 = sld [smem:[#allocation2 + $0x41]] }
  0x53   : > { %s3526_s21 = sld [smem:[#allocation2 + $0x46]] }
  0x54   : > { %v875_v63 = vstv %s3518_s13  ;;  %s3525_s23 = sld [smem:[#allocation2 + $0x45]] }
  0x55   : > { %v876_v6 = vmul.f32 %v875_v63, %v4031_v1  ;;  %s3524_s26 = sld [smem:[#allocation2 + $0x44]] }
  0x56   : > { %v919_v8 = vstv %s3523_s16  ;;  %s3530_s27 = sld [smem:[#allocation2 + $0x4a]] }
  0x57   : > { %v920_v16 = vmul.f32 %v4045_v13, %v919_v8  ;;  %s3527_s7 = sld [smem:[#allocation2 + $0x47]] }
  0x58   : > { %538 = vrot.lane.b32.xlu2 %v536_v48, %s3943_s11  ;;  %v805_v48 = vstv %s3511_s29  ;;  %v899_v12 = vstv %s3521_s19  ;;  %s3529_s29 = sld [smem:[#allocation2 + $0x49]] }
  0x59   : > { %528 = vrot.lane.b32.xlu1 %v526_v49, %s3944_s14  ;;  %v806_v52 = vmul.f32 %v805_v48, %v4031_v1  ;;  %s3532_s10 = sld [smem:[#allocation2 + $0x4c]] }
  0x5a   : > { %518 = vrot.lane.b32.xlu0 %v516_v50, %s3940_s30  ;;  %v826_v50 = vmul.f32 %v825_v44, %v4031_v1  ;;  %v939_v20 = vstv %s3525_s23  ;;  %s3536_s13 = sld [smem:[#allocation2 + $0x50]] }
  0x5b   : > { %v940_v27 = vmul.f32 %v4045_v13, %v939_v20  ;;  %s3534_s16 = sld [smem:[#allocation2 + $0x4e]] }
  0x5c   : > { %v983_v30 = vstv %s3530_s27  ;;  %s3540_s19 = sld [smem:[#allocation2 + $0x53]] }
  0x5d   : > { %v959_v35 = vstv %s3527_s7  ;;  %v984_v39 = vmul.f32 %v4066_v32, %v983_v30  ;;  %s3544_s23 = sld [smem:[#allocation2 + $0x57]] }
  0x5e   : > { %s3542_s27 = sld [smem:[#allocation2 + $0x55]] }
  0x5f   : > { %v1003_v44 = vstv %s3532_s10  ;;  %s3546_s7 = sld [smem:[#allocation2 + $0x59]] }
  0x60   : > { %574 = vrot.lane.b32.xlu2 %v572_v54, %s3938_s25  ;;  %v845_v54 = vstv %s3515_s8  ;;  %s3533_s8 = sld [smem:[#allocation2 + $0x4d]]  ;;  %v1004_v53 = vmul.f32 %v4066_v32, %v1003_v44 }
  0x61   : > { %564 = vrot.lane.b32.xlu1 %v562_v55, %s3942_s9  ;;  %s3551_s10 = sld [smem:[#allocation2 + $0x5e]] }
  0x62   : > { %554 = vrot.lane.b32.xlu0 %v552_v56, %s3939_s28  ;;  %v1069_v8 = vstv %s3540_s19  ;;  %s3558_s19 = sld [smem:[#allocation2 + $0x65]] }
  0x64   : > { %v1089_v30 = vstv %s3542_s27  ;;  %s3560_s27 = sld [smem:[#allocation2 + $0x67]] }
  0x68   : > { %604 = vrot.lane.b32.xlu2 %v602_v60, %s3940_s30  ;;  %v846_v60 = vmul.f32 %v845_v54, %v4031_v1 }
  0x69   : > { %594 = vrot.lane.b32.xlu1 %v592_v61, %s3937_s24  ;;  %v836_v61 = vmul.f32 %v835_v57, %v4031_v1  ;;  %v1043_v57 = vstv %s3536_s13  ;;  %s3549_s13 = sld [smem:[#allocation2 + $0x5c]] }
  0x6a   : > { %584 = vrot.lane.b32.xlu0 %v582_v62, %s3941_s6  ;;  %v889_v62 = vstv %s3520_s12  ;;  %s3531_s12 = sld [smem:[#allocation2 + $0x4b]] }
  0x70   : > { %638 = vrot.lane.b32.xlu2 %v636_v3, %s3939_s28  ;;  %v865_v3 = vstv %s3517_s15  ;;  %s3535_s15 = sld [smem:[#allocation2 + $0x4f]] }
  0x71   : > { %624 = vrot.lane.b32.xlu1 %v622_v4, %s3943_s11  ;;  %v866_v7 = vmul.f32 %v865_v3, %v4031_v1  ;;  %v1044_v3 = vmul.f32 %v4066_v32, %v1043_v57 }
  0x72   : > { %614 = vrot.lane.b32.xlu0 %v612_v5, %s3944_s14  ;;  %v890_v5 = vmul.f32 %v4045_v13, %v889_v62  ;;  %v1023_v62 = vstv %s3534_s16  ;;  %s3553_s16 = sld [smem:[#allocation2 + $0x60]] }
  0x78   : > { %668 = vrot.lane.b32.xlu2 %v666_v9, %s3941_s6  ;;  %v909_v9 = vstv %s3522_s17  ;;  %s3541_s17 = sld [smem:[#allocation2 + $0x54]] }
  0x79   : > { %658 = vrot.lane.b32.xlu1 %v656_v10, %s3938_s25 }
  0x7a   : > { %648 = vrot.lane.b32.xlu0 %v646_v11, %s3942_s9  ;;  %v4111_v15 = vpop.permute.xlu2 %336 }
  0x80   : > { %698 = vrot.lane.b32.xlu2 %v696_v17, %s3944_s14  ;;  %v910_v17 = vmul.f32 %v4045_v13, %v909_v9 }
  0x81   : > { %688 = vrot.lane.b32.xlu1 %v686_v18, %s3940_s30  ;;  %v900_v18 = vmul.f32 %v4045_v13, %v899_v12 }
  0x82   : > { %678 = vrot.lane.b32.xlu0 %v676_v19, %s3937_s24  ;;  %v4119_v22 = vpop.permute.xlu2 %347  ;;  %v949_v19 = vstv %s3526_s21  ;;  %s3539_s21 = sld [smem:[#allocation2 + $0x52]] }
  0x88   : > { %732 = vrot.lane.b32.xlu2 %v730_v24, %s3942_s9  ;;  %v929_v24 = vstv %s3524_s26  ;;  %s3543_s26 = sld [smem:[#allocation2 + $0x56]] }
  0x89   : > { %722 = vrot.lane.b32.xlu1 %v720_v25, %s3939_s28  ;;  %v930_v28 = vmul.f32 %v4045_v13, %v929_v24  ;;  %v1109_v24 = vstv %s3544_s23  ;;  %s3555_s23 = sld [smem:[#allocation2 + $0x62]] }
  0x8a   : > { %708 = vrot.lane.b32.xlu0 %v706_v26, %s3943_s11  ;;  %v4127_v29 = vpop.permute.xlu2 %384  ;;  %v950_v26 = vmul.f32 %v4045_v13, %v949_v19  ;;  %v1070_v19 = vmul.f32 %v1069_v8, %v4031_v1 }
  0x90   : > { %762 = vrot.lane.b32.xlu2 %v760_v31, %s3937_s24  ;;  %v973_v31 = vstv %s3529_s29  ;;  %s3548_s29 = sld [smem:[#allocation2 + $0x5b]] }
  0x91   : > { %752 = vrot.lane.b32.xlu1 %v750_v33, %s3941_s6 }
  0x92   : > { %742 = vrot.lane.b32.xlu0 %v740_v34, %s3938_s25  ;;  %v4135_v37 = vpop.permute.xlu2 %414 }
  0x93   : > { %v4137_v38 = vpop.permute.xlu1 %314 }
  0x94   : > { %v4139_v40 = vpop.permute.xlu0 %292 }
  0x98   : > { %792 = vrot.lane.b32.xlu2 %v790_v41, %s3943_s11  ;;  %v974_v41 = vmul.f32 %v4066_v32, %v973_v31 }
  0x99   : > { %782 = vrot.lane.b32.xlu1 %v780_v42, %s3944_s14  ;;  %v960_v42 = vmul.f32 %v4045_v13, %v959_v35  ;;  %v1110_v35 = vmul.f32 %v1109_v24, %v4031_v1  ;;  %v1193_v24 = vstv %s3553_s16  ;;  %s3572_s16 = sld [smem:[#allocation2 + $0x72]] }
  0x9a   : > { %772 = vrot.lane.b32.xlu0 %v770_v43, %s3940_s30  ;;  %v4147_v46 = vpop.permute.xlu2 %444  ;;  %v1013_v43 = vstv %s3533_s8  ;;  %s3545_s8 = sld [smem:[#allocation2 + $0x58]] }
  0x9b   : > { %v4149_v47 = vpop.permute.xlu1 %325 }
  0x9c   : > { %v4151_v49 = vpop.permute.xlu0 %303 }
  0xa0   : > { %828 = vrot.lane.b32.xlu2 %v826_v50, %s3938_s25  ;;  %v993_v50 = vstv %s3531_s12  ;;  %s3550_s12 = sld [smem:[#allocation2 + $0x5d]] }
  0xa1   : > { %818 = vrot.lane.b32.xlu1 %v816_v51, %s3942_s9  ;;  %v994_v54 = vmul.f32 %v4066_v32, %v993_v50 }
  0xa2   : > { %808 = vrot.lane.b32.xlu0 %v806_v52, %s3939_s28  ;;  %v4159_v55 = vpop.permute.xlu2 %478  ;;  %v1014_v52 = vmul.f32 %v4066_v32, %v1013_v43  ;;  %v1129_v43 = vstv %s3546_s7  ;;  %s3564_s7 = sld [smem:[#allocation2 + $0x6b]] }
  0xa3   : > { %v4161_v56 = vpop.permute.xlu1 %369  ;;  %v1130_v57 = vmul.f32 %v1129_v43, %v4031_v1 }
  0xa4   : > { %v4163_v58 = vpop.permute.xlu0 %358 }
  0xa8   : > { %858 = vrot.lane.b32.xlu2 %v856_v59, %s3940_s30  ;;  %v1033_v59 = vstv %s3535_s15  ;;  %s3554_s15 = sld [smem:[#allocation2 + $0x61]] }
  0xa9   : > { %848 = vrot.lane.b32.xlu1 %v846_v60, %s3937_s24 }
  0xaa   : > { %838 = vrot.lane.b32.xlu0 %v836_v61, %s3941_s6  ;;  %v4171_v0 = vpop.permute.xlu2 %508 }
  0xab   : > { %v4173_v2 = vpop.permute.xlu1 %404 }
  0xac   : > { %v4175_v4 = vpop.permute.xlu0 %394 }
  0xb0   : > { %892 = vrot.lane.b32.xlu2 %v890_v5, %s3939_s28  ;;  %v1034_v5 = vmul.f32 %v4066_v32, %v1033_v59 }
  0xb1   : > { %878 = vrot.lane.b32.xlu1 %v876_v6, %s3943_s11  ;;  %v1024_v6 = vmul.f32 %v4066_v32, %v1023_v62  ;;  %v1173_v62 = vstv %s3551_s10  ;;  %s3562_s10 = sld [smem:[#allocation2 + $0x69]] }
  0xb2   : > { %868 = vrot.lane.b32.xlu0 %v866_v7, %s3944_s14  ;;  %v4183_v10 = vpop.permute.xlu2 %538  ;;  %v1079_v7 = vstv %s3541_s17  ;;  %s3552_s17 = sld [smem:[#allocation2 + $0x5f]] }
  0xb3   : > { %6265 = vst [vmem:[#allocation12_spill] sm:$0xff] %v4183_v10  ;;  %v4185_v11 = vpop.permute.xlu1 %434 }
  0xb4   : > { %v4187_v14 = vpop.permute.xlu0 %424 }
  0xb8   : > { %922 = vrot.lane.b32.xlu2 %v920_v16, %s3941_s6  ;;  %v1059_v16 = vstv %s3539_s21  ;;  %s3557_s21 = sld [smem:[#allocation2 + $0x64]] }
  0xb9   : > { %912 = vrot.lane.b32.xlu1 %v910_v17, %s3938_s25  ;;  %v1060_v20 = vmul.f32 %v1059_v16, %v4031_v1  ;;  %v1174_v16 = vmul.f32 %v4045_v13, %v1173_v62  ;;  %v1213_v62 = vstv %s3555_s23  ;;  %s282_s23 = sld [smem:[#allocation4]] }
  0xba   : > { %902 = vrot.lane.b32.xlu0 %v900_v18, %s3942_s9  ;;  %v4195_v21 = vpop.permute.xlu2 %574  ;;  %v1080_v18 = vmul.f32 %v1079_v7, %v4031_v1  ;;  %v1153_v7 = vstv %s3549_s13  ;;  %s3568_s13 = sld [smem:[#allocation2 + $0x6e]] }
  0xbb   : > { %v4197_v23 = vpop.permute.xlu1 %468 }
  0xbc   : > { %v4199_v25 = vpop.permute.xlu0 %454 }
  0xc0   : > { %952 = vrot.lane.b32.xlu2 %v950_v26, %s3944_s14  ;;  %v1099_v26 = vstv %s3543_s26  ;;  %s3561_s26 = sld [smem:[#allocation2 + $0x68]] }
  0xc1   : > { %942 = vrot.lane.b32.xlu1 %v940_v27, %s3940_s30 }
  0xc2   : > { %932 = vrot.lane.b32.xlu0 %v930_v28, %s3937_s24  ;;  %v4207_v33 = vpop.permute.xlu2 %604 }
  0xc3   : > { %v4209_v34 = vpop.permute.xlu1 %498 }
  0xc4   : > { %v4211_v36 = vpop.permute.xlu0 %488 }
  0xc8   : > { %986 = vrot.lane.b32.xlu2 %v984_v39, %s3942_s9  ;;  %v1100_v39 = vmul.f32 %v1099_v26, %v4031_v1 }
  0xc9   : > { %976 = vrot.lane.b32.xlu1 %v974_v41, %s3939_s28  ;;  %v1090_v41 = vmul.f32 %v1089_v30, %v4031_v1 }
  0xca   : > { %962 = vrot.lane.b32.xlu0 %v960_v42, %s3943_s11  ;;  %v4219_v45 = vpop.permute.xlu2 %638  ;;  %v1143_v42 = vstv %s3548_s29  ;;  %s3559_s29 = sld [smem:[#allocation2 + $0x66]] }
  0xcb   : > { %v4221_v48 = vpop.permute.xlu1 %528 }
  0xcc   : > { %6266 = vst [vmem:[#allocation13_spill] sm:$0xff] %v4221_v48  ;;  %v4223_v51 = vpop.permute.xlu0 %518 }
  0xd0   : > { %1016 = vrot.lane.b32.xlu2 %v1014_v52, %s3937_s24  ;;  %v1119_v52 = vstv %s3545_s8  ;;  %s3563_s8 = sld [smem:[#allocation2 + $0x6a]] }
  0xd1   : > { %1006 = vrot.lane.b32.xlu1 %v1004_v53, %s3941_s6  ;;  %v1120_v59 = vmul.f32 %v1119_v52, %v4031_v1  ;;  %v1237_v52 = vstv %s3558_s19  ;;  %s284_s19 = sld [smem:[#allocation2]] }
  0xd2   : > { %996 = vrot.lane.b32.xlu0 %v994_v54, %s3938_s25  ;;  %v4231_v60 = vpop.permute.xlu2 %668  ;;  %v1144_v54 = vmul.f32 %v4045_v13, %v1143_v42  ;;  %v1194_v42 = vmul.f32 %v4045_v13, %v1193_v24 }
  0xd3   : > { %v4233_v61 = vpop.permute.xlu1 %564 }
  0xd4   : > { %v4235_v63 = vpop.permute.xlu0 %554 }
  0xd8   : > { %1046 = vrot.lane.b32.xlu2 %v1044_v3, %s3943_s11  ;;  %v1163_v3 = vstv %s3550_s12  ;;  %s3569_s12 = sld [smem:[#allocation2 + $0x6f]] }
  0xd9   : > { %1036 = vrot.lane.b32.xlu1 %v1034_v5, %s3944_s14 }
  0xda   : > { %1026 = vrot.lane.b32.xlu0 %v1024_v6, %s3940_s30  ;;  %v4243_v9 = vpop.permute.xlu2 %698 }
  0xdb   : > { %v4245_v12 = vpop.permute.xlu1 %594 }
  0xdc   : > { %v4247_v17 = vpop.permute.xlu0 %584 }
  0xe0   : > { %1082 = vrot.lane.b32.xlu2 %v1080_v18, %s3938_s25  ;;  %v1164_v18 = vmul.f32 %v4045_v13, %v1163_v3 }
  0xe1   : > { %1072 = vrot.lane.b32.xlu1 %v1070_v19, %s3942_s9  ;;  %v1154_v19 = vmul.f32 %v4045_v13, %v1153_v7  ;;  %v1238_v7 = vmul.f32 %v4066_v32, %v1237_v52 }
  0xe2   : > { %1062 = vrot.lane.b32.xlu0 %v1060_v20, %s3939_s28  ;;  %v4255_v27 = vpop.permute.xlu2 %732  ;;  %v1203_v20 = vstv %s3554_s15  ;;  %s3567_s15 = sld [smem:[#allocation2 + $0x6d]] }
  0xe3   : > { %6267 = vst [vmem:[#allocation14_spill] sm:$0xff] %v4255_v27  ;;  %v4257_v28 = vpop.permute.xlu1 %624 }
  0xe4   : > { %v4259_v31 = vpop.permute.xlu0 %614 }
  0xe8   : > { %1112 = vrot.lane.b32.xlu2 %v1110_v35, %s3940_s30  ;;  %v1183_v35 = vstv %s3552_s17  ;;  %s3571_s17 = sld [smem:[#allocation2 + $0x71]] }
  0xe9   : > { %1102 = vrot.lane.b32.xlu1 %v1100_v39, %s3937_s24  ;;  %v1184_v43 = vmul.f32 %v4045_v13, %v1183_v35 }
  0xea   : > { %1092 = vrot.lane.b32.xlu0 %v1090_v41, %s3941_s6  ;;  %v4267_v44 = vpop.permute.xlu2 %762  ;;  %v1204_v41 = vmul.f32 %v4045_v13, %v1203_v20  ;;  %v1257_v20 = vstv %s3560_s27  ;;  %s4352_s27 = sld [smem:[#allocation2 + $0x74]] }
  0xeb   : > { %6268 = vst [vmem:[#allocation15_spill] sm:$0xff] %v4267_v44  ;;  %v4269_v50 = vpop.permute.xlu1 %658  ;;  %v1258_v52 = vmul.f32 %v4066_v32, %v1257_v20 }
  0xec   : > { %v4271_v53 = vpop.permute.xlu0 %648 }
  0xee   : > { %v1353_v44 = vstv %s3571_s17  ;;  %s4420_s17 = sld [smem:[#allocation2 + $0x80]] }
  0xf0   : > { %1146 = vrot.lane.b32.xlu2 %v1144_v54, %s3939_s28  ;;  %v1227_v54 = vstv %s3557_s21  ;;  %s3570_s21 = sld [smem:[#allocation2 + $0x70]] }
  0xf1   : > { %1132 = vrot.lane.b32.xlu1 %v1130_v57, %s3943_s11 }
  0xf2   : > { %1122 = vrot.lane.b32.xlu0 %v1120_v59, %s3944_s14  ;;  %v4279_v5 = vpop.permute.xlu2 %792 }
  0xf3   : > { %6269 = vst [vmem:[#allocation16_spill] sm:$0xff] %v4279_v5  ;;  %v4281_v6 = vpop.permute.xlu1 %688  ;;  %v1277_v5 = vstv %s3562_s10  ;;  %s3577_s10 = sld [smem:[#allocation2 + $0x77]] }
  0xf4   : > { %v4283_v8 = vpop.permute.xlu0 %678 }
  0xf8   : > { %1176 = vrot.lane.b32.xlu2 %v1174_v16, %s3941_s6  ;;  %v1228_v16 = vmul.f32 %v4066_v32, %v1227_v54 }
  0xf9   : > { %1166 = vrot.lane.b32.xlu1 %v1164_v18, %s3938_s25  ;;  %v1214_v18 = vmul.f32 %v4045_v13, %v1213_v62  ;;  %v1297_v62 = vstv %s3564_s7  ;;  %s4368_s7 = sld [smem:[#allocation2 + $0x79]] }
  0xfa   : > { %1156 = vrot.lane.b32.xlu0 %v1154_v19, %s3942_s9  ;;  %v4291_v26 = vpop.permute.xlu2 %828  ;;  %v1267_v19 = vstv %s3561_s26  ;;  %v1298_v20 = vmul.f32 %v4066_v32, %v1297_v62  ;;  %v1313_v62 = vstv %s3567_s15  ;;  %s4350_s26 = sld [smem:[#allocation2 + $0x76]] }
  0xfb   : > { %v4293_v30 = vpop.permute.xlu1 %722  ;;  %s4406_s15 = sld [smem:[#allocation2 + $0x7a]] }
  0xfc   : > { %6270 = vst [vmem:[#allocation17_spill] sm:$0xff] %v4293_v30  ;;  %v4295_v39 = vpop.permute.xlu0 %708 }
  0xfd   : > { %6271 = vst [vmem:[#allocation18_spill] sm:$0xff] %v4295_v39 }
 0x100   : > { %1206 = vrot.lane.b32.xlu2 %v1204_v41, %s3944_s14  ;;  %v1247_v41 = vstv %s3559_s29  ;;  %s3573_s29 = sld [smem:[#allocation2 + $0x73]]  ;;  %v1397_v30 = vstv %s4350_s26 }
 0x101   : > { %1196 = vrot.lane.b32.xlu1 %v1194_v42, %s3940_s30  ;;  %v1248_v54 = vmul.f32 %v4066_v32, %v1247_v41  ;;  %v1398_v10 = vmul.f32 %v4045_v13, %v1397_v30  ;;  %s4446_s26 = sld [smem:[#allocation2 + $0x9]] }
 0x102   : > { %1186 = vrot.lane.b32.xlu0 %v1184_v43, %s3937_s24  ;;  %v4303_v57 = vpop.permute.xlu2 %858  ;;  %v1268_v43 = vmul.f32 %v4066_v32, %v1267_v19 }
 0x103   : > { %v4305_v59 = vpop.permute.xlu1 %752 }
 0x104   : > { %6272 = vst [vmem:[#allocation19_spill] sm:$0xff] %v4305_v59  ;;  %v4307_v3 = vpop.permute.xlu0 %742  ;;  %v1354_v59 = vmul.f32 %v1353_v44, %v4031_v1 }
 0x105   : > { %6273 = vst [vmem:[#allocation20_spill] sm:$0xff] %v4307_v3 }
 0x108   : > { %1240 = vrot.lane.b32.xlu2 %v1238_v7, %s3942_s9  ;;  %v1287_v7 = vstv %s3563_s8  ;;  %s4373_s8 = sld [smem:[#allocation2 + $0x78]] }
 0x109   : > { %1230 = vrot.lane.b32.xlu1 %v1228_v16, %s3939_s28  ;;  %v1288_v41 = vmul.f32 %v4066_v32, %v1287_v7 }
 0x10a   : > { %1216 = vrot.lane.b32.xlu0 %v1214_v18, %s3943_s11  ;;  %v4315_v24 = vpop.permute.xlu2 %892 }
 0x10b   : > { %v4317_v35 = vpop.permute.xlu1 %782 }
 0x10c   : > { %6274 = vst [vmem:[#allocation21_spill] sm:$0xff] %v4317_v35  ;;  %v4319_v42 = vpop.permute.xlu0 %772 }
 0x10d   : > { %6275 = vst [vmem:[#allocation22_spill] sm:$0xff] %v4319_v42 }
 0x10e   : > { %v1417_v30 = vstv %s4373_s8  ;;  %s4491_s8 = sld [smem:[#allocation2 + $0x86]] }
 0x110   : > { %1270 = vrot.lane.b32.xlu2 %v1268_v43, %s3937_s24  ;;  %v1278_v43 = vmul.f32 %v4066_v32, %v1277_v5 }
 0x111   : > { %1260 = vrot.lane.b32.xlu1 %v1258_v52, %s3941_s6  ;;  %v1333_v52 = vstv %s3569_s12  ;;  %s4392_s12 = sld [smem:[#allocation2 + $0x7c]] }
 0x112   : > { %1250 = vrot.lane.b32.xlu0 %v1248_v54, %s3938_s25  ;;  %v4327_v16 = vpop.permute.xlu2 %922  ;;  %v1323_v54 = vstv %s3568_s13  ;;  %v1334_v5 = vmul.f32 %v1333_v52, %v4031_v1  ;;  %s4396_s13 = sld [smem:[#allocation2 + $0x7b]] }
 0x113   : > { %6276 = vst [vmem:[#allocation23_spill] sm:$0xff] %v4327_v16  ;;  %v4329_v18 = vpop.permute.xlu1 %818  ;;  %v305_v16 = vrot.slane %v4151_v49, 1 }
 0x114   : > { %v4331_v19 = vpop.permute.xlu0 %808 }
 0x118   : > { %1300 = vrot.lane.b32.xlu2 %v1298_v20, %s3943_s11  ;;  %v1324_v20 = vmul.f32 %v1323_v54, %v4031_v1  ;;  %v285_v54 = vstv %s284_s19  ;;  %s4424_s19 = sld [smem:[#allocation2 + $0x7f]] }
 0x119   : > { %1290 = vrot.lane.b32.xlu1 %v1288_v41, %s3944_s14  ;;  %v1314_v41 = vmul.f32 %v1313_v62, %v4031_v1  ;;  %v1343_v62 = vstv %s3570_s21  ;;  %v286_v3 = vmul.f32 %v285_v54, %v4031_v1  ;;  %s4426_s21 = sld [smem:[#allocation4 + $0x1]] }
 0x11a   : > { %1280 = vrot.lane.b32.xlu0 %v1278_v43, %s3940_s30  ;;  %v4339_v35 = vpop.permute.xlu2 %952  ;;  %v1363_v43 = vstv %s3572_s16  ;;  %v1344_v27 = vmul.f32 %v1343_v62, %v4031_v1  ;;  %s4416_s16 = sld [smem:[#allocation2 + $0x1b]] }
 0x11b   : > { %6277 = vst [vmem:[#allocation24_spill] sm:$0xff] %v4339_v35  ;;  %v4341_v42 = vpop.permute.xlu1 %848 }
 0x11c   : > { %v4343_v7 = vpop.permute.xlu0 %838 }
 0x120   : > { %1336 = vrot.lane.b32.xlu2 %v1334_v5, %s3938_s25 }
 0x121   : > { %1326 = vrot.lane.b32.xlu1 %v1324_v20, %s3942_s9  ;;  %v1364_v20 = vmul.f32 %v1363_v43, %v4031_v1  ;;  %v1383_v43 = vstv %s4352_s27  ;;  %s4455_s27 = sld [smem:[#allocation2 + $0x83]] }
 0x122   : > { %1316 = vrot.lane.b32.xlu0 %v1314_v41, %s3939_s28  ;;  %v4355_v35 = vpop.permute.xlu2 %986  ;;  %v283_v41 = vstv %s282_s23  ;;  %s4437_s23 = sld [smem:[#allocation2 + $0x7d]] }
 0x123   : > { %6278 = vst [vmem:[#allocation25_spill] sm:$0xff] %v4355_v35  ;;  %v4357_v52 = vpop.permute.xlu1 %878  ;;  %v294_v35 = vrot.slane %v4139_v40, 1  ;;  %v287_v44 = vadd.f32 %v286_v3, %v283_v41  ;;  %v1384_v3 = vmul.f32 %v1383_v43, %v4031_v1 }
 0x124   : > { %v4359_v5 = vpop.permute.xlu0 %868 }
 0x128   : > { %1366 = vrot.lane.b32.xlu2 %v1364_v20, %s3940_s30  ;;  %v1373_v20 = vstv %s3573_s29  ;;  %s4459_s29 = sld [smem:[#allocation2 + $0x82]] }
 0x129   : > { %1356 = vrot.lane.b32.xlu1 %v1354_v59, %s3937_s24  ;;  %v296_v59 = vsel %vm295_vm0, %v4139_v40, %v294_v35  ;;  %v1427_v40 = vstv %s4368_s7  ;;  %s4476_s7 = sld [smem:[#allocation2 + $0x81]] }
 0x12a   : > { %1346 = vrot.lane.b32.xlu0 %v1344_v27, %s3941_s6  ;;  %v4376_v54 = vpop.permute.xlu2 %1016  ;;  %v307_v27 = vsel %vm306_vm1, %v4151_v49, %v305_v16  ;;  %v298_v41 = vadd.f32 %v296_v59, %v287_v44  ;;  %v327_v16 = vrot.slane %v4149_v47, 1  ;;  %v1418_v59 = vmul.f32 %v4045_v13, %v1417_v30 }
 0x12b   : > { %6279 = vst [vmem:[#allocation26_spill] sm:$0xff] %v4376_v54  ;;  %v4378_v62 = vpop.permute.xlu1 %912  ;;  %v1374_v54 = vmul.f32 %v1373_v20, %v4031_v1  ;;  %v1437_v30 = vstv %s4406_s15  ;;  %s4526_s15 = sld [smem:[#allocation2 + $0x8a]] }
 0x12c   : > { %6280 = vst [vmem:[#allocation27_spill] sm:$0xff] %v4378_v62  ;;  %v4382_v48 = vpop.permute.xlu0 %902  ;;  %v316_v62 = vrot.slane %v4137_v38, 1  ;;  %v309_v39 = vadd.f32 %v307_v27, %v298_v41  ;;  %v1447_v27 = vstv %s4396_s13  ;;  %s4522_s13 = sld [smem:[#allocation2 + $0x36]] }
 0x12e   : > { %v318_v1 = vsel %vm317_vm2, %v4137_v38, %v316_v62  ;;  %v329_v38 = vsel %vm328_vm3, %v4149_v47, %v327_v16 }
 0x12f   : > { %v320_v43 = vadd.f32 %v318_v1, %v309_v39  ;;  %v1457_v39 = vstv %s4392_s12  ;;  %s4505_s12 = sld [smem:[#allocation2 + $0x84]] }
 0x130   : > { %1400 = vrot.lane.b32.xlu2 %v1398_v10, %s3939_s28  ;;  %v1407_v10 = vstv %s3577_s10  ;;  %s4496_s10 = sld [smem:[#allocation2 + $0x85]] }
 0x131   : > { %1386 = vrot.lane.b32.xlu1 %v1384_v3, %s3943_s11  ;;  %v1408_v20 = vmul.f32 %v4045_v13, %v1407_v10  ;;  %v338_v3 = vrot.slane %v4111_v15, 1  ;;  %v331_v62 = vadd.f32 %v329_v38, %v320_v43  ;;  %v4442_v10 = vld [vmem:[%s4028_s20 + $0x1] ss:$4 sm:$0x7] }
 0x132   : > { %1376 = vrot.lane.b32.xlu0 %v1374_v54, %s3944_s14  ;;  %v4399_v49 = vpop.permute.xlu2 %1046  ;;  %v1428_v54 = vmul.f32 %v4045_v13, %v1427_v40  ;;  %v349_v40 = vrot.slane %v4119_v22, 1  ;;  %v1458_v43 = vmul.f32 %v4442_v10, %v1457_v39  ;;  %v1481_v39 = vstv %s4424_s19  ;;  %s4548_s19 = sld [smem:[#allocation2 + $0x88]] }
 0x133   : > { %6281 = vst [vmem:[#allocation28_spill] sm:$0xff] %v4399_v49  ;;  %v4401_v35 = vpop.permute.xlu1 %942  ;;  %v340_v41 = vsel %vm339_vm4, %v4111_v15, %v338_v3  ;;  %v1438_v15 = vmul.f32 %v4442_v10, %v1437_v30  ;;  %v547_v3 = vstv %s4416_s16  ;;  %s4534_s16 = sld [smem:[#allocation2 + $0x89]] }
 0x134   : > { %6282 = vst [vmem:[#allocation29_spill] sm:$0xff] %v4401_v35  ;;  %v4408_v44 = vpop.permute.xlu0 %932  ;;  %v342_v1 = vadd.f32 %v340_v41, %v331_v62  ;;  %v1491_v62 = vstv %s4420_s17  ;;  %s4536_s17 = sld [smem:[#allocation4 + $0x2]] }
 0x138   : > { %1430 = vrot.lane.b32.xlu2 %v1428_v54, %s3941_s6  ;;  %v1448_v54 = vmul.f32 %v4442_v10, %v1447_v27  ;;  %v371_v27 = vrot.slane %v4161_v56, 1 }
 0x139   : > { %1420 = vrot.lane.b32.xlu1 %v1418_v59, %s3938_s25  ;;  %v351_v59 = vsel %vm350_vm5, %v4119_v22, %v349_v40  ;;  %v4463_v22 = vld [vmem:[%s4028_s20] ss:$4 sm:$0x7] }
 0x13a   : > { %1410 = vrot.lane.b32.xlu0 %v1408_v20, %s3942_s9  ;;  %v4429_v13 = vpop.permute.xlu2 %1082  ;;  %v360_v20 = vrot.slane %v4163_v58, 1  ;;  %v353_v38 = vadd.f32 %v351_v59, %v342_v1  ;;  %v548_v41 = vmul.f32 %v4463_v22, %v547_v3  ;;  %v1467_v59 = vstv %s4437_s23  ;;  %s4567_s23 = sld [smem:[#allocation2 + $0x8d]] }
 0x13b   : > { %v4431_v47 = vpop.permute.xlu1 %976 }
 0x13c   : > { %6283 = vst [vmem:[#allocation30_spill] sm:$0xff] %v4431_v47  ;;  %v4439_v16 = vpop.permute.xlu0 %962  ;;  %v362_v1 = vsel %vm361_vm6, %v4163_v58, %v360_v20  ;;  %v1482_v47 = vmul.f32 %v4066_v32, %v1481_v39  ;;  %v1468_v58 = vmul.f32 %v4442_v10, %v1467_v59  ;;  %v373_v20 = vsel %vm372_vm7, %v4161_v56, %v371_v27 }
 0x13d   : > { %6284 = vst [vmem:[#allocation31_spill] sm:$0xff] %v4439_v16  ;;  %v364_v49 = vadd.f32 %v362_v1, %v353_v38  ;;  %v1511_v39 = vstv %s4459_s29  ;;  %v386_v27 = vrot.slane %v4127_v29, 1  ;;  %v4510_v1 = vld [vmem:[%s4028_s20 + $0x2] ss:$4 sm:$0x7]  ;;  %v586_v59 = vrot.slane %v4247_v17, 1 }
 0x13e   : > { %s4600_s29 = sld [smem:[#allocation2 + $0x12]] }
 0x140   : > { %1460 = vrot.lane.b32.xlu2 %v1458_v43, %s3944_s14  ;;  %v545_v43 = vstv %s4426_s21  ;;  %s4562_s21 = sld [smem:[#allocation2 + $0x24]] }
 0x141   : > { %1450 = vrot.lane.b32.xlu1 %v1448_v54, %s3940_s30  ;;  %v556_v54 = vrot.slane %v4235_v63, 1  ;;  %v549_v16 = vadd.f32 %v548_v41, %v545_v43  ;;  %v1501_v41 = vstv %s4476_s7  ;;  %s4607_s7 = sld [smem:[#allocation2 + $0x91]] }
 0x142   : > { %1440 = vrot.lane.b32.xlu0 %v1438_v15, %s3937_s24  ;;  %v4467_v40 = vpop.permute.xlu2 %1112  ;;  %v1492_v15 = vmul.f32 %v4066_v32, %v1491_v62  ;;  %v566_v32 = vrot.slane %v4233_v61, 1  ;;  %v1521_v62 = vstv %s4455_s27  ;;  %s4589_s27 = sld [smem:[#allocation2 + $0x8b]] }
 0x143   : > { %6285 = vst [vmem:[#allocation32_spill] sm:$0xff] %v4467_v40  ;;  %v4469_v30 = vpop.permute.xlu1 %1006  ;;  %v557_v35 = vsel %vm295_vm0, %v4235_v63, %v556_v54  ;;  %v375_v40 = vadd.f32 %v373_v20, %v364_v49  ;;  %v1522_v43 = vmul.f32 %v4510_v1, %v1521_v62  ;;  %v396_v20 = vrot.slane %v4175_v4, 1 }
 0x144   : > { %6286 = vst [vmem:[#allocation33_spill] sm:$0xff] %v4469_v30  ;;  %v4478_v3 = vpop.permute.xlu0 %996  ;;  %v377_v30 = vstv %s4446_s26  ;;  %v559_v56 = vadd.f32 %v557_v35, %v549_v16  ;;  %v1512_v35 = vmul.f32 %v4510_v1, %v1511_v39  ;;  %v576_v16 = vrot.slane %v4195_v21, 1  ;;  %s4572_s26 = sld [smem:[#allocation2 + $0x8c]] }
 0x145   : > { %v378_v38 = vmul.f32 %v4442_v10, %v377_v30  ;;  %v567_v54 = vsel %vm306_vm1, %v4233_v61, %v566_v32  ;;  %v587_v32 = vsel %vm328_vm3, %v4247_v17, %v586_v59  ;;  %v1551_v62 = vstv %s4491_s8  ;;  %s4614_s8 = sld [smem:[#allocation2 + $0x8f]] }
 0x146   : > { %v577_v61 = vsel %vm317_vm2, %v4195_v21, %v576_v16  ;;  %v397_v21 = vsel %vm306_vm1, %v4175_v4, %v396_v20  ;;  %v596_v17 = vrot.slane %v4245_v12, 1  ;;  %v606_v4 = vrot.slane %v4207_v33, 1 }
 0x148   : > { %1494 = vrot.lane.b32.xlu2 %v1492_v15, %s3942_s9  ;;  %v569_v15 = vadd.f32 %v567_v54, %v559_v56  ;;  %v1552_v54 = vmul.f32 %v4510_v1, %v1551_v62  ;;  %v597_v20 = vsel %vm339_vm4, %v4245_v12, %v596_v17 }
 0x149   : > { %1484 = vrot.lane.b32.xlu1 %v1482_v47, %s3939_s28  ;;  %v379_v47 = vadd.f32 %v378_v38, %v375_v40  ;;  %v1502_v40 = vmul.f32 %v4510_v1, %v1501_v41  ;;  %v406_v41 = vrot.slane %v4173_v2, 1 }
 0x14a   : > { %1470 = vrot.lane.b32.xlu0 %v1468_v58, %s3943_s11  ;;  %v4499_v63 = vpop.permute.xlu2 %1146  ;;  %v387_v58 = vsel %vm295_vm0, %v4127_v29, %v386_v27  ;;  %v1541_v29 = vstv %s4496_s10  ;;  %v579_v39 = vadd.f32 %v577_v61, %v569_v15  ;;  %v416_v15 = vrot.slane %v4135_v37, 1  ;;  %s4627_s10 = sld [smem:[#allocation2 + $0x8e]] }
 0x14b   : > { %v4501_v49 = vpop.permute.xlu1 %1036  ;;  %v389_v38 = vadd.f32 %v387_v58, %v379_v47  ;;  %v1531_v47 = vstv %s4505_s12  ;;  %v1542_v59 = vmul.f32 %v4510_v1, %v1541_v29  ;;  %v407_v58 = vsel %vm317_vm2, %v4173_v2, %v406_v41  ;;  %s4649_s12 = sld [smem:[#allocation2 + $0x94]] }
 0x14c   : > { %v4507_v30 = vpop.permute.xlu0 %1026  ;;  %v801_v61 = vstv %s4522_s13  ;;  %v426_v2 = vrot.slane %v4187_v14, 1  ;;  %v1587_v29 = vstv %s4526_s15  ;;  %v417_v12 = vsel %vm328_vm3, %v4135_v37, %v416_v15  ;;  %s4657_s13 = sld [smem:[#allocation2 + $0x93]] }
 0x14d   : > { %v607_v41 = vsel %vm350_vm5, %v4207_v33, %v606_v4  ;;  %v1588_v4 = vmul.f32 %v4463_v22, %v1587_v29  ;;  %s4669_s15 = sld [smem:[#allocation2 + $0x92]] }
 0x150   : > { %1524 = vrot.lane.b32.xlu2 %v1522_v43, %s3937_s24  ;;  %v399_v43 = vadd.f32 %v397_v21, %v389_v38  ;;  %v616_v38 = vrot.slane %v4259_v31, 1  ;;  %v802_v21 = vmul.f32 %v4463_v22, %v801_v61 }
 0x151   : > { %1514 = vrot.lane.b32.xlu1 %v1512_v35, %s3941_s6  ;;  %v589_v35 = vadd.f32 %v587_v32, %v579_v39  ;;  %v1577_v39 = vstv %s4534_s16  ;;  %s4677_s16 = sld [smem:[#allocation2 + $0x51]] }
 0x152   : > { %1504 = vrot.lane.b32.xlu0 %v1502_v40, %s3938_s25  ;;  %v4539_v56 = vpop.permute.xlu2 %1176  ;;  %v1532_v40 = vmul.f32 %v4510_v1, %v1531_v47  ;;  %v409_v32 = vadd.f32 %v407_v58, %v399_v43  ;;  %v617_v43 = vsel %vm361_vm6, %v4259_v31, %v616_v38  ;;  %v427_v58 = vsel %vm339_vm4, %v4187_v14, %v426_v2 }
 0x153   : > { %v4541_v27 = vpop.permute.xlu1 %1072  ;;  %v599_v62 = vadd.f32 %v597_v20, %v589_v35  ;;  %v799_v35 = vstv %s4536_s17  ;;  %v626_v31 = vrot.slane %v4257_v28, 1  ;;  %v820_v2 = vrot.slane %v4329_v18, 1  ;;  %s4679_s17 = sld [smem:[#allocation2 + $0x3f]] }
 0x154   : > { %v4550_v16 = vpop.permute.xlu0 %1062  ;;  %v419_v37 = vadd.f32 %v417_v12, %v409_v32  ;;  %v803_v38 = vadd.f32 %v802_v21, %v799_v35  ;;  %v436_v32 = vrot.slane %v4185_v11, 1  ;;  %v1617_v12 = vstv %s4567_s23  ;;  %s4699_s23 = sld [smem:[#allocation2 + $0x96]] }
 0x155   : > { %v609_v33 = vadd.f32 %v607_v41, %v599_v62  ;;  %v631_v62 = vstv %s4562_s21  ;;  %v627_v14 = vsel %vm372_vm7, %v4257_v28, %v626_v31  ;;  %v1607_v41 = vstv %s4572_s26  ;;  %s4691_s21 = sld [smem:[#allocation2 + $0x97]] }
 0x156   : > { %v437_v28 = vsel %vm350_vm5, %v4185_v11, %v436_v32  ;;  %v1618_v31 = vmul.f32 %v4463_v22, %v1617_v12  ;;  %v821_v11 = vsel %vm306_vm1, %v4329_v18, %v820_v2  ;;  %s4714_s26 = sld [smem:[#allocation2 + $0x95]] }
 0x157   : > { %v619_v20 = vadd.f32 %v617_v43, %v609_v33  ;;  %v1597_v33 = vstv %s4589_s27  ;;  %s4739_s27 = sld [smem:[#allocation2 + $0x9b]] }
 0x158   : > { %1554 = vrot.lane.b32.xlu2 %v1552_v54, %s3943_s11  ;;  %v810_v54 = vrot.slane %v4331_v19, 1 }
 0x159   : > { %1544 = vrot.lane.b32.xlu1 %v1542_v59, %s3944_s14  ;;  %v1567_v59 = vstv %s4548_s19  ;;  %v629_v21 = vadd.f32 %v627_v14, %v619_v20  ;;  %v1608_v20 = vmul.f32 %v4463_v22, %v1607_v41  ;;  %v461_v14 = vstv %s4600_s29  ;;  %s4686_s19 = sld [smem:[#allocation4 + $0x3]] }
 0x15a   : > { %1534 = vrot.lane.b32.xlu0 %v1532_v40, %s3940_s30  ;;  %v4580_v17 = vpop.permute.xlu2 %1206  ;;  %v1578_v40 = vmul.f32 %v4463_v22, %v1577_v39  ;;  %v1568_v61 = vmul.f32 %v4463_v22, %v1567_v59  ;;  %v811_v29 = vsel %vm295_vm0, %v4331_v19, %v810_v54  ;;  %v429_v39 = vadd.f32 %v427_v58, %v419_v37  ;;  %s4745_s29 = sld [smem:[#allocation2 + $0x9a]] }
 0x15b   : > { %v4582_v47 = vpop.permute.xlu1 %1102  ;;  %v632_v19 = vmul.f32 %v4442_v10, %v631_v62  ;;  %v813_v43 = vadd.f32 %v811_v29, %v803_v38  ;;  %v446_v59 = vrot.slane %v4147_v46, 1  ;;  %v456_v37 = vrot.slane %v4199_v25, 1 }
 0x15c   : > { %v4591_v15 = vpop.permute.xlu0 %1092  ;;  %v830_v38 = vrot.slane %v4291_v26, 1  ;;  %v1598_v29 = vmul.f32 %v4463_v22, %v1597_v33  ;;  %v650_v41 = vrot.slane %v4271_v53, 1 }
 0x15d   : > { %v633_v32 = vadd.f32 %v632_v19, %v629_v21  ;;  %v823_v62 = vadd.f32 %v821_v11, %v813_v43  ;;  %v457_v12 = vsel %vm372_vm7, %v4199_v25, %v456_v37  ;;  %v1651_v25 = vstv %s4607_s7  ;;  %s4747_s7 = sld [smem:[#allocation2 + $0x2d]] }
 0x15e   : > { %v1637_v21 = vstv %s4614_s8  ;;  %v462_v19 = vmul.f32 %v4510_v1, %v461_v14  ;;  %v470_v11 = vrot.slane %v4197_v23, 1  ;;  %v870_v14 = vrot.slane %v4359_v5, 1  ;;  %s4759_s8 = sld [smem:[#allocation2 + $0x98]] }
 0x160   : > { %1590 = vrot.lane.b32.xlu2 %v1588_v4, %s3938_s25  ;;  %v439_v4 = vadd.f32 %v437_v28, %v429_v39  ;;  %v447_v39 = vsel %vm361_vm6, %v4147_v46, %v446_v59  ;;  %v831_v46 = vsel %vm317_vm2, %v4291_v26, %v830_v38  ;;  %v651_v26 = vsel %vm306_vm1, %v4271_v53, %v650_v41 }
 0x161   : > { %1580 = vrot.lane.b32.xlu1 %v1578_v40, %s3942_s9  ;;  %v640_v40 = vrot.slane %v4219_v45, 1  ;;  %v833_v59 = vadd.f32 %v831_v46, %v823_v62  ;;  %v1638_v38 = vmul.f32 %v4463_v22, %v1637_v21  ;;  %v1671_v46 = vstv %s4657_s13  ;;  %s4782_s13 = sld [smem:[#allocation6 + $0x1]] }
 0x162   : > { %1570 = vrot.lane.b32.xlu0 %v1568_v61, %s3939_s28  ;;  %v4618_v35 = vpop.permute.xlu2 %1240  ;;  %v840_v61 = vrot.slane %v4343_v7, 1  ;;  %v449_v28 = vadd.f32 %v447_v39, %v439_v4  ;;  %v1627_v4 = vstv %s4627_s10  ;;  %v670_v21 = vrot.slane %v4231_v60, 1  ;;  %s4772_s10 = sld [smem:[#allocation6 + $0x3]] }
 0x163   : > { %v4620_v54 = vpop.permute.xlu1 %1132  ;;  %v641_v18 = vsel %vm295_vm0, %v4219_v45, %v640_v40  ;;  %v1628_v62 = vmul.f32 %v4463_v22, %v1627_v4 }
 0x164   : > { %v4630_v58 = vpop.permute.xlu0 %1122  ;;  %v841_v2 = vsel %vm328_vm3, %v4343_v7, %v840_v61  ;;  %v459_v45 = vadd.f32 %v457_v12, %v449_v28  ;;  %v643_v43 = vadd.f32 %v641_v18, %v633_v32  ;;  %v850_v7 = vrot.slane %v4341_v42, 1 }
 0x165   : > { %v843_v40 = vadd.f32 %v841_v2, %v833_v59  ;;  %v660_v61 = vrot.slane %v4269_v50, 1  ;;  %v480_v12 = vrot.slane %v4159_v55, 1  ;;  %v471_v28 = vsel %vm295_vm0, %v4197_v23, %v470_v11 }
 0x166   : > { %v463_v53 = vadd.f32 %v462_v19, %v459_v45  ;;  %v653_v32 = vadd.f32 %v651_v26, %v643_v43  ;;  %v851_v39 = vsel %vm339_vm4, %v4341_v42, %v850_v7  ;;  %v1681_v18 = vstv %s4649_s12  ;;  %s4776_s12 = sld [smem:[#allocation6 + $0x2]] }
 0x167   : > { %v853_v41 = vadd.f32 %v851_v39, %v843_v40  ;;  %v661_v42 = vsel %vm317_vm2, %v4269_v50, %v660_v61  ;;  %v680_v23 = vrot.slane %v4283_v8, 1  ;;  %v871_v59 = vsel %vm361_vm6, %v4359_v5, %v870_v14 }
 0x168   : > { %1620 = vrot.lane.b32.xlu2 %v1618_v31, %s3940_s30  ;;  %v473_v2 = vadd.f32 %v471_v28, %v463_v53  ;;  %v663_v19 = vadd.f32 %v661_v42, %v653_v32  ;;  %v1661_v26 = vstv %s4669_s15  ;;  %v880_v7 = vrot.slane %v4357_v52, 1  ;;  %s4790_s15 = sld [smem:[#allocation2 + $0x9e]] }
 0x169   : > { %1610 = vrot.lane.b32.xlu1 %v1608_v20, %s3937_s24  ;;  %v1652_v20 = vmul.f32 %v4442_v10, %v1651_v25  ;;  %v490_v25 = vrot.slane %v4211_v36, 1  ;;  %v481_v11 = vsel %vm306_vm1, %v4159_v55, %v480_v12  ;;  %v500_v5 = vrot.slane %v4209_v34, 1 }
 0x16a   : > { %1600 = vrot.lane.b32.xlu0 %v1598_v29, %s3941_s6  ;;  %v4661_v37 = vpop.permute.xlu2 %1270  ;;  %v860_v29 = vrot.slane %v4303_v57, 1  ;;  %v483_v61 = vadd.f32 %v481_v11, %v473_v2  ;;  %v1662_v32 = vmul.f32 %v4442_v10, %v1661_v26  ;;  %v681_v39 = vsel %vm339_vm4, %v4283_v8, %v680_v23 }
 0x16b   : > { %v4663_v33 = vpop.permute.xlu1 %1166  ;;  %v885_v55 = vstv %s4679_s17  ;;  %v690_v14 = vrot.slane %v4281_v6, 1  ;;  %v1711_v8 = vstv %s4691_s21  ;;  %v1701_v42 = vstv %s4699_s23  ;;  %s4813_s17 = sld [smem:[#allocation2 + $0x9c]] }
 0x16c   : > { %v4671_v31 = vpop.permute.xlu0 %1156  ;;  %v861_v50 = vsel %vm350_vm5, %v4303_v57, %v860_v29  ;;  %v1055_v57 = vstv %s4677_s16  ;;  %v671_v29 = vsel %vm328_vm3, %v4231_v60, %v670_v21  ;;  %v1064_v60 = vrot.slane %v4550_v16, 1  ;;  %s4798_s16 = sld [smem:[#allocation2 + $0x9d]] }
 0x16d   : > { %v863_v4 = vadd.f32 %v861_v50, %v853_v41  ;;  %v673_v12 = vadd.f32 %v671_v29, %v663_v19  ;;  %v881_v41 = vsel %vm372_vm7, %v4357_v52, %v880_v7  ;;  %v1056_v28 = vmul.f32 %v4463_v22, %v1055_v57  ;;  %v6288_v29 = vld [vmem:[#allocation12_spill] sm:$0xff]  ;;  %s4827_s21 = sld [smem:[#allocation2 + $0x6c]] }
 0x16e   : > { %v510_v21 = vrot.slane %v4171_v0, 1  ;;  %v501_v19 = vsel %vm328_vm3, %v4209_v34, %v500_v5  ;;  %v1691_v50 = vstv %s4714_s26  ;;  %v691_v11 = vsel %vm350_vm5, %v4281_v6, %v690_v14  ;;  %v6289_v14 = vld [vmem:[#allocation13_spill] sm:$0xff]  ;;  %s4833_s23 = sld [smem:[#allocation6 + $0x5]] }
 0x16f   : > { %v873_v53 = vadd.f32 %v871_v59, %v863_v4  ;;  %v520_v59 = vrot.slane %v4223_v51, 1  ;;  %v1712_v4 = vmul.f32 %v4442_v10, %v1711_v8  ;;  %v894_v34 = vrot.slane %v4315_v24, 1  ;;  %s4839_s26 = sld [smem:[#allocation4 + $0x4]] }
 0x170   : > { %1654 = vrot.lane.b32.xlu2 %v1652_v20, %s3939_s28  ;;  %v1682_v20 = vmul.f32 %v4442_v10, %v1681_v18  ;;  %v683_v18 = vadd.f32 %v681_v39, %v673_v12  ;;  %v1065_v57 = vsel %vm295_vm0, %v4550_v16, %v1064_v60  ;;  %v511_v6 = vsel %vm339_vm4, %v4171_v0, %v510_v21 }
 0x171   : > { %1640 = vrot.lane.b32.xlu1 %v1638_v38, %s3943_s11  ;;  %v1672_v38 = vmul.f32 %v4442_v10, %v1671_v46  ;;  %v883_v52 = vadd.f32 %v881_v41, %v873_v53  ;;  %v886_v46 = vmul.f32 %v4442_v10, %v885_v55  ;;  %v540_v39 = vrot.slane %v6288_v29, 1 }
 0x172   : > { %1630 = vrot.lane.b32.xlu0 %v1628_v62, %s3944_s14  ;;  %v4704_v45 = vpop.permute.xlu2 %1300  ;;  %v491_v62 = vsel %vm317_vm2, %v4211_v36, %v490_v25  ;;  %v1053_v36 = vstv %s4686_s19  ;;  %v693_v5 = vadd.f32 %v691_v11, %v683_v18  ;;  %v1074_v16 = vrot.slane %v4541_v27, 1  ;;  %s4821_s19 = sld [smem:[#allocation6 + $0x6]] }
 0x173   : > { %v4706_v43 = vpop.permute.xlu1 %1196  ;;  %v493_v23 = vadd.f32 %v491_v62, %v483_v61  ;;  %v1057_v26 = vadd.f32 %v1056_v28, %v1053_v36  ;;  %v6287_v61 = vld [vmem:[#allocation18_spill] sm:$0xff]  ;;  %v1692_v62 = vmul.f32 %v4442_v10, %v1691_v50  ;;  %v530_v12 = vrot.slane %v6289_v14, 1 }
 0x174   : > { %v4717_v40 = vpop.permute.xlu0 %1186  ;;  %v710_v53 = vrot.slane %v6287_v61, 1  ;;  %v521_v41 = vsel %vm350_vm5, %v4223_v51, %v520_v59  ;;  %v904_v28 = vrot.slane %v4382_v48, 1  ;;  %v895_v60 = vsel %vm295_vm0, %v4315_v24, %v894_v34 }
 0x175   : > { %v503_v55 = vadd.f32 %v501_v19, %v493_v23  ;;  %v1067_v36 = vadd.f32 %v1065_v57, %v1057_v26  ;;  %v1745_v8 = vstv %s4739_s27  ;;  %v715_v18 = vstv %s4747_s7  ;;  %s4845_s27 = sld [smem:[#allocation2 + $0xa1]] }
 0x176   : > { %v1075_v24 = vsel %vm306_vm1, %v4541_v27, %v1074_v16  ;;  %v1094_v23 = vrot.slane %v4591_v15, 1  ;;  %v1721_v50 = vstv %s4759_s8  ;;  %v905_v59 = vsel %vm306_vm1, %v4382_v48, %v904_v28  ;;  %v6291_v28 = vld [vmem:[#allocation17_spill] sm:$0xff]  ;;  %s4865_s7 = sld [smem:[#allocation2 + $0x9f]] }
 0x177   : > { %v1077_v26 = vadd.f32 %v1075_v24, %v1067_v36  ;;  %v4825_v27 = vsel %vm372_vm7, %v6288_v29, %v540_v39  ;;  %v513_v11 = vadd.f32 %v511_v6, %v503_v55  ;;  %v1841_v34 = vstv %s4772_s10  ;;  %s4878_s8 = sld [smem:[#allocation2 + $0x5a]] }
 0x178   : > { %1684 = vrot.lane.b32.xlu2 %v1682_v20, %s3941_s6  ;;  %v1702_v20 = vmul.f32 %v4442_v10, %v1701_v42  ;;  %v1735_v42 = vstv %s4745_s29  ;;  %v716_v48 = vmul.f32 %v4510_v1, %v715_v18  ;;  %v1095_v29 = vsel %vm328_vm3, %v4591_v15, %v1094_v23  ;;  %s4853_s29 = sld [smem:[#allocation2 + $0xa0]] }
 0x179   : > { %1674 = vrot.lane.b32.xlu1 %v1672_v38, %s3938_s25  ;;  %v700_v38 = vrot.slane %v4243_v9, 1  ;;  %v531_v39 = vsel %vm361_vm6, %v6289_v14, %v530_v12  ;;  %v1831_v16 = vstv %s4776_s12  ;;  %v1104_v36 = vrot.slane %v4582_v47, 1  ;;  %v6292_v14 = vld [vmem:[#allocation23_spill] sm:$0xff]  ;;  %s4959_s10 = sld [smem:[#allocation2 + $0x75]] }
 0x17a   : > { %1664 = vrot.lane.b32.xlu0 %v1662_v32, %s3942_s9  ;;  %v4751_v2 = vpop.permute.xlu2 %1336  ;;  %v887_v32 = vadd.f32 %v886_v46, %v883_v52  ;;  %v711_v52 = vsel %vm372_vm7, %v6287_v61, %v710_v53  ;;  %v1722_v53 = vmul.f32 %v4442_v10, %v1721_v50  ;;  %v1775_v15 = vstv %s4790_s15  ;;  %s4896_s15 = sld [smem:[#allocation6 + $0x4]] }
 0x17b   : > { %v4753_v25 = vpop.permute.xlu1 %1230  ;;  %v701_v0 = vsel %vm361_vm6, %v4243_v9, %v700_v38  ;;  %v1084_v9 = vrot.slane %v4429_v13, 1  ;;  %v1736_v38 = vmul.f32 %v4510_v1, %v1735_v42  ;;  %v924_v12 = vrot.slane %v6292_v14, 1  ;;  %s4977_s12 = sld [smem:[#allocation6 + $0x8]] }
 0x17c   : > { %v4762_v7 = vpop.permute.xlu0 %1216  ;;  %v703_v51 = vadd.f32 %v701_v0, %v693_v5  ;;  %v897_v46 = vadd.f32 %v895_v60, %v887_v32  ;;  %v6290_v5 = vld [vmem:[#allocation27_spill] sm:$0xff]  ;;  %v523_v32 = vadd.f32 %v521_v41, %v513_v11  ;;  %v1821_v41 = vstv %s4782_s13  ;;  %s4985_s13 = sld [smem:[#allocation6 + $0xa]] }
 0x17d   : > { %v914_v61 = vrot.slane %v6290_v5, 1  ;;  %v1085_v6 = vsel %vm317_vm2, %v4429_v13, %v1084_v9  ;;  %v724_v13 = vrot.slane %v6291_v28, 1  ;;  %v1765_v0 = vstv %s4798_s16  ;;  %s4912_s16 = sld [smem:[#allocation2 + $0x48]] }
 0x17e   : > { %v713_v57 = vadd.f32 %v711_v52, %v703_v51  ;;  %v1087_v55 = vadd.f32 %v1085_v6, %v1077_v26  ;;  %v533_v52 = vadd.f32 %v531_v39, %v523_v32  ;;  %v1755_v23 = vstv %s4813_s17  ;;  %s4998_s17 = sld [smem:[#allocation6 + $0x7]] }
 0x17f   : > { %v934_v50 = vrot.slane %v4408_v44, 1  ;;  %v1766_v11 = vmul.f32 %v4510_v1, %v1765_v0  ;;  %v925_v32 = vsel %vm328_vm3, %v6292_v14, %v924_v12  ;;  %v1756_v6 = vmul.f32 %v4510_v1, %v1755_v23 }
 0x180   : > { %1714 = vrot.lane.b32.xlu2 %v1712_v4, %s3944_s14  ;;  %v717_v60 = vadd.f32 %v716_v48, %v713_v57  ;;  %v1097_v42 = vadd.f32 %v1095_v29, %v1087_v55  ;;  %v725_v48 = vsel %vm295_vm0, %v6291_v28, %v724_v13  ;;  %v1105_v57 = vsel %vm339_vm4, %v4582_v47, %v1104_v36  ;;  %v6295_v47 = vld [vmem:[#allocation20_spill] sm:$0xff] }
 0x181   : > { %1704 = vrot.lane.b32.xlu1 %v1702_v20, %s3940_s30  ;;  %v1746_v20 = vmul.f32 %v4510_v1, %v1745_v8  ;;  %v915_v8 = vsel %vm317_vm2, %v6290_v5, %v914_v61  ;;  %v1124_v5 = vrot.slane %v4630_v58, 1  ;;  %v1309_v61 = vstv %s4827_s21  ;;  %s5026_s21 = sld [smem:[#allocation6 + $0xc]] }
 0x182   : > { %1694 = vrot.lane.b32.xlu0 %v1692_v62, %s3937_s24  ;;  %v4804_v21 = vpop.permute.xlu2 %1366  ;;  %v907_v62 = vadd.f32 %v905_v59, %v897_v46  ;;  %v6293_v46 = vld [vmem:[#allocation14_spill] sm:$0xff]  ;;  %v6294_v59 = vld [vmem:[#allocation32_spill] sm:$0xff]  ;;  %v744_v39 = vrot.slane %v6295_v47, 1  ;;  %v1871_v28 = vstv %s4821_s19  ;;  %v935_v13 = vsel %vm339_vm4, %v4408_v44, %v934_v50  ;;  %s5012_s19 = sld [smem:[#allocation6 + $0xd]] }
 0x183   : > { %v4806_v19 = vpop.permute.xlu1 %1260  ;;  %v734_v9 = vrot.slane %v6293_v46, 1  ;;  %v1114_v26 = vrot.slane %v6294_v59, 1  ;;  %v1861_v0 = vstv %s4833_s23  ;;  %v1307_v14 = vstv %s4839_s26  ;;  %s5035_s23 = sld [smem:[#allocation6 + $0xb]] }
 0x184   : > { %v4817_v4 = vpop.permute.xlu0 %1250  ;;  %v917_v24 = vadd.f32 %v915_v8, %v907_v62  ;;  %v1107_v62 = vadd.f32 %v1105_v57, %v1097_v42  ;;  %v1805_v12 = vstv %s4845_s27  ;;  %v1795_v8 = vstv %s4853_s29  ;;  %v6297_v57 = vld [vmem:[#allocation19_spill] sm:$0xff]  ;;  %s5040_s26 = sld [smem:[#allocation2 + $0x63]] }
 0x185   : > { %v735_v29 = vsel %vm306_vm1, %v6293_v46, %v734_v9  ;;  %v1115_v36 = vsel %vm350_vm5, %v6294_v59, %v1114_v26  ;;  %v4904_v44 = vadd.f32 %v4825_v27, %v533_v52  ;;  %v6296_v46 = vld [vmem:[#allocation29_spill] sm:$0xff]  ;;  %v745_v50 = vsel %vm317_vm2, %v6295_v47, %v744_v39  ;;  %s5063_s27 = sld [smem:[#allocation6 + $0x10]] }
 0x186   : > { %v927_v55 = vadd.f32 %v925_v32, %v917_v24  ;;  %v944_v9 = vrot.slane %v6296_v46, 1  ;;  %v1117_v24 = vadd.f32 %v1115_v36, %v1107_v62  ;;  %v1134_v59 = vrot.slane %v4620_v54, 1  ;;  %s5068_s29 = sld [smem:[#allocation6 + $0xf]] }
 0x187   : > { %v1785_v27 = vstv %s4865_s7  ;;  %s5078_s7 = sld [smem:[#allocation6 + $0xe]] }
 0x188   : > { %1748 = vrot.lane.b32.xlu2 %v1746_v20, %s3942_s9  ;;  %v945_v47 = vsel %vm350_vm5, %v6296_v46, %v944_v9  ;;  %v1786_v39 = vmul.f32 %v4510_v1, %v1785_v27  ;;  %v1338_v46 = vrot.slane %v4751_v2, 1  ;;  %v6301_v27 = vld [vmem:[#allocation22_spill] sm:$0xff] }
 0x189   : > { %1738 = vrot.lane.b32.xlu1 %v1736_v38, %s3939_s28  ;;  %v1776_v38 = vmul.f32 %v4510_v1, %v1775_v15  ;;  %v1310_v15 = vmul.f32 %v4463_v22, %v1309_v61  ;;  %v1139_v61 = vstv %s4878_s8  ;;  %s5096_s8 = sld [smem:[#allocation6 + $0x14]] }
 0x18a   : > { %1724 = vrot.lane.b32.xlu0 %v1722_v53, %s3943_s11  ;;  %v4859_v51 = vpop.permute.xlu2 %1400  ;;  %v727_v53 = vadd.f32 %v725_v48, %v717_v60  ;;  %v1125_v60 = vsel %vm361_vm6, %v4630_v58, %v1124_v5  ;;  %v937_v58 = vadd.f32 %v935_v13, %v927_v55  ;;  %v1796_v48 = vmul.f32 %v4510_v1, %v1795_v8  ;;  %v6299_v13 = vld [vmem:[#allocation31_spill] sm:$0xff] }
 0x18b   : > { %v4861_v18 = vpop.permute.xlu1 %1290  ;;  %v1127_v52 = vadd.f32 %v1125_v60, %v1117_v24  ;;  %v1311_v26 = vadd.f32 %v1310_v15, %v1307_v14  ;;  %v754_v5 = vrot.slane %v6297_v57, 1  ;;  %v964_v36 = vrot.slane %v6299_v13, 1 }
 0x18c   : > { %v4869_v20 = vpop.permute.xlu0 %1280  ;;  %v737_v42 = vadd.f32 %v735_v29, %v727_v53  ;;  %v947_v55 = vadd.f32 %v945_v47, %v937_v58  ;;  %v1135_v15 = vsel %vm372_vm7, %v4620_v54, %v1134_v59  ;;  %v1842_v24 = vmul.f32 %v1841_v34, %v4904_v44 }
 0x18d   : > { %v1137_v14 = vadd.f32 %v1135_v15, %v1127_v52  ;;  %v1832_v54 = vmul.f32 %v1831_v16, %v4904_v44  ;;  %v755_v59 = vsel %vm328_vm3, %v6297_v57, %v754_v5  ;;  %v774_v52 = vrot.slane %v6301_v27, 1 }
 0x18e   : > { %v747_v62 = vadd.f32 %v745_v50, %v737_v42  ;;  %v1851_v42 = vstv %s4896_s15  ;;  %v6300_v50 = vld [vmem:[#allocation15_spill] sm:$0xff]  ;;  %v965_v16 = vsel %vm372_vm7, %v6299_v13, %v964_v36  ;;  %v1158_v47 = vrot.slane %v4671_v31, 1  ;;  %v6302_v36 = vld [vmem:[#allocation21_spill] sm:$0xff]  ;;  %s5103_s15 = sld [smem:[#allocation6 + $0x13]] }
 0x18f   : > { %v764_v58 = vrot.slane %v6300_v50, 1 }
 0x190   : > { %1778 = vrot.lane.b32.xlu2 %v1776_v38, %s3937_s24 }
 0x191   : > { %1768 = vrot.lane.b32.xlu1 %v1766_v11, %s3941_s6  ;;  %v1806_v11 = vmul.f32 %v4510_v1, %v1805_v12  ;;  %v1140_v12 = vmul.f32 %v4442_v10, %v1139_v61  ;;  %v757_v61 = vadd.f32 %v755_v59, %v747_v62  ;;  %v1368_v59 = vrot.slane %v4804_v21, 1 }
 0x192   : > { %1758 = vrot.lane.b32.xlu0 %v1756_v6, %s3938_s25  ;;  %v4908_v22 = vpop.permute.xlu2 %1430  ;;  %v6298_v6 = vld [vmem:[#allocation24_spill] sm:$0xff] }
 0x193   : > { %v1327_v23 = vpop.permute.xlu1 %1326  ;;  %v954_v29 = vrot.slane %v6298_v6, 1  ;;  %v1141_v57 = vadd.f32 %v1140_v12, %v1137_v14 }
 0x194   : > { %v1317_v38 = vpop.permute.xlu0 %1316  ;;  %v1328_v53 = vrot.slane %v1327_v23, 1 }
 0x195   : > { %v1318_v32 = vrot.slane %v1317_v38, 1  ;;  %v955_v34 = vsel %vm361_vm6, %v6298_v6, %v954_v29  ;;  %v765_v29 = vsel %vm339_vm4, %v6300_v50, %v764_v58  ;;  %v1159_v58 = vsel %vm306_vm1, %v4671_v31, %v1158_v47  ;;  %v6304_v31 = vld [vmem:[#allocation16_spill] sm:$0xff] }
 0x196   : > { %v1329_v9 = vsel %vm306_vm1, %v1327_v23, %v1328_v53  ;;  %v957_v53 = vadd.f32 %v955_v34, %v947_v55  ;;  %v767_v12 = vadd.f32 %v765_v29, %v757_v61  ;;  %v1369_v47 = vsel %vm350_vm5, %v4804_v21, %v1368_v59 }
 0x197   : > { %v1319_v60 = vsel %vm295_vm0, %v1317_v38, %v1318_v32  ;;  %v1822_v32 = vmul.f32 %v1821_v41, %v4904_v44  ;;  %v775_v41 = vsel %vm350_vm5, %v6301_v27, %v774_v52  ;;  %v998_v29 = vrot.slane %v4478_v3, 1 }
 0x198   : > { %v1321_v8 = vadd.f32 %v1319_v60, %v1311_v26  ;;  %1808 = vrot.lane.b32.xlu2 %v1806_v11, %s3943_s11  ;;  %v969_v11 = vstv %s4912_s16  ;;  %v967_v55 = vadd.f32 %v965_v16, %v957_v53  ;;  %v784_v60 = vrot.slane %v6302_v36, 1  ;;  %v6305_v53 = vld [vmem:[#allocation25_spill] sm:$0xff]  ;;  %s5106_s16 = sld [smem:[#allocation6 + $0x11]] }
 0x199   : > { %1798 = vrot.lane.b32.xlu1 %v1796_v48, %s3944_s14  ;;  %v1148_v48 = vrot.slane %v4499_v63, 1  ;;  %v970_v62 = vmul.f32 %v4510_v1, %v969_v11  ;;  %v777_v27 = vadd.f32 %v775_v41, %v767_v12  ;;  %v794_v11 = vrot.slane %v6304_v31, 1 }
 0x19a   : > { %v1331_v26 = vadd.f32 %v1329_v9, %v1321_v8  ;;  %1788 = vrot.lane.b32.xlu0 %v1786_v39, %s3940_s30  ;;  %v4945_v38 = vpop.permute.xlu2 %1460  ;;  %v1339_v39 = vsel %vm317_vm2, %v4751_v2, %v1338_v46  ;;  %v6303_v8 = vld [vmem:[#allocation30_spill] sm:$0xff]  ;;  %v1862_v16 = vmul.f32 %v1861_v0, %v4904_v44  ;;  %v785_v61 = vsel %vm361_vm6, %v6302_v36, %v784_v60 }
 0x19b   : > { %v1357_v23 = vpop.permute.xlu1 %1356  ;;  %v1149_v14 = vsel %vm295_vm0, %v4499_v63, %v1148_v48  ;;  %v978_v46 = vrot.slane %v6303_v8, 1  ;;  %v971_v52 = vadd.f32 %v970_v62, %v967_v55  ;;  %v1852_v48 = vmul.f32 %v1851_v42, %v4904_v44 }
 0x19c   : > { %v1347_v5 = vpop.permute.xlu0 %1346  ;;  %v1358_v15 = vrot.slane %v1357_v23, 1  ;;  %v1341_v13 = vadd.f32 %v1339_v39, %v1331_v26  ;;  %v1151_v9 = vadd.f32 %v1149_v14, %v1141_v57  ;;  %v988_v57 = vrot.slane %v6305_v53, 1 }
 0x19d   : > { %v1348_v6 = vrot.slane %v1347_v5, 1  ;;  %v1393_v0 = vstv %s4959_s10  ;;  %v1178_v55 = vrot.slane %v4539_v56, 1  ;;  %v1188_v36 = vrot.slane %v4717_v40, 1  ;;  %s5111_s10 = sld [smem:[#allocation2 + $0x7e]] }
 0x19e   : > { %v1359_v63 = vsel %vm339_vm4, %v1357_v23, %v1358_v15  ;;  %v1168_v23 = vrot.slane %v4663_v33, 1  ;;  %v1394_v14 = vmul.f32 %v4442_v10, %v1393_v0  ;;  %v1905_v59 = vstv %s4985_s13  ;;  %s5130_s13 = sld [smem:[#allocation6 + $0x16]] }
 0x19f   : > { %v1349_v2 = vsel %vm328_vm3, %v1347_v5, %v1348_v6  ;;  %v979_v5 = vsel %vm295_vm0, %v6303_v8, %v978_v46  ;;  %v787_v6 = vadd.f32 %v785_v61, %v777_v27  ;;  %v1891_v8 = vstv %s4977_s12  ;;  %s5124_s12 = sld [smem:[#allocation6 + $0x17]] }
 0x1a0   : > { %v1351_v50 = vadd.f32 %v1349_v2, %v1341_v13  ;;  %1844 = vrot.lane.b32.xlu2 %v1842_v24, %s3938_s25  ;;  %v981_v42 = vadd.f32 %v979_v5, %v971_v52  ;;  %v1169_v13 = vsel %vm317_vm2, %v4663_v33, %v1168_v23  ;;  %v795_v2 = vsel %vm372_vm7, %v6304_v31, %v794_v11 }
 0x1a1   : > { %1834 = vrot.lane.b32.xlu1 %v1832_v54, %s3942_s9  ;;  %v1872_v54 = vmul.f32 %v1871_v28, %v4904_v44  ;;  %v1161_v28 = vadd.f32 %v1159_v58, %v1151_v9  ;;  %v989_v33 = vsel %vm306_vm1, %v6305_v53, %v988_v57  ;;  %v5020_v46 = vadd.f32 %v795_v2, %v787_v6 }
 0x1a2   : > { %v1361_v26 = vadd.f32 %v1359_v63, %v1351_v50  ;;  %1824 = vrot.lane.b32.xlu0 %v1822_v32, %s3939_s28  ;;  %v4980_v34 = vpop.permute.xlu2 %1494  ;;  %v991_v9 = vadd.f32 %v989_v33, %v981_v42  ;;  %v999_v63 = vsel %vm317_vm2, %v4478_v3, %v998_v29  ;;  %v1179_v27 = vsel %vm328_vm3, %v4539_v56, %v1178_v55 }
 0x1a3   : > { %v1387_v24 = vpop.permute.xlu1 %1386  ;;  %v1171_v41 = vadd.f32 %v1169_v13, %v1161_v28  ;;  %v1189_v52 = vsel %vm339_vm4, %v4717_v40, %v1188_v36  ;;  %v1906_v40 = vmul.f32 %v1905_v59, %v5020_v46  ;;  %v1892_v53 = vmul.f32 %v1891_v8, %v4904_v44  ;;  %v6307_v28 = vld [vmem:[#allocation26_spill] sm:$0xff] }
 0x1a4   : > { %v1377_v32 = vpop.permute.xlu0 %1376  ;;  %v1388_v39 = vrot.slane %v1387_v24, 1  ;;  %v1371_v62 = vadd.f32 %v1369_v47, %v1361_v26  ;;  %v1402_v26 = vrot.slane %v4859_v51, 1  ;;  %v1001_v56 = vadd.f32 %v999_v63, %v991_v9 }
 0x1a5   : > { %v1378_v15 = vrot.slane %v1377_v32, 1  ;;  %v1181_v31 = vadd.f32 %v1179_v27, %v1171_v41  ;;  %v1208_v0 = vrot.slane %v4580_v17, 1  ;;  %v1218_v6 = vrot.slane %v4762_v7, 1 }
 0x1a6   : > { %v1389_v12 = vsel %vm372_vm7, %v1387_v24, %v1388_v39  ;;  %v6306_v24 = vld [vmem:[#allocation33_spill] sm:$0xff]  ;;  %v1403_v57 = vsel %vm295_vm0, %v4859_v51, %v1402_v26  ;;  %v1028_v36 = vrot.slane %v4507_v30, 1  ;;  %v1925_v41 = vstv %s5026_s21  ;;  %s5166_s21 = sld [smem:[#allocation4 + $0x5]] }
 0x1a7   : > { %v1379_v60 = vsel %vm361_vm6, %v1377_v32, %v1378_v15  ;;  %v1191_v61 = vadd.f32 %v1189_v52, %v1181_v31  ;;  %v1018_v32 = vrot.slane %v6307_v28, 1  ;;  %v1935_v15 = vstv %s5012_s19  ;;  %s5154_s19 = sld [smem:[#allocation2 + $0x87]] }
 0x1a8   : > { %v1381_v21 = vadd.f32 %v1379_v60, %v1371_v62  ;;  %1874 = vrot.lane.b32.xlu2 %v1872_v54, %s3940_s30  ;;  %v1008_v54 = vrot.slane %v6306_v24, 1  ;;  %v1936_v2 = vmul.f32 %v1935_v15, %v5020_v46  ;;  %v1223_v8 = vstv %s5040_s26  ;;  %s5183_s26 = sld [smem:[#allocation6 + $0x19]] }
 0x1a9   : > { %1864 = vrot.lane.b32.xlu1 %v1862_v16, %s3937_s24  ;;  %v1881_v16 = vstv %s4998_s17  ;;  %v1019_v33 = vsel %vm339_vm4, %v6307_v28, %v1018_v32  ;;  %v1219_v9 = vsel %vm372_vm7, %v4762_v7, %v1218_v6  ;;  %v1926_v63 = vmul.f32 %v1925_v41, %v5020_v46  ;;  %s5139_s17 = sld [smem:[#allocation6 + $0x15]] }
 0x1aa   : > { %v1391_v50 = vadd.f32 %v1389_v12, %v1381_v21  ;;  %1854 = vrot.lane.b32.xlu0 %v1852_v48, %s3941_s6  ;;  %v5023_v58 = vpop.permute.xlu2 %1524  ;;  %v1198_v48 = vrot.slane %v4706_v43, 1  ;;  %v1882_v5 = vmul.f32 %v1881_v16, %v4904_v44  ;;  %v1009_v47 = vsel %vm328_vm3, %v6306_v24, %v1008_v54 }
 0x1ab   : > { %v1421_v10 = vpop.permute.xlu1 %1420  ;;  %v1011_v29 = vadd.f32 %v1009_v47, %v1001_v56  ;;  %v1209_v12 = vsel %vm361_vm6, %v4580_v17, %v1208_v0  ;;  %v1029_v52 = vsel %vm350_vm5, %v4507_v30, %v1028_v36  ;;  %v1432_v26 = vrot.slane %v4908_v22, 1 }
 0x1ac   : > { %v1395_v11 = vadd.f32 %v1394_v14, %v1391_v50  ;;  %v1411_v23 = vpop.permute.xlu0 %1410  ;;  %v1199_v51 = vsel %vm350_vm5, %v4706_v43, %v1198_v48  ;;  %v1422_v60 = vrot.slane %v1421_v10, 1  ;;  %v1915_v43 = vstv %s5035_s23  ;;  %s5176_s23 = sld [smem:[#allocation6 + $0x1a]] }
 0x1ad   : > { %v1412_v3 = vrot.slane %v1411_v23, 1  ;;  %v1201_v62 = vadd.f32 %v1199_v51, %v1191_v61  ;;  %v1021_v50 = vadd.f32 %v1019_v33, %v1011_v29  ;;  %v1916_v27 = vmul.f32 %v1915_v43, %v5020_v46  ;;  %v6308_v61 = vld [vmem:[#allocation28_spill] sm:$0xff] }
 0x1ae   : > { %v1405_v39 = vadd.f32 %v1403_v57, %v1395_v11  ;;  %v1423_v17 = vsel %vm317_vm2, %v1421_v10, %v1422_v60  ;;  %v1224_v7 = vmul.f32 %v4510_v1, %v1223_v8  ;;  %v1038_v11 = vrot.slane %v4501_v49, 1 }
 0x1af   : > { %v1413_v42 = vsel %vm306_vm1, %v1411_v23, %v1412_v3  ;;  %v1211_v59 = vadd.f32 %v1209_v12, %v1201_v62  ;;  %v1031_v23 = vadd.f32 %v1029_v52, %v1021_v50  ;;  %v1965_v10 = vstv %s5063_s27  ;;  %s5187_s27 = sld [smem:[#allocation6 + $0x18]] }
 0x1b0   : > { %1908 = vrot.lane.b32.xlu2 %v1906_v40, %s3939_s28  ;;  %v1415_v21 = vadd.f32 %v1413_v42, %v1405_v39  ;;  %v1232_v1 = vrot.slane %v4753_v25, 1  ;;  %v1433_v48 = vsel %vm328_vm3, %v4908_v22, %v1432_v26  ;;  %v1955_v56 = vstv %s5068_s29  ;;  %s5209_s29 = sld [smem:[#allocation6 + $0x1e]] }
 0x1b1   : > { %1894 = vrot.lane.b32.xlu1 %v1892_v53, %s3943_s11  ;;  %v1221_v54 = vadd.f32 %v1219_v9, %v1211_v59  ;;  %v1048_v40 = vrot.slane %v6308_v61, 1  ;;  %v1039_v28 = vsel %vm361_vm6, %v4501_v49, %v1038_v11  ;;  %v1945_v22 = vstv %s5078_s7  ;;  %s5215_s7 = sld [smem:[#allocation6 + $0x1d]] }
 0x1b2   : > { %1884 = vrot.lane.b32.xlu0 %v1882_v5, %s3944_s14  ;;  %v5059_v55 = vpop.permute.xlu2 %1554  ;;  %v1425_v31 = vadd.f32 %v1423_v17, %v1415_v21  ;;  %v1041_v47 = vadd.f32 %v1039_v28, %v1031_v23  ;;  %v1966_v15 = vmul.f32 %v1965_v10, %v5020_v46  ;;  %v1956_v0 = vmul.f32 %v1955_v56, %v5020_v46 }
 0x1b3   : > { %v5061_v13 = vpop.permute.xlu1 %1450  ;;  %v1225_v53 = vadd.f32 %v1224_v7, %v1221_v54  ;;  %v1242_v51 = vrot.slane %v4618_v35, 1  ;;  %v1233_v6 = vsel %vm295_vm0, %v4753_v25, %v1232_v1  ;;  %v1049_v42 = vsel %vm372_vm7, %v6308_v61, %v1048_v40  ;;  %v5161_v7 = vld [vmem:[%s4028_s20 + $0x2] ss:$4 sm:$0x7] }
 0x1b4   : > { %v1441_v14 = vpop.permute.xlu0 %1440  ;;  %v1435_v57 = vadd.f32 %v1433_v48, %v1425_v31  ;;  %v1452_v32 = vrot.slane %v5061_v13, 1  ;;  %v1946_v29 = vmul.f32 %v1945_v22, %v5020_v46  ;;  %v1252_v62 = vrot.slane %v4817_v4, 1 }
 0x1b5   : > { %v1442_v24 = vrot.slane %v1441_v14, 1  ;;  %v1235_v49 = vadd.f32 %v1233_v6, %v1225_v53  ;;  %v1462_v36 = vrot.slane %v4945_v38, 1  ;;  %v5132_v41 = vadd.f32 %v1049_v42, %v1041_v47  ;;  %v3851_v6 = vld [vmem:[%s4028_s20] ss:$4 sm:$0x7] }
 0x1b6   : > { %v1453_v25 = vsel %vm350_vm5, %v5061_v13, %v1452_v32  ;;  %v1999_v33 = vstv %s5096_s8  ;;  %v1989_v13 = vstv %s5103_s15  ;;  %v1975_v9 = vstv %s5106_s16  ;;  %s5223_s8 = sld [smem:[#allocation6 + $0x1c]] }
 0x1b7   : > { %v1443_v3 = vsel %vm339_vm4, %v1441_v14, %v1442_v24  ;;  %v1253_v50 = vsel %vm317_vm2, %v4817_v4, %v1252_v62  ;;  %v1463_v59 = vsel %vm361_vm6, %v4945_v38, %v1462_v36  ;;  %v2000_v52 = vmul.f32 %v1999_v33, %v5132_v41  ;;  %s5242_s15 = sld [smem:[#allocation6 + $0x21]] }
 0x1b8   : > { %1938 = vrot.lane.b32.xlu2 %v1936_v2, %s3941_s6  ;;  %v1445_v39 = vadd.f32 %v1443_v3, %v1435_v57  ;;  %v1243_v2 = vsel %vm306_vm1, %v4618_v35, %v1242_v51  ;;  %v1990_v26 = vmul.f32 %v1989_v13, %v5132_v41  ;;  %v1262_v17 = vrot.slane %v4806_v19, 1  ;;  %s5249_s16 = sld [smem:[#allocation6 + $0x20]] }
 0x1b9   : > { %1928 = vrot.lane.b32.xlu1 %v1926_v63, %s3938_s25  ;;  %v1245_v12 = vadd.f32 %v1243_v2, %v1235_v49  ;;  %v1477_v63 = vstv %s5111_s10  ;;  %v1976_v4 = vmul.f32 %v1975_v9, %v5020_v46  ;;  %v2029_v23 = vstv %s5124_s12  ;;  %s5251_s10 = sld [smem:[#allocation6 + $0x1f]] }
 0x1ba   : > { %1918 = vrot.lane.b32.xlu0 %v1916_v27, %s3942_s9  ;;  %v5091_v30 = vpop.permute.xlu2 %1590  ;;  %v1455_v43 = vadd.f32 %v1453_v25, %v1445_v39  ;;  %v1478_v38 = vmul.f32 %v5161_v7, %v1477_v63  ;;  %v2019_v10 = vstv %s5130_s13  ;;  %v2009_v1 = vstv %s5139_s17  ;;  %s5256_s12 = sld [smem:[#allocation2 + $0x90]] }
 0x1bb   : > { %v5093_v16 = vpop.permute.xlu1 %1484  ;;  %v1255_v24 = vadd.f32 %v1253_v50, %v1245_v12  ;;  %v1272_v48 = vrot.slane %v4661_v37, 1  ;;  %v1263_v3 = vsel %vm328_vm3, %v4806_v19, %v1262_v17  ;;  %v1282_v56 = vrot.slane %v4869_v20, 1  ;;  %s5274_s13 = sld [smem:[#allocation6 + $0x23]] }
 0x1bc   : > { %v1471_v5 = vpop.permute.xlu0 %1470  ;;  %v1465_v35 = vadd.f32 %v1463_v59, %v1455_v43  ;;  %v1486_v61 = vrot.slane %v5093_v16, 1  ;;  %v2030_v28 = vmul.f32 %v2029_v23, %v5132_v41  ;;  %v2020_v32 = vmul.f32 %v2019_v10, %v5132_v41  ;;  %s5278_s17 = sld [smem:[#allocation6 + $0x25]] }
 0x1bd   : > { %v1472_v60 = vrot.slane %v1471_v5, 1  ;;  %v1265_v40 = vadd.f32 %v1263_v3, %v1255_v24  ;;  %v2010_v19 = vmul.f32 %v2009_v1, %v5132_v41  ;;  %v1273_v22 = vsel %vm339_vm4, %v4661_v37, %v1272_v48 }
 0x1be   : > { %v1283_v47 = vsel %vm350_vm5, %v4869_v20, %v1282_v56  ;;  %v1496_v39 = vrot.slane %v4980_v34, 1  ;;  %v1292_v37 = vrot.slane %v4861_v18, 1  ;;  %v1561_v49 = vstv %s5166_s21  ;;  %s5305_s21 = sld [smem:[#allocation6 + $0x28]] }
 0x1bf   : > { %v1473_v27 = vsel %vm372_vm7, %v1471_v5, %v1472_v60  ;;  %v1563_v5 = vstv %s5154_s19  ;;  %v2059_v25 = vstv %s5176_s23  ;;  %v2049_v60 = vstv %s5183_s26  ;;  %s5287_s19 = sld [smem:[#allocation6 + $0x22]] }
 0x1c0   : > { %1968 = vrot.lane.b32.xlu2 %v1966_v15, %s3944_s14  ;;  %v1475_v54 = vadd.f32 %v1473_v27, %v1465_v35  ;;  %v1487_v15 = vsel %vm295_vm0, %v5093_v16, %v1486_v61  ;;  %v1564_v42 = vmul.f32 %v3851_v6, %v1563_v5  ;;  %v1497_v36 = vsel %vm306_vm1, %v4980_v34, %v1496_v39  ;;  %s5314_s23 = sld [smem:[#allocation6 + $0x26]] }
 0x1c1   : > { %1958 = vrot.lane.b32.xlu1 %v1956_v0, %s3940_s30  ;;  %v1275_v0 = vadd.f32 %v1273_v22, %v1265_v40  ;;  %v1302_v43 = vrot.slane %v4704_v45, 1  ;;  %v2039_v12 = vstv %s5187_s27  ;;  %v1293_v9 = vsel %vm361_vm6, %v4861_v18, %v1292_v37  ;;  %s5324_s26 = sld [smem:[#allocation6 + $0x2b]] }
 0x1c2   : > { %1948 = vrot.lane.b32.xlu0 %v1946_v29, %s3937_s24  ;;  %v5135_v21 = vpop.permute.xlu2 %1620  ;;  %v1479_v53 = vadd.f32 %v1478_v38, %v1475_v54  ;;  %v1565_v33 = vadd.f32 %v1564_v42, %v1561_v49  ;;  %v2060_v27 = vmul.f32 %v2059_v25, %v5132_v41  ;;  %v2050_v35 = vmul.f32 %v2049_v60, %v5132_v41  ;;  %s5329_s27 = sld [smem:[#allocation6 + $0x2a]] }
 0x1c3   : > { %v5137_v14 = vpop.permute.xlu1 %1514  ;;  %v1285_v29 = vadd.f32 %v1283_v47, %v1275_v0  ;;  %v2040_v18 = vmul.f32 %v2039_v12, %v5132_v41  ;;  %v1592_v24 = vrot.slane %v5091_v30, 1  ;;  %v2093_v48 = vstv %s5209_s29  ;;  %s3612_s29 = sld [smem:[#allocation2 + $0x99]] }
 0x1c4   : > { %v5145_v8 = vpop.permute.xlu0 %1504  ;;  %v1489_v51 = vadd.f32 %v1487_v15, %v1479_v53  ;;  %v1526_v3 = vrot.slane %v5023_v58, 1  ;;  %v2083_v61 = vstv %s5215_s7  ;;  %v1556_v25 = vrot.slane %v5059_v55, 1  ;;  %s5336_s7 = sld [smem:[#allocation6 + $0x29]] }
 0x1c5   : > { %v1506_v20 = vrot.slane %v5145_v8, 1  ;;  %v1295_v34 = vadd.f32 %v1293_v9, %v1285_v29  ;;  %v1593_v5 = vsel %vm317_vm2, %v5091_v30, %v1592_v24  ;;  %v1622_v30 = vrot.slane %v5135_v21, 1 }
 0x1c6   : > { %v1499_v2 = vadd.f32 %v1497_v36, %v1489_v51  ;;  %v1527_v39 = vsel %vm339_vm4, %v5023_v58, %v1526_v3  ;;  %v2113_v36 = vstv %s5249_s16  ;;  %v1647_v9 = vstv %s5256_s12  ;;  %s5370_s16 = sld [smem:[#allocation7]] }
 0x1c7   : > { %v1507_v50 = vsel %vm317_vm2, %v5145_v8, %v1506_v20  ;;  %v1303_v8 = vsel %vm372_vm7, %v4704_v45, %v1302_v43  ;;  %v1623_v60 = vsel %vm350_vm5, %v5135_v21, %v1622_v30  ;;  %s3666_s12 = sld [smem:[#allocation6 + $0x2e]] }
 0x1c8   : > { %2002 = vrot.lane.b32.xlu2 %v2000_v52, %s3942_s9  ;;  %v1516_v52 = vrot.slane %v5137_v14, 1  ;;  %v1509_v17 = vadd.f32 %v1507_v50, %v1499_v2  ;;  %v5236_v54 = vadd.f32 %v1303_v8, %v1295_v34  ;;  %v2103_v2 = vstv %s5251_s10  ;;  %s5374_s10 = sld [smem:[#allocation6 + $0x2f]] }
 0x1c9   : > { %1992 = vrot.lane.b32.xlu1 %v1990_v26, %s3939_s28 }
 0x1ca   : > { %1978 = vrot.lane.b32.xlu0 %v1976_v4, %s3943_s11  ;;  %v5169_v31 = vpop.permute.xlu2 %1654  ;;  %v1517_v45 = vsel %vm328_vm3, %v5137_v14, %v1516_v52  ;;  %v2094_v14 = vmul.f32 %v2093_v48, %v5236_v54  ;;  %v2084_v47 = vmul.f32 %v2083_v61, %v5236_v54  ;;  %v2114_v34 = vmul.f32 %v2113_v36, %v5236_v54 }
 0x1cb   : > { %v5171_v11 = vpop.permute.xlu1 %1544  ;;  %v1519_v40 = vadd.f32 %v1517_v45, %v1509_v17  ;;  %v1656_v17 = vrot.slane %v5169_v31, 1  ;;  %v2133_v61 = vstv %s5287_s19  ;;  %s5393_s19 = sld [smem:[#allocation6 + $0x31]] }
 0x1cc   : > { %v5185_v57 = vpop.permute.xlu0 %1534  ;;  %v1546_v58 = vrot.slane %v5171_v11, 1 }
 0x1cd   : > { %v1536_v56 = vrot.slane %v5185_v57, 1  ;;  %v1529_v51 = vadd.f32 %v1527_v39, %v1519_v40  ;;  %v1657_v3 = vsel %vm295_vm0, %v5169_v31, %v1656_v17  ;;  %v2134_v31 = vmul.f32 %v2133_v61, %v5236_v54 }
 0x1cf   : > { %v1537_v15 = vsel %vm350_vm5, %v5185_v57, %v1536_v56 }
 0x1d0   : > { %2032 = vrot.lane.b32.xlu2 %v2030_v28, %s3937_s24  ;;  %v1539_v57 = vadd.f32 %v1537_v15, %v1529_v51  ;;  %v2187_v15 = vstv %s5305_s21  ;;  %s5397_s21 = sld [smem:[#allocation6 + $0x33]] }
 0x1d1   : > { %2022 = vrot.lane.b32.xlu1 %v2020_v32, %s3941_s6 }
 0x1d2   : > { %2012 = vrot.lane.b32.xlu0 %v2010_v19, %s3938_s25  ;;  %v5207_v16 = vpop.permute.xlu2 %1684  ;;  %v2073_v19 = vstv %s5223_s8  ;;  %s3664_s8 = sld [smem:[#allocation6 + $0x2c]] }
 0x1d3   : > { %v1581_v62 = vpop.permute.xlu1 %1580  ;;  %v2074_v42 = vmul.f32 %v2073_v19, %v5236_v54  ;;  %v1686_v19 = vrot.slane %v5207_v16, 1 }
 0x1d4   : > { %v1571_v13 = vpop.permute.xlu0 %1570  ;;  %v1582_v59 = vrot.slane %v1581_v62, 1 }
 0x1d5   : > { %v1572_v63 = vrot.slane %v1571_v13, 1  ;;  %v1687_v51 = vsel %vm328_vm3, %v5207_v16, %v1686_v19 }
 0x1d6   : > { %v1583_v38 = vsel %vm306_vm1, %v1581_v62, %v1582_v59  ;;  %v2123_v62 = vstv %s5242_s15  ;;  %s1816_s15 = sld [smem:[#allocation6]] }
 0x1d7   : > { %v1573_v26 = vsel %vm295_vm0, %v1571_v13, %v1572_v63  ;;  %v2124_v63 = vmul.f32 %v2123_v62, %v5236_v54 }
 0x1d8   : > { %v1575_v4 = vadd.f32 %v1573_v26, %v1565_v33  ;;  %2062 = vrot.lane.b32.xlu2 %v2060_v27, %s3943_s11  ;;  %v1547_v33 = vsel %vm361_vm6, %v5171_v11, %v1546_v58  ;;  %v2104_v11 = vmul.f32 %v2103_v2, %v5236_v54  ;;  %v1557_v26 = vsel %vm372_vm7, %v5059_v55, %v1556_v25 }
 0x1d9   : > { %2052 = vrot.lane.b32.xlu1 %v2050_v35, %s3944_s14  ;;  %v1549_v50 = vadd.f32 %v1547_v33, %v1539_v57  ;;  %v3852_v35 = vld [vmem:[%s4028_s20 + $0x1] ss:$4 sm:$0x7]  ;;  %s5309_s20 = sld [smem:[#allocation6 + $0x27]]  ;;  %v2167_v58 = vstv %s5314_s23  ;;  %v1731_v33 = vstv %s3612_s29 }
 0x1da   : > { %v1585_v23 = vadd.f32 %v1583_v38, %v1575_v4  ;;  %2042 = vrot.lane.b32.xlu0 %v2040_v18, %s3940_s30  ;;  %v5239_v10 = vpop.permute.xlu2 %1714  ;;  %v1648_v52 = vmul.f32 %v3852_v35, %v1647_v9  ;;  %s5414_s23 = sld [smem:[#allocation6 + $0x34]] }
 0x1db   : > { %v1611_v1 = vpop.permute.xlu1 %1610  ;;  %v5300_v18 = vadd.f32 %v1557_v26, %v1549_v50  ;;  %v1716_v36 = vrot.slane %v5239_v10, 1  ;;  %s5432_s29 = sld [smem:[#allocation6 + $0x39]] }
 0x1dc   : > { %v1601_v53 = vpop.permute.xlu0 %1600  ;;  %v1612_v28 = vrot.slane %v1611_v1, 1  ;;  %v1595_v22 = vadd.f32 %v1593_v5, %v1585_v23  ;;  %v2157_v23 = vstv %s5278_s17  ;;  %s5388_s17 = sld [smem:[#allocation6 + $0x32]] }
 0x1dd   : > { %v1602_v32 = vrot.slane %v1601_v53, 1  ;;  %v2188_v57 = vmul.f32 %v2187_v15, %v5300_v18  ;;  %v2168_v16 = vmul.f32 %v2167_v58, %v5300_v18  ;;  %v1717_v50 = vsel %vm361_vm6, %v5239_v10, %v1716_v36 }
 0x1de   : > { %v1613_v37 = vsel %vm339_vm4, %v1611_v1, %v1612_v28  ;;  %v2143_v1 = vstv %s5274_s13  ;;  %s3668_s13 = sld [smem:[#allocation6 + $0x30]] }
 0x1df   : > { %v1603_v0 = vsel %vm328_vm3, %v1601_v53, %v1602_v32  ;;  %v2158_v53 = vmul.f32 %v2157_v23, %v5300_v18  ;;  %v2144_v5 = vmul.f32 %v2143_v1, %v5236_v54 }
 0x1e0   : > { %v1605_v6 = vadd.f32 %v1603_v0, %v1595_v22  ;;  %2096 = vrot.lane.b32.xlu2 %v2094_v14, %s3938_s25  ;;  %v2177_v0 = vstv %s5309_s20  ;;  %s5410_s20 = sld [smem:[#allocation6 + $0x35]] }
 0x1e1   : > { %2086 = vrot.lane.b32.xlu1 %v2084_v47, %s3942_s9 }
 0x1e2   : > { %v1615_v20 = vadd.f32 %v1613_v37, %v1605_v6  ;;  %2076 = vrot.lane.b32.xlu0 %v2074_v42, %s3939_s28  ;;  %v5272_v49 = vpop.permute.xlu2 %1748 }
 0x1e3   : > { %v1641_v29 = vpop.permute.xlu1 %1640  ;;  %v1750_v17 = vrot.slane %v5272_v49, 1 }
 0x1e4   : > { %v1631_v43 = vpop.permute.xlu0 %1630  ;;  %v1642_v13 = vrot.slane %v1641_v29, 1  ;;  %v1625_v59 = vadd.f32 %v1623_v60, %v1615_v20  ;;  %v2178_v20 = vmul.f32 %v2177_v0, %v5300_v18  ;;  %v2261_v36 = vstv %s3668_s13  ;;  %s5482_s13 = sld [smem:[#allocation6 + $0x40]] }
 0x1e5   : > { %v1632_v12 = vrot.slane %v1631_v43, 1 }
 0x1e6   : > { %v1643_v4 = vsel %vm372_vm7, %v1641_v29, %v1642_v13  ;;  %v2217_v13 = vstv %s5324_s26  ;;  %s5417_s26 = sld [smem:[#allocation6 + $0x37]] }
 0x1e7   : > { %v1633_v27 = vsel %vm361_vm6, %v1631_v43, %v1632_v12  ;;  %v2207_v12 = vstv %s5329_s27  ;;  %s5425_s27 = sld [smem:[#allocation6 + $0x9]] }
 0x1e8   : > { %v1635_v21 = vadd.f32 %v1633_v27, %v1625_v59  ;;  %2126 = vrot.lane.b32.xlu2 %v2124_v63, %s3940_s30  ;;  %v2197_v63 = vstv %s5336_s7  ;;  %v1732_v27 = vmul.f32 %v5161_v7, %v1731_v33  ;;  %s5436_s7 = sld [smem:[#allocation6 + $0x38]] }
 0x1e9   : > { %2116 = vrot.lane.b32.xlu1 %v2114_v34, %s3937_s24  ;;  %v2198_v10 = vmul.f32 %v2197_v63, %v5300_v18 }
 0x1ea   : > { %v1645_v8 = vadd.f32 %v1643_v4, %v1635_v21  ;;  %2106 = vrot.lane.b32.xlu0 %v2104_v11, %s3941_s6  ;;  %v5303_v24 = vpop.permute.xlu2 %1778  ;;  %v2218_v21 = vmul.f32 %v2217_v13, %v5300_v18  ;;  %v2208_v11 = vmul.f32 %v2207_v12, %v5300_v18 }
 0x1eb   : > { %v1675_v38 = vpop.permute.xlu1 %1674 }
 0x1ec   : > { %v1649_v55 = vadd.f32 %v1648_v52, %v1645_v8  ;;  %v1665_v48 = vpop.permute.xlu0 %1664  ;;  %v1676_v45 = vrot.slane %v1675_v38, 1 }
 0x1ed   : > { %v1666_v56 = vrot.slane %v1665_v48, 1 }
 0x1ee   : > { %v1659_v40 = vadd.f32 %v1657_v3, %v1649_v55  ;;  %v1677_v22 = vsel %vm317_vm2, %v1675_v38, %v1676_v45  ;;  %v1751_v55 = vsel %vm306_vm1, %v5272_v49, %v1750_v17  ;;  %v2227_v45 = vstv %s3664_s8  ;;  %s5441_s8 = sld [smem:[#allocation6 + $0x3a]] }
 0x1ef   : > { %v1667_v28 = vsel %vm306_vm1, %v1665_v48, %v1666_v56 }
 0x1f0   : > { %v1669_v32 = vadd.f32 %v1667_v28, %v1659_v40  ;;  %2160 = vrot.lane.b32.xlu2 %v2158_v53, %s3939_s28  ;;  %v2228_v53 = vmul.f32 %v2227_v45, %v5300_v18 }
 0x1f1   : > { %2146 = vrot.lane.b32.xlu1 %v2144_v5, %s3943_s11  ;;  %v1780_v5 = vrot.slane %v5303_v24, 1 }
 0x1f2   : > { %v1679_v14 = vadd.f32 %v1677_v22, %v1669_v32  ;;  %2136 = vrot.lane.b32.xlu0 %v2134_v31, %s3944_s14  ;;  %v5327_v47 = vpop.permute.xlu2 %1808 }
 0x1f3   : > { %v1705_v39 = vpop.permute.xlu1 %1704  ;;  %v1781_v22 = vsel %vm339_vm4, %v5303_v24, %v1780_v5  ;;  %v1810_v0 = vrot.slane %v5327_v47, 1 }
 0x1f4   : > { %v1695_v30 = vpop.permute.xlu0 %1694  ;;  %v1706_v6 = vrot.slane %v1705_v39, 1  ;;  %v1689_v37 = vadd.f32 %v1687_v51, %v1679_v14  ;;  %v1817_v51 = vstv %s1816_s15  ;;  %s5456_s15 = sld [smem:[#allocation6 + $0x3c]] }
 0x1f5   : > { %v1696_v42 = vrot.slane %v1695_v30, 1  ;;  %v1811_v24 = vsel %vm372_vm7, %v5327_v47, %v1810_v0 }
 0x1f6   : > { %v1707_v25 = vsel %vm350_vm5, %v1705_v39, %v1706_v6 }
 0x1f7   : > { %v1697_v29 = vsel %vm339_vm4, %v1695_v30, %v1696_v42 }
 0x1f8   : > { %v1699_v62 = vadd.f32 %v1697_v29, %v1689_v37  ;;  %2190 = vrot.lane.b32.xlu2 %v2188_v57, %s3941_s6  ;;  %v1818_v29 = vmul.f32 %v1817_v51, %v4904_v44  ;;  %v1901_v51 = vstv %s5425_s27  ;;  %s5530_s27 = sld [smem:[#allocation6 + $0x45]] }
 0x1f9   : > { %2180 = vrot.lane.b32.xlu1 %v2178_v20, %s3938_s25  ;;  %v1815_v20 = vstv %s5370_s16  ;;  %s5460_s16 = sld [smem:[#allocation6 + $0x3b]] }
 0x1fa   : > { %v1709_v60 = vadd.f32 %v1707_v25, %v1699_v62  ;;  %2170 = vrot.lane.b32.xlu0 %v2168_v16, %s3942_s9  ;;  %v5347_v2 = vpop.permute.xlu2 %1844  ;;  %v2251_v62 = vstv %s5374_s10  ;;  %v2241_v16 = vstv %s3666_s12  ;;  %v1819_v13 = vadd.f32 %v1818_v29, %v1815_v20  ;;  %s5463_s10 = sld [smem:[#allocation6 + $0x3d]] }
 0x1fb   : > { %v1739_v43 = vpop.permute.xlu1 %1738  ;;  %v1846_v63 = vrot.slane %v5347_v2, 1  ;;  %v1902_v20 = vmul.f32 %v1901_v51, %v5020_v46  ;;  %v2352_v29 = vstv %s5432_s29  ;;  %s5478_s12 = sld [smem:[#allocation6 + $0x3e]] }
 0x1fc   : > { %v1725_v9 = vpop.permute.xlu0 %1724  ;;  %v1719_v34 = vadd.f32 %v1717_v50, %v1709_v60  ;;  %v1740_v35 = vrot.slane %v1739_v43, 1  ;;  %s5533_s29 = sld [smem:[#allocation6 + $0x47]] }
 0x1fd   : > { %v1726_v59 = vrot.slane %v1725_v9, 1  ;;  %v1847_v17 = vsel %vm317_vm2, %v5347_v2, %v1846_v63 }
 0x1fe   : > { %v1741_v38 = vsel %vm295_vm0, %v1739_v43, %v1740_v35  ;;  %v2281_v35 = vstv %s5388_s17  ;;  %s5485_s17 = sld [smem:[#allocation6 + $0x41]] }
 0x1ff   : > { %v1727_v52 = vsel %vm372_vm7, %v1725_v9, %v1726_v59 }
 0x200   : > { %v1729_v26 = vadd.f32 %v1727_v52, %v1719_v34  ;;  %2220 = vrot.lane.b32.xlu2 %v2218_v21, %s3944_s14  ;;  %v2271_v52 = vstv %s5393_s19  ;;  %s5489_s19 = sld [smem:[#allocation6 + $0x12]] }
 0x201   : > { %2210 = vrot.lane.b32.xlu1 %v2208_v11, %s3940_s30 }
 0x202   : > { %v1733_v4 = vadd.f32 %v1732_v27, %v1729_v26  ;;  %2200 = vrot.lane.b32.xlu0 %v2198_v10, %s3937_s24  ;;  %v5363_v8 = vpop.permute.xlu2 %1874  ;;  %v2291_v10 = vstv %s5397_s21  ;;  %s5502_s21 = sld [smem:[#allocation6 + $0x43]] }
 0x203   : > { %v1769_v7 = vpop.permute.xlu1 %1768  ;;  %v1876_v2 = vrot.slane %v5363_v8, 1 }
 0x204   : > { %v1743_v23 = vadd.f32 %v1741_v38, %v1733_v4  ;;  %v1759_v1 = vpop.permute.xlu0 %1758  ;;  %v1770_v48 = vrot.slane %v1769_v7, 1 }
 0x205   : > { %v1760_v3 = vrot.slane %v1759_v1, 1 }
 0x206   : > { %v1753_v56 = vadd.f32 %v1751_v55, %v1743_v23  ;;  %v1771_v28 = vsel %vm328_vm3, %v1769_v7, %v1770_v48 }
 0x207   : > { %v1761_v61 = vsel %vm317_vm2, %v1759_v1, %v1760_v3 }
 0x208   : > { %v1763_v40 = vadd.f32 %v1761_v61, %v1753_v56 }
 0x20a   : > { %v1773_v32 = vadd.f32 %v1771_v28, %v1763_v40  ;;  %2230 = vrot.lane.b32.xlu0 %v2228_v53, %s3943_s11  ;;  %v5377_v31 = vpop.permute.xlu2 %1908  ;;  %v2311_v40 = vstv %s5410_s20  ;;  %v2301_v53 = vstv %s5414_s23  ;;  %s5506_s20 = sld [smem:[#allocation6 + $0x42]] }
 0x20b   : > { %v1799_v49 = vpop.permute.xlu1 %1798  ;;  %s5509_s23 = sld [smem:[#allocation6 + $0x44]] }
 0x20c   : > { %v1789_v19 = vpop.permute.xlu0 %1788  ;;  %v1800_v14 = vrot.slane %v1799_v49, 1  ;;  %v1783_v15 = vadd.f32 %v1781_v22, %v1773_v32  ;;  %v2332_v32 = vstv %s5417_s26  ;;  %s5525_s26 = sld [smem:[#allocation6 + $0x46]] }
 0x20d   : > { %v1790_v39 = vrot.slane %v1789_v19, 1 }
 0x20e   : > { %v1801_v42 = vsel %vm361_vm6, %v1799_v49, %v1800_v14  ;;  %v1877_v49 = vsel %vm350_vm5, %v5363_v8, %v1876_v2  ;;  %v1910_v8 = vrot.slane %v5377_v31, 1 }
 0x20f   : > { %v1791_v30 = vsel %vm350_vm5, %v1789_v19, %v1790_v39 }
 0x210   : > { %v1793_v6 = vadd.f32 %v1791_v30, %v1783_v15  ;;  %v2333_v30 = vmul.f32 %v2332_v32, %v4904_v44  ;;  %v2426_v32 = vstv %s5485_s17  ;;  %s5594_s17 = sld [smem:[#allocation6 + $0x50]] }
 0x211   : > { %v2427_v51 = vmul.f32 %v2426_v32, %v5020_v46 }
 0x212   : > { %v1803_v58 = vadd.f32 %v1801_v42, %v1793_v6  ;;  %v5384_v37 = vpop.permute.xlu2 %1938 }
 0x213   : > { %v1835_v57 = vpop.permute.xlu1 %1834 }
 0x214   : > { %v5395_v25 = vadd.f32 %v1811_v24, %v1803_v58  ;;  %v1825_v60 = vpop.permute.xlu0 %1824  ;;  %v1836_v43 = vrot.slane %v1835_v57, 1  ;;  %v2342_v24 = vstv %s5436_s7  ;;  %s5546_s7 = sld [smem:[#allocation6 + $0x1b]] }
 0x215   : > { %v1826_v33 = vrot.slane %v1825_v60, 1 }
 0x216   : > { %v2252_v12 = vmul.f32 %v2251_v62, %v5395_v25  ;;  %v2242_v9 = vmul.f32 %v2241_v16, %v5395_v25  ;;  %v2262_v47 = vmul.f32 %v2261_v36, %v5395_v25  ;;  %v1837_v34 = vsel %vm306_vm1, %v1835_v57, %v1836_v43 }
 0x217   : > { %v1827_v50 = vsel %vm295_vm0, %v1825_v60, %v1826_v33  ;;  %v2282_v23 = vmul.f32 %v2281_v35, %v5395_v25  ;;  %v2272_v1 = vmul.f32 %v2271_v52, %v5395_v25  ;;  %v2292_v48 = vmul.f32 %v2291_v10, %v5395_v25 }
 0x218   : > { %v1829_v59 = vadd.f32 %v1827_v50, %v1819_v13  ;;  %2254 = vrot.lane.b32.xlu2 %v2252_v12, %s3942_s9  ;;  %2244 = vrot.lane.b32.xlu1 %v2242_v9, %s3939_s28  ;;  %v2312_v39 = vmul.f32 %v2311_v40, %v5395_v25  ;;  %v2302_v15 = vmul.f32 %v2301_v53, %v5395_v25  ;;  %v2362_v36 = vstv %s5441_s8  ;;  %s5548_s8 = sld [smem:[#allocation6 + $0x4a]] }
 0x219   : > { %2264 = vrot.lane.b32.xlu0 %v2262_v47, %s3938_s25  ;;  %v1911_v60 = vsel %vm295_vm0, %v5377_v31, %v1910_v8  ;;  %v2353_v9 = vmul.f32 %v2352_v29, %v4904_v44  ;;  %v2343_v47 = vmul.f32 %v2342_v24, %v4904_v44  ;;  %v1940_v31 = vrot.slane %v5384_v37, 1 }
 0x21a   : > { %v1839_v27 = vadd.f32 %v1837_v34, %v1829_v59  ;;  %v5408_v21 = vpop.permute.xlu2 %1968  ;;  %v2363_v59 = vmul.f32 %v2362_v36, %v4904_v44  ;;  %v2382_v35 = vstv %s5456_s15  ;;  %v2372_v52 = vstv %s5460_s16  ;;  %s5552_s15 = sld [smem:[#allocation6 + $0x49]] }
 0x21b   : > { %v1865_v11 = vpop.permute.xlu1 %1864  ;;  %v2392_v10 = vstv %s5463_s10  ;;  %v2416_v40 = vstv %s5482_s13  ;;  %v2402_v53 = vstv %s5478_s12  ;;  %v2446_v29 = vstv %s5502_s21  ;;  %s5557_s16 = sld [smem:[#allocation6 + $0x4b]] }
 0x21c   : > { %v1855_v26 = vpop.permute.xlu0 %1854  ;;  %v1866_v4 = vrot.slane %v1865_v11, 1  ;;  %v1849_v38 = vadd.f32 %v1847_v17, %v1839_v27  ;;  %v1941_v17 = vsel %vm328_vm3, %v5384_v37, %v1940_v31  ;;  %v1970_v37 = vrot.slane %v5408_v21, 1  ;;  %s5571_s10 = sld [smem:[#allocation6 + $0x4d]] }
 0x21d   : > { %v1856_v7 = vrot.slane %v1855_v26, 1  ;;  %v2436_v24 = vstv %s5506_s20  ;;  %v2456_v36 = vstv %s5509_s23  ;;  %s5577_s12 = sld [smem:[#allocation6 + $0x4c]] }
 0x21e   : > { %v1867_v45 = vsel %vm339_vm4, %v1865_v11, %v1866_v4  ;;  %s5581_s13 = sld [smem:[#allocation6 + $0x4e]] }
 0x21f   : > { %v1857_v55 = vsel %vm328_vm3, %v1855_v26, %v1856_v7  ;;  %s5601_s21 = sld [smem:[#allocation6 + $0x52]] }
 0x220   : > { %v1859_v3 = vadd.f32 %v1857_v55, %v1849_v38  ;;  %2284 = vrot.lane.b32.xlu2 %v2282_v23, %s3937_s24  ;;  %2274 = vrot.lane.b32.xlu1 %v2272_v1, %s3941_s6  ;;  %v2383_v23 = vmul.f32 %v2382_v35, %v4904_v44  ;;  %v2373_v1 = vmul.f32 %v2372_v52, %v4904_v44  ;;  %v2466_v35 = vstv %s5530_s27  ;;  %s5609_s20 = sld [smem:[#allocation6 + $0x24]] }
 0x221   : > { %2294 = vrot.lane.b32.xlu0 %v2292_v48, %s3940_s30  ;;  %v2393_v48 = vmul.f32 %v2392_v10, %v4904_v44  ;;  %v2486_v10 = vstv %s5533_s29  ;;  %s5618_s23 = sld [smem:[#allocation6 + $0x54]] }
 0x222   : > { %v1869_v56 = vadd.f32 %v1867_v45, %v1859_v3  ;;  %v5438_v5 = vpop.permute.xlu2 %2002  ;;  %s5625_s27 = sld [smem:[#allocation6 + $0x55]] }
 0x223   : > { %v1895_v61 = vpop.permute.xlu1 %1894  ;;  %s5640_s29 = sld [smem:[#allocation6 + $0x57]] }
 0x224   : > { %v1885_v28 = vpop.permute.xlu0 %1884  ;;  %v1896_v19 = vrot.slane %v1895_v61, 1  ;;  %v1879_v14 = vadd.f32 %v1877_v49, %v1869_v56  ;;  %v1971_v49 = vsel %vm361_vm6, %v5408_v21, %v1970_v37  ;;  %v2004_v21 = vrot.slane %v5438_v5, 1 }
 0x225   : > { %v1886_v22 = vrot.slane %v1885_v28, 1 }
 0x226   : > { %v1897_v42 = vsel %vm372_vm7, %v1895_v61, %v1896_v19  ;;  %v1985_v19 = vstv %s5489_s19  ;;  %s5598_s19 = sld [smem:[#allocation6 + $0x4f]] }
 0x227   : > { %v1887_v0 = vsel %vm361_vm6, %v1885_v28, %v1886_v22 }
 0x228   : > { %v1889_v6 = vadd.f32 %v1887_v0, %v1879_v14  ;;  %2314 = vrot.lane.b32.xlu2 %v2312_v39, %s3943_s11  ;;  %2304 = vrot.lane.b32.xlu1 %v2302_v15, %s3944_s14  ;;  %v2417_v39 = vmul.f32 %v2416_v40, %v5020_v46  ;;  %v2403_v15 = vmul.f32 %v2402_v53, %v4904_v44  ;;  %v2510_v53 = vstv %s5548_s8  ;;  %s5647_s8 = sld [smem:[#allocation6 + $0x58]] }
 0x229   : > { %2335 = vrot.lane.b32.xlu0 %v2333_v30, %s3939_s28 }
 0x22a   : > { %v1899_v58 = vadd.f32 %v1897_v42, %v1889_v6  ;;  %v5467_v13 = vpop.permute.xlu2 %2032  ;;  %v1986_v6 = vmul.f32 %v1985_v19, %v5132_v41 }
 0x22b   : > { %v1929_v57 = vpop.permute.xlu1 %1928 }
 0x22c   : > { %v1919_v62 = vpop.permute.xlu0 %1918  ;;  %v1903_v16 = vadd.f32 %v1902_v20, %v1899_v58  ;;  %v1930_v43 = vrot.slane %v1929_v57, 1 }
 0x22d   : > { %v1920_v33 = vrot.slane %v1919_v62, 1 }
 0x22e   : > { %v1913_v12 = vadd.f32 %v1911_v60, %v1903_v16  ;;  %v1931_v34 = vsel %vm317_vm2, %v1929_v57, %v1930_v43  ;;  %v2005_v60 = vsel %vm306_vm1, %v5438_v5, %v2004_v21  ;;  %v2034_v5 = vrot.slane %v5467_v13, 1 }
 0x22f   : > { %v1921_v50 = vsel %vm306_vm1, %v1919_v62, %v1920_v33 }
 0x230   : > { %v1923_v63 = vadd.f32 %v1921_v50, %v1913_v12  ;;  %2355 = vrot.lane.b32.xlu2 %v2353_v9, %s3938_s25  ;;  %2345 = vrot.lane.b32.xlu1 %v2343_v47, %s3942_s9  ;;  %v2447_v9 = vmul.f32 %v2446_v29, %v5020_v46  ;;  %v2437_v47 = vmul.f32 %v2436_v24, %v5020_v46  ;;  %v2540_v29 = vstv %s5571_s10  ;;  %s5669_s10 = sld [smem:[#allocation6 + $0x5c]] }
 0x231   : > { %2365 = vrot.lane.b32.xlu0 %v2363_v59, %s3941_s6  ;;  %v2457_v59 = vmul.f32 %v2456_v36, %v5020_v46  ;;  %v2530_v24 = vstv %s5577_s12  ;;  %s5673_s12 = sld [smem:[#allocation6 + $0x2d]] }
 0x232   : > { %v1933_v27 = vadd.f32 %v1931_v34, %v1923_v63  ;;  %v5495_v3 = vpop.permute.xlu2 %2062 }
 0x233   : > { %v1959_v11 = vpop.permute.xlu1 %1958 }
 0x234   : > { %v1949_v26 = vpop.permute.xlu0 %1948  ;;  %v1960_v4 = vrot.slane %v1959_v11, 1  ;;  %v1943_v38 = vadd.f32 %v1941_v17, %v1933_v27  ;;  %v2035_v17 = vsel %vm339_vm4, %v5467_v13, %v2034_v5 }
 0x235   : > { %v1950_v7 = vrot.slane %v1949_v26, 1 }
 0x236   : > { %v1961_v45 = vsel %vm350_vm5, %v1959_v11, %v1960_v4  ;;  %v2476_v11 = vstv %s5525_s26  ;;  %s5622_s26 = sld [smem:[#allocation6 + $0x53]] }
 0x237   : > { %v1951_v55 = vsel %vm339_vm4, %v1949_v26, %v1950_v7 }
 0x238   : > { %v1953_v2 = vadd.f32 %v1951_v55, %v1943_v38  ;;  %2385 = vrot.lane.b32.xlu2 %v2383_v23, %s3940_s30  ;;  %2375 = vrot.lane.b32.xlu1 %v2373_v1, %s3937_s24  ;;  %v2477_v23 = vmul.f32 %v2476_v11, %v5020_v46  ;;  %v2467_v1 = vmul.f32 %v2466_v35, %v5020_v46  ;;  %v2064_v55 = vrot.slane %v5495_v3, 1 }
 0x239   : > { %2395 = vrot.lane.b32.xlu0 %v2393_v48, %s3944_s14  ;;  %v2560_v11 = vstv %s5598_s19  ;;  %s3716_s19 = sld [smem:[#allocation6 + $0x5f]] }
 0x23a   : > { %v1963_v56 = vadd.f32 %v1961_v45, %v1953_v2  ;;  %v5523_v42 = vpop.permute.xlu2 %2096  ;;  %v2487_v2 = vmul.f32 %v2486_v10, %v5020_v46  ;;  %v2069_v45 = vstv %s5546_s7  ;;  %v2065_v40 = vsel %vm372_vm7, %v5495_v3, %v2064_v55  ;;  %s5644_s7 = sld [smem:[#allocation6 + $0x56]] }
 0x23b   : > { %v1993_v61 = vpop.permute.xlu1 %1992  ;;  %v2070_v32 = vmul.f32 %v2069_v45, %v5236_v54  ;;  %v2511_v3 = vmul.f32 %v2510_v53, %v5132_v41  ;;  %v2098_v21 = vrot.slane %v5523_v42, 1 }
 0x23c   : > { %v1979_v28 = vpop.permute.xlu0 %1978  ;;  %v1973_v14 = vadd.f32 %v1971_v49, %v1963_v56  ;;  %v1994_v0 = vrot.slane %v1993_v61, 1  ;;  %v2594_v53 = vstv %s5622_s26  ;;  %s5708_s26 = sld [smem:[#allocation6 + $0x65]] }
 0x23d   : > { %v1980_v22 = vrot.slane %v1979_v28, 1  ;;  %v2099_v36 = vsel %vm317_vm2, %v5523_v42, %v2098_v21 }
 0x23e   : > { %v1995_v20 = vsel %vm295_vm0, %v1993_v61, %v1994_v0 }
 0x23f   : > { %v1981_v30 = vsel %vm372_vm7, %v1979_v28, %v1980_v22  ;;  %v2500_v28 = vstv %s5552_s15  ;;  %v2520_v22 = vstv %s5557_s16  ;;  %s5662_s15 = sld [smem:[#allocation6 + $0x59]] }
 0x240   : > { %v1983_v8 = vadd.f32 %v1981_v30, %v1973_v14  ;;  %2419 = vrot.lane.b32.xlu2 %v2417_v39, %s3939_s28  ;;  %2405 = vrot.lane.b32.xlu1 %v2403_v15, %s3943_s11  ;;  %v2501_v30 = vmul.f32 %v2500_v28, %v5132_v41  ;;  %s5666_s16 = sld [smem:[#allocation6 + $0x5b]] }
 0x241   : > { %2429 = vrot.lane.b32.xlu0 %v2427_v51, %s3942_s9 }
 0x242   : > { %v1987_v58 = vadd.f32 %v1986_v6, %v1983_v8  ;;  %v5554_v52 = vpop.permute.xlu2 %2126  ;;  %v2521_v6 = vmul.f32 %v2520_v22, %v5132_v41 }
 0x243   : > { %v2023_v57 = vpop.permute.xlu1 %2022  ;;  %v2128_v42 = vrot.slane %v5554_v52, 1 }
 0x244   : > { %v2013_v62 = vpop.permute.xlu0 %2012  ;;  %v1997_v16 = vadd.f32 %v1995_v20, %v1987_v58  ;;  %v2024_v43 = vrot.slane %v2023_v57, 1 }
 0x245   : > { %v2014_v33 = vrot.slane %v2013_v62, 1  ;;  %v2129_v10 = vsel %vm350_vm5, %v5554_v52, %v2128_v42 }
 0x246   : > { %v2007_v12 = vadd.f32 %v2005_v60, %v1997_v16  ;;  %v2025_v31 = vsel %vm328_vm3, %v2023_v57, %v2024_v43  ;;  %v2550_v16 = vstv %s5581_s13  ;;  %s3715_s13 = sld [smem:[#allocation6 + $0x5e]] }
 0x247   : > { %v2015_v50 = vsel %vm317_vm2, %v2013_v62, %v2014_v33 }
 0x248   : > { %v2017_v63 = vadd.f32 %v2015_v50, %v2007_v12  ;;  %2449 = vrot.lane.b32.xlu2 %v2447_v9, %s3941_s6  ;;  %2439 = vrot.lane.b32.xlu1 %v2437_v47, %s3938_s25  ;;  %v2541_v12 = vmul.f32 %v2540_v29, %v5132_v41  ;;  %v2531_v9 = vmul.f32 %v2530_v24, %v5132_v41  ;;  %v2624_v29 = vstv %s5644_s7  ;;  %s5718_s7 = sld [smem:[#allocation6 + $0x36]] }
 0x249   : > { %2459 = vrot.lane.b32.xlu0 %v2457_v59, %s3937_s24  ;;  %v2551_v50 = vmul.f32 %v2550_v16, %v5132_v41 }
 0x24a   : > { %v2027_v34 = vadd.f32 %v2025_v31, %v2017_v63  ;;  %v5583_v15 = vpop.permute.xlu2 %2160 }
 0x24b   : > { %v2053_v27 = vpop.permute.xlu1 %2052  ;;  %v2162_v52 = vrot.slane %v5583_v15, 1 }
 0x24c   : > { %v2043_v26 = vpop.permute.xlu0 %2042  ;;  %v2054_v4 = vrot.slane %v2053_v27, 1  ;;  %v2037_v38 = vadd.f32 %v2035_v17, %v2027_v34 }
 0x24d   : > { %v2044_v7 = vrot.slane %v2043_v26, 1 }
 0x24e   : > { %v2055_v13 = vsel %vm361_vm6, %v2053_v27, %v2054_v4  ;;  %v2570_v27 = vstv %s5594_s17  ;;  %s3714_s17 = sld [smem:[#allocation6 + $0x5d]] }
 0x24f   : > { %v2045_v48 = vsel %vm350_vm5, %v2043_v26, %v2044_v7  ;;  %v2584_v26 = vstv %s5601_s21  ;;  %s3718_s21 = sld [smem:[#allocation6 + $0x61]] }
 0x250   : > { %v2047_v37 = vadd.f32 %v2045_v48, %v2037_v38  ;;  %2479 = vrot.lane.b32.xlu2 %v2477_v23, %s3944_s14  ;;  %2469 = vrot.lane.b32.xlu1 %v2467_v1, %s3940_s30  ;;  %v2571_v38 = vmul.f32 %v2570_v27, %v5132_v41  ;;  %v2561_v23 = vmul.f32 %v2560_v11, %v5132_v41  ;;  %v2153_v48 = vstv %s5609_s20  ;;  %s3717_s20 = sld [smem:[#allocation6 + $0x60]] }
 0x251   : > { %2489 = vrot.lane.b32.xlu0 %v2487_v2, %s3943_s11  ;;  %v2585_v55 = vmul.f32 %v2584_v26, %v5236_v54  ;;  %v2678_v11 = vstv %s5669_s10  ;;  %s5739_s10 = sld [smem:[#allocation6 + $0x69]] }
 0x252   : > { %v2057_v56 = vadd.f32 %v2055_v13, %v2047_v37  ;;  %v5611_v59 = vpop.permute.xlu2 %2190 }
 0x253   : > { %v2087_v61 = vpop.permute.xlu1 %2086 }
 0x254   : > { %v2077_v49 = vpop.permute.xlu0 %2076  ;;  %v2067_v19 = vadd.f32 %v2065_v40, %v2057_v56  ;;  %v2088_v14 = vrot.slane %v2087_v61, 1  ;;  %v2604_v40 = vstv %s5618_s23  ;;  %s3719_s23 = sld [smem:[#allocation6 + $0x62]] }
 0x255   : > { %v2078_v39 = vrot.slane %v2077_v49, 1 }
 0x256   : > { %v2071_v0 = vadd.f32 %v2070_v32, %v2067_v19  ;;  %v2089_v58 = vsel %vm306_vm1, %v2087_v61, %v2088_v14  ;;  %v2154_v61 = vmul.f32 %v2153_v48, %v5300_v18  ;;  %v2163_v19 = vsel %vm295_vm0, %v5583_v15, %v2162_v52 }
 0x257   : > { %v2079_v51 = vsel %vm295_vm0, %v2077_v49, %v2078_v39  ;;  %v2614_v49 = vstv %s5625_s27  ;;  %v2192_v15 = vrot.slane %v5611_v59, 1  ;;  %v2698_v52 = vstv %s3715_s13  ;;  %s5711_s27 = sld [smem:[#allocation6 + $0x64]] }
 0x258   : > { %v2081_v8 = vadd.f32 %v2079_v51, %v2071_v0  ;;  %2513 = vrot.lane.b32.xlu2 %v2511_v3, %s3942_s9  ;;  %2503 = vrot.lane.b32.xlu1 %v2501_v30, %s3939_s28  ;;  %v2605_v0 = vmul.f32 %v2604_v40, %v5236_v54  ;;  %v2595_v3 = vmul.f32 %v2594_v53, %v5236_v54  ;;  %s5761_s13 = sld [smem:[#allocation6 + $0x6a]] }
 0x259   : > { %2523 = vrot.lane.b32.xlu0 %v2521_v6, %s3938_s25  ;;  %v2615_v51 = vmul.f32 %v2614_v49, %v5236_v54  ;;  %v2193_v16 = vsel %vm328_vm3, %v5611_v59, %v2192_v15 }
 0x25a   : > { %v2091_v57 = vadd.f32 %v2089_v58, %v2081_v8  ;;  %v2221_v13 = vpop.permute.xlu2 %2220 }
 0x25b   : > { %v2117_v20 = vpop.permute.xlu1 %2116  ;;  %v2222_v59 = vrot.slane %v2221_v13, 1 }
 0x25c   : > { %v2107_v62 = vpop.permute.xlu0 %2106  ;;  %v2118_v60 = vrot.slane %v2117_v20, 1  ;;  %v2101_v33 = vadd.f32 %v2099_v36, %v2091_v57 }
 0x25d   : > { %v2108_v43 = vrot.slane %v2107_v62, 1 }
 0x25e   : > { %v2119_v5 = vsel %vm339_vm4, %v2117_v20, %v2118_v60  ;;  %v2634_v20 = vstv %s5640_s29  ;;  %s5713_s29 = sld [smem:[#allocation6 + $0x66]] }
 0x25f   : > { %v2109_v47 = vsel %vm328_vm3, %v2107_v62, %v2108_v43  ;;  %v2644_v62 = vstv %s5647_s8  ;;  %s5725_s8 = sld [smem:[#allocation7 + $0x1]] }
 0x260   : > { %v2111_v63 = vadd.f32 %v2109_v47, %v2101_v33  ;;  %2543 = vrot.lane.b32.xlu2 %v2541_v12, %s3937_s24  ;;  %2533 = vrot.lane.b32.xlu1 %v2531_v9, %s3941_s6  ;;  %v2635_v33 = vmul.f32 %v2634_v20, %v5236_v54  ;;  %v2625_v12 = vmul.f32 %v2624_v29, %v5236_v54 }
 0x261   : > { %2553 = vrot.lane.b32.xlu0 %v2551_v50, %s3940_s30  ;;  %v2645_v47 = vmul.f32 %v2644_v62, %v5236_v54 }
 0x262   : > { %v2121_v31 = vadd.f32 %v2119_v5, %v2111_v63 }
 0x263   : > { %v2147_v34 = vpop.permute.xlu1 %2146 }
 0x264   : > { %v2137_v35 = vpop.permute.xlu0 %2136  ;;  %v2148_v17 = vrot.slane %v2147_v34, 1  ;;  %v2131_v7 = vadd.f32 %v2129_v10, %v2121_v31  ;;  %v2668_v31 = vstv %s5666_s16  ;;  %v2237_v10 = vstv %s5673_s12  ;;  %s5733_s16 = sld [smem:[#allocation6 + $0x67]] }
 0x265   : > { %v2138_v4 = vrot.slane %v2137_v35, 1  ;;  %s5757_s12 = sld [smem:[#allocation6 + $0x6d]] }
 0x266   : > { %v2149_v37 = vsel %vm372_vm7, %v2147_v34, %v2148_v17  ;;  %v2654_v34 = vstv %s5662_s15  ;;  %s5728_s15 = sld [smem:[#allocation6 + $0x68]] }
 0x267   : > { %v2139_v1 = vsel %vm361_vm6, %v2137_v35, %v2138_v4  ;;  %v2223_v35 = vsel %vm361_vm6, %v2221_v13, %v2222_v59  ;;  %v2669_v4 = vmul.f32 %v2668_v31, %v5300_v18  ;;  %v2708_v13 = vstv %s3716_s19  ;;  %s5765_s19 = sld [smem:[#allocation6 + $0x6e]] }
 0x268   : > { %v2141_v2 = vadd.f32 %v2139_v1, %v2131_v7  ;;  %2573 = vrot.lane.b32.xlu2 %v2571_v38, %s3943_s11  ;;  %2563 = vrot.lane.b32.xlu1 %v2561_v23, %s3944_s14  ;;  %v2655_v7 = vmul.f32 %v2654_v34, %v5236_v54  ;;  %v2679_v23 = vmul.f32 %v2678_v11, %v5300_v18  ;;  %v2326_v11 = vstv %s5725_s8  ;;  %s5820_s8 = sld [smem:[#allocation6 + $0x72]] }
 0x269   : > { %2587 = vrot.lane.b32.xlu0 %v2585_v55, %s3939_s28  ;;  %v2238_v55 = vmul.f32 %v2237_v10, %v5395_v25 }
 0x26a   : > { %v2151_v45 = vadd.f32 %v2149_v37, %v2141_v2  ;;  %v2688_v37 = vstv %s3714_s17  ;;  %s3788_s17 = sshll.u32 %s6312_s22, 3 }
 0x26b   : > { %v2181_v56 = vpop.permute.xlu1 %2180  ;;  %s5776_s22 = scalar_lea.vmem %s6241_s5, %s3788_s17  ;;  %s5866_s17 = sld [smem:[#allocation6 + $0x79]] }
 0x26c   : > { %v2171_v28 = vpop.permute.xlu0 %2170  ;;  %v2155_v32 = vadd.f32 %v2154_v61, %v2151_v45  ;;  %v2182_v22 = vrot.slane %v2181_v56, 1  ;;  %v2699_v45 = vmul.f32 %v2698_v52, %v5300_v18  ;;  %v2709_v61 = vmul.f32 %v2708_v13, %v5300_v18 }
 0x26d   : > { %v2172_v14 = vrot.slane %v2171_v28, 1 }
 0x26e   : > { %v2165_v39 = vadd.f32 %v2163_v19, %v2155_v32  ;;  %v2183_v8 = vsel %vm317_vm2, %v2181_v56, %v2182_v22  ;;  %v2689_v56 = vmul.f32 %v2688_v37, %v5300_v18  ;;  %v2728_v19 = vstv %s3718_s21  ;;  %s5877_s21 = sld [smem:[#allocation6 + $0x48]] }
 0x26f   : > { %v2173_v30 = vsel %vm306_vm1, %v2171_v28, %v2172_v14  ;;  %v2718_v22 = vstv %s3717_s20  ;;  %v2738_v14 = vstv %s3719_s23  ;;  %s5791_s23 = sld [smem:[#allocation6 + $0x70]] }
 0x270   : > { %v2175_v6 = vadd.f32 %v2173_v30, %v2165_v39  ;;  %2607 = vrot.lane.b32.xlu2 %v2605_v0, %s3938_s25  ;;  %2597 = vrot.lane.b32.xlu1 %v2595_v3, %s3942_s9  ;;  %v2729_v3 = vmul.f32 %v2728_v19, %v5300_v18  ;;  %v2719_v30 = vmul.f32 %v2718_v22, %v5300_v18  ;;  %s5885_s20 = sld [smem:[#allocation6 + $0x7d]] }
 0x271   : > { %2617 = vrot.lane.b32.xlu0 %v2615_v51, %s3941_s6  ;;  %v2739_v15 = vmul.f32 %v2738_v14, %v5300_v18 }
 0x272   : > { %v2185_v21 = vadd.f32 %v2183_v8, %v2175_v6  ;;  %v5660_v58 = vpop.permute.xlu2 %2254 }
 0x273   : > { %v2211_v57 = vpop.permute.xlu1 %2210  ;;  %v2256_v28 = vrot.slane %v5660_v58, 1 }
 0x274   : > { %v2201_v24 = vpop.permute.xlu0 %2200  ;;  %v2212_v36 = vrot.slane %v2211_v57, 1  ;;  %v2195_v43 = vadd.f32 %v2193_v16, %v2185_v21  ;;  %v2752_v16 = vstv %s5711_s27  ;;  %s5799_s27 = sld [smem:[#allocation6 + $0x71]] }
 0x275   : > { %v2202_v60 = vrot.slane %v2201_v24, 1  ;;  %v2257_v51 = vsel %vm306_vm1, %v5660_v58, %v2256_v28 }
 0x276   : > { %v2213_v63 = vsel %vm350_vm5, %v2211_v57, %v2212_v36  ;;  %v2762_v57 = vstv %s5708_s26  ;;  %s5796_s26 = sld [smem:[#allocation6 + $0x6f]] }
 0x277   : > { %v2203_v9 = vsel %vm339_vm4, %v2201_v24, %v2202_v60  ;;  %v2772_v60 = vstv %s5713_s29  ;;  %s5811_s29 = sld [smem:[#allocation6 + $0x3f]] }
 0x278   : > { %v2205_v50 = vadd.f32 %v2203_v9, %v2195_v43  ;;  %2637 = vrot.lane.b32.xlu2 %v2635_v33, %s3940_s30  ;;  %2627 = vrot.lane.b32.xlu1 %v2625_v12, %s3937_s24  ;;  %v2763_v12 = vmul.f32 %v2762_v57, %v5395_v25  ;;  %v2753_v9 = vmul.f32 %v2752_v16, %v5395_v25 }
 0x279   : > { %2647 = vrot.lane.b32.xlu0 %v2645_v47, %s3944_s14  ;;  %v2328_v47 = vstv %s5718_s7  ;;  %s5815_s7 = sld [smem:[#allocation6 + $0x73]] }
 0x27a   : > { %v2215_v42 = vadd.f32 %v2213_v63, %v2205_v50  ;;  %v5683_v5 = vpop.permute.xlu2 %2284  ;;  %v2773_v63 = vmul.f32 %v2772_v60, %v5395_v25  ;;  %v2329_v31 = vmul.f32 %v2328_v47, %v4904_v44 }
 0x27b   : > { %v2286_v20 = vrot.slane %v5683_v5, 1 }
 0x27c   : > { %v2231_v27 = vpop.permute.xlu0 %2230  ;;  %v2225_v17 = vadd.f32 %v2223_v35, %v2215_v42  ;;  %v2792_v35 = vstv %s5728_s15  ;;  %s5823_s15 = sld [smem:[#allocation6 + $0x74]] }
 0x27d   : > { %v2232_v26 = vrot.slane %v2231_v27, 1  ;;  %v2287_v50 = vsel %vm339_vm4, %v5683_v5, %v2286_v20  ;;  %v2782_v5 = vstv %s5733_s16  ;;  %v2793_v13 = vmul.f32 %v2792_v35, %v5395_v25  ;;  %s5837_s16 = sld [smem:[#allocation6 + $0x77]] }
 0x27f   : > { %v2233_v38 = vsel %vm372_vm7, %v2231_v27, %v2232_v26 }
 0x280   : > { %v2235_v1 = vadd.f32 %v2233_v38, %v2225_v17  ;;  %2671 = vrot.lane.b32.xlu2 %v2669_v4, %s3939_s28  ;;  %2657 = vrot.lane.b32.xlu1 %v2655_v7, %s3943_s11  ;;  %v2320_v17 = vlaneseq }
 0x281   : > { %2681 = vrot.lane.b32.xlu0 %v2679_v23, %s3942_s9 }
 0x282   : > { %v5698_v48 = vpop.permute.xlu2 %2314  ;;  %v2239_v2 = vadd.f32 %v2238_v55, %v2235_v1  ;;  %v2802_v1 = vstv %s5739_s10  ;;  %vm5778_vm8 = vcmp.lt.s32.totalorder %v2320_v17, 256  ;;  %s5842_s10 = sld [smem:[#allocation6 + $0x76]] }
 0x283   : > { %v2316_v26 = vrot.slane %v5698_v48, 1  ;;  %v2803_v28 = vmul.f32 %v2802_v1, %v5395_v25 }
 0x288   : > { %2701 = vrot.lane.b32.xlu2 %v2699_v45, %s3941_s6  ;;  %2691 = vrot.lane.b32.xlu1 %v2689_v56, %s3938_s25  ;;  %v2783_v45 = vmul.f32 %v2782_v5, %v5395_v25  ;;  %v2317_v56 = vsel %vm372_vm7, %v5698_v48, %v2316_v26 }
 0x289   : > { %2711 = vrot.lane.b32.xlu0 %v2709_v61, %s3937_s24 }
 0x28a   : > { %v5706_v40 = vpop.permute.xlu2 %2355  ;;  %v2245_v53 = vpop.permute.xlu1 %2244 }
 0x28b   : > { %v2246_v32 = vrot.slane %v2245_v53, 1  ;;  %v2265_v49 = vpop.permute.xlu0 %2264  ;;  %v2357_v19 = vrot.slane %v5706_v40, 1 }
 0x28c   : > { %v2266_v6 = vrot.slane %v2265_v49, 1 }
 0x28d   : > { %v2247_v39 = vsel %vm295_vm0, %v2245_v53, %v2246_v32 }
 0x28e   : > { %v2249_v0 = vadd.f32 %v2247_v39, %v2239_v2  ;;  %v2267_v29 = vsel %vm317_vm2, %v2265_v49, %v2266_v6  ;;  %v2330_v2 = vadd.f32 %v2329_v31, %v2326_v11  ;;  %v2840_v39 = vstv %s5757_s12  ;;  %s5845_s12 = sld [smem:[#allocation6 + $0x78]] }
 0x290   : > { %v2259_v8 = vadd.f32 %v2257_v51, %v2249_v0  ;;  %2731 = vrot.lane.b32.xlu2 %v2729_v3, %s3944_s14  ;;  %2721 = vrot.lane.b32.xlu1 %v2719_v30, %s3940_s30  ;;  %v2812_v0 = vstv %s5761_s13  ;;  %v2850_v3 = vstv %s5765_s19  ;;  %s5861_s13 = sld [smem:[#allocation6 + $0x7a]] }
 0x291   : > { %2741 = vrot.lane.b32.xlu0 %v2739_v15, %s3943_s11  ;;  %v2841_v15 = vmul.f32 %v2840_v39, %v4904_v44  ;;  %v2851_v57 = vmul.f32 %v2850_v3, %v4904_v44  ;;  %v2924_v3 = vstv %s5842_s10  ;;  %s5869_s19 = sld [smem:[#allocation6 + $0x7b]] }
 0x292   : > { %v5730_v21 = vpop.permute.xlu2 %2385  ;;  %v2275_v58 = vpop.permute.xlu1 %2274  ;;  %v2269_v36 = vadd.f32 %v2267_v29, %v2259_v8  ;;  %v2813_v8 = vmul.f32 %v2812_v0, %v5395_v25  ;;  %s5942_s10 = sld [smem:[#allocation6 + $0x51]] }
 0x293   : > { %v2276_v24 = vrot.slane %v2275_v58, 1  ;;  %v2295_v62 = vpop.permute.xlu0 %2294 }
 0x294   : > { %v2296_v59 = vrot.slane %v2295_v62, 1 }
 0x295   : > { %v2277_v43 = vsel %vm328_vm3, %v2275_v58, %v2276_v24  ;;  %v2358_v58 = vsel %vm317_vm2, %v5706_v40, %v2357_v19  ;;  %v2387_v40 = vrot.slane %v5730_v21, 1  ;;  %v2934_v19 = vstv %s5837_s16  ;;  %s5939_s16 = sld [smem:[#allocation6 + $0x85]] }
 0x296   : > { %v2279_v33 = vadd.f32 %v2277_v43, %v2269_v36  ;;  %v2297_v10 = vsel %vm350_vm5, %v2295_v62, %v2296_v59  ;;  %v2870_v43 = vstv %s5791_s23  ;;  %s5890_s23 = sld [smem:[#allocation6 + $0x7c]] }
 0x297   : > { %v2871_v59 = vmul.f32 %v2870_v43, %v4904_v44 }
 0x298   : > { %v2289_v42 = vadd.f32 %v2287_v50, %v2279_v33  ;;  %2765 = vrot.lane.b32.xlu2 %v2763_v12, %s3942_s9  ;;  %2755 = vrot.lane.b32.xlu1 %v2753_v9, %s3939_s28  ;;  %v2860_v33 = vstv %s5796_s26  ;;  %v2880_v12 = vstv %s5799_s27  ;;  %s5893_s26 = sld [smem:[#allocation6 + $0x7f]] }
 0x299   : > { %2775 = vrot.lane.b32.xlu0 %v2773_v63, %s3938_s25  ;;  %v2861_v63 = vmul.f32 %v2860_v33, %v4904_v44  ;;  %v2881_v31 = vmul.f32 %v2880_v12, %v4904_v44  ;;  %v2964_v33 = vstv %s5861_s13  ;;  %v2954_v12 = vstv %s5866_s17  ;;  %s5909_s27 = sld [smem:[#allocation6 + $0x81]] }
 0x29a   : > { %v5752_v34 = vpop.permute.xlu2 %2419  ;;  %v2305_v27 = vpop.permute.xlu1 %2304  ;;  %v2299_v38 = vadd.f32 %v2297_v10, %v2289_v42  ;;  %v2388_v42 = vsel %vm350_vm5, %v5730_v21, %v2387_v40  ;;  %v2412_v10 = vstv %s5811_s29  ;;  %s5914_s29 = sld [smem:[#allocation6 + $0x80]] }
 0x29b   : > { %v2306_v4 = vrot.slane %v2305_v27, 1  ;;  %v2336_v7 = vpop.permute.xlu0 %2335  ;;  %s5960_s13 = sld [smem:[#allocation6 + $0x88]] }
 0x29c   : > { %v2337_v23 = vrot.slane %v2336_v7, 1  ;;  %s5963_s17 = sld [smem:[#allocation6 + $0x89]] }
 0x29d   : > { %v2307_v55 = vsel %vm361_vm6, %v2305_v27, %v2306_v4  ;;  %v2900_v4 = vstv %s5815_s7  ;;  %s5917_s7 = sld [smem:[#allocation6 + $0x82]] }
 0x29e   : > { %v2309_v52 = vadd.f32 %v2307_v55, %v2299_v38  ;;  %v2338_v37 = vsel %vm295_vm0, %v2336_v7, %v2337_v23  ;;  %v2890_v7 = vstv %s5820_s8  ;;  %v2910_v38 = vstv %s5823_s15  ;;  %s5931_s8 = sld [smem:[#allocation6 + $0x84]] }
 0x29f   : > { %v2340_v53 = vadd.f32 %v2338_v37, %v2330_v2  ;;  %v2421_v23 = vrot.slane %v5752_v34, 1  ;;  %v2413_v55 = vmul.f32 %v2412_v10, %v5020_v46  ;;  %v2891_v37 = vmul.f32 %v2890_v7, %v4904_v44  ;;  %s5936_s15 = sld [smem:[#allocation6 + $0x83]] }
 0x2a0   : > { %v2319_v32 = vadd.f32 %v2317_v56, %v2309_v52  ;;  %2795 = vrot.lane.b32.xlu2 %v2793_v13, %s3937_s24  ;;  %2785 = vrot.lane.b32.xlu1 %v2783_v45, %s3941_s6  ;;  %v2901_v52 = vmul.f32 %v2900_v4, %v4904_v44  ;;  %v2911_v45 = vmul.f32 %v2910_v38, %v4904_v44 }
 0x2a1   : > { %2805 = vrot.lane.b32.xlu0 %v2803_v28, %s3940_s30 }
 0x2a2   : > { %2324 = vst.msk [vmem:[%s5776_s22] ss:$4 sm:$0x3] %vm5778_vm8, %v2319_v32  ;;  %v5789_v48 = vpop.permute.xlu2 %2449  ;;  %v2346_v49 = vpop.permute.xlu1 %2345 }
 0x2a3   : > { %v2347_v22 = vrot.slane %v2346_v49, 1  ;;  %v2366_v14 = vpop.permute.xlu0 %2365 }
 0x2a4   : > { %v2367_v51 = vrot.slane %v2366_v14, 1 }
 0x2a5   : > { %v2348_v30 = vsel %vm306_vm1, %v2346_v49, %v2347_v22  ;;  %v2451_v22 = vrot.slane %v5789_v48, 1 }
 0x2a6   : > { %v2350_v6 = vadd.f32 %v2348_v30, %v2340_v53  ;;  %v2368_v29 = vsel %vm328_vm3, %v2366_v14, %v2367_v51  ;;  %v2422_v53 = vsel %vm295_vm0, %v5752_v34, %v2421_v23  ;;  %v2944_v34 = vstv %s5845_s12  ;;  %s5955_s12 = sld [smem:[#allocation6 + $0x86]] }
 0x2a7   : > { %v2994_v23 = vstv %s5885_s20  ;;  %s5987_s20 = sld [smem:[#allocation6 + $0x8c]] }
 0x2a8   : > { %v2360_v20 = vadd.f32 %v2358_v58, %v2350_v6  ;;  %2843 = vrot.lane.b32.xlu2 %v2841_v15, %s3939_s28  ;;  %2815 = vrot.lane.b32.xlu1 %v2813_v8, %s3944_s14  ;;  %v2935_v8 = vmul.f32 %v2934_v19, %v5020_v46  ;;  %v2925_v58 = vmul.f32 %v2924_v3, %v5020_v46 }
 0x2a9   : > { %2853 = vrot.lane.b32.xlu0 %v2851_v57, %s3942_s9  ;;  %v2452_v57 = vsel %vm328_vm3, %v5789_v48, %v2451_v22 }
 0x2aa   : > { %v2370_v24 = vadd.f32 %v2368_v29, %v2360_v20  ;;  %v5813_v62 = vpop.permute.xlu2 %2479  ;;  %v2376_v16 = vpop.permute.xlu1 %2375  ;;  %v2945_v20 = vmul.f32 %v2944_v34, %v5020_v46  ;;  %v3018_v34 = vstv %s5914_s29  ;;  %s6009_s29 = sld [smem:[#allocation6 + $0x8f]] }
 0x2ab   : > { %v2377_v36 = vrot.slane %v2376_v16, 1  ;;  %v2396_v60 = vpop.permute.xlu0 %2395  ;;  %v2481_v48 = vrot.slane %v5813_v62, 1 }
 0x2ac   : > { %v2397_v47 = vrot.slane %v2396_v60, 1 }
 0x2ad   : > { %v2378_v9 = vsel %vm339_vm4, %v2376_v16, %v2377_v36 }
 0x2ae   : > { %v2380_v50 = vadd.f32 %v2378_v9, %v2370_v24  ;;  %v2398_v11 = vsel %vm361_vm6, %v2396_v60, %v2397_v47  ;;  %v2974_v9 = vstv %s5869_s19  ;;  %s5979_s19 = sld [smem:[#allocation6 + $0x8b]] }
 0x2b0   : > { %v2390_v27 = vadd.f32 %v2388_v42, %v2380_v50  ;;  %2873 = vrot.lane.b32.xlu2 %v2871_v59, %s3941_s6  ;;  %2863 = vrot.lane.b32.xlu1 %v2861_v63, %s3938_s25  ;;  %v2965_v63 = vmul.f32 %v2964_v33, %v5020_v46  ;;  %v2955_v42 = vmul.f32 %v2954_v12, %v5020_v46  ;;  %v3058_v12 = vstv %s5931_s8  ;;  %s6027_s8 = sld [smem:[#allocation6 + $0x91]] }
 0x2b1   : > { %2883 = vrot.lane.b32.xlu0 %v2881_v31, %s3937_s24  ;;  %v2482_v31 = vsel %vm361_vm6, %v5813_v62, %v2481_v48 }
 0x2b2   : > { %v2400_v35 = vadd.f32 %v2398_v11, %v2390_v27  ;;  %v5835_v5 = vpop.permute.xlu2 %2513  ;;  %v2406_v26 = vpop.permute.xlu1 %2405  ;;  %v2975_v27 = vmul.f32 %v2974_v9, %v5020_v46  ;;  %v2496_v11 = vstv %s5877_s21  ;;  %v3048_v9 = vstv %s5936_s15  ;;  %s5984_s21 = sld [smem:[#allocation6 + $0x8a]] }
 0x2b3   : > { %v2407_v21 = vrot.slane %v2406_v26, 1  ;;  %v2430_v17 = vpop.permute.xlu0 %2429  ;;  %v2497_v62 = vmul.f32 %v2496_v11, %v5132_v41  ;;  %v2515_v4 = vrot.slane %v5835_v5, 1  ;;  %s6030_s15 = sld [smem:[#allocation6 + $0x93]] }
 0x2b4   : > { %v2431_v13 = vrot.slane %v2430_v17, 1 }
 0x2b5   : > { %v2408_v1 = vsel %vm372_vm7, %v2406_v26, %v2407_v21 }
 0x2b6   : > { %v2410_v2 = vadd.f32 %v2408_v1, %v2400_v35  ;;  %v2432_v14 = vsel %vm306_vm1, %v2430_v17, %v2431_v13  ;;  %v2984_v1 = vstv %s5890_s23  ;;  %s5999_s23 = sld [smem:[#allocation6 + $0x8e]] }
 0x2b8   : > { %v2414_v56 = vadd.f32 %v2413_v55, %v2410_v2  ;;  %2903 = vrot.lane.b32.xlu2 %v2901_v52, %s3944_s14  ;;  %2893 = vrot.lane.b32.xlu1 %v2891_v37, %s3940_s30  ;;  %v3008_v2 = vstv %s5893_s26  ;;  %s6003_s26 = sld [smem:[#allocation6 + $0x8d]] }
 0x2b9   : > { %2913 = vrot.lane.b32.xlu0 %v2911_v45, %s3943_s11  ;;  %v2995_v45 = vmul.f32 %v2994_v23, %v5020_v46 }
 0x2ba   : > { %v2424_v28 = vadd.f32 %v2422_v53, %v2414_v56  ;;  %v5858_v32 = vpop.permute.xlu2 %2543  ;;  %v2440_v49 = vpop.permute.xlu1 %2439  ;;  %v2985_v56 = vmul.f32 %v2984_v1, %v5020_v46  ;;  %v2516_v53 = vsel %vm306_vm1, %v5835_v5, %v2515_v4 }
 0x2bb   : > { %v2441_v39 = vrot.slane %v2440_v49, 1  ;;  %v2460_v0 = vpop.permute.xlu0 %2459  ;;  %v2545_v5 = vrot.slane %v5858_v32, 1 }
 0x2bc   : > { %v2434_v30 = vadd.f32 %v2432_v14, %v2424_v28  ;;  %v2461_v6 = vrot.slane %v2460_v0, 1  ;;  %v3009_v28 = vmul.f32 %v3008_v2, %v5132_v41 }
 0x2bd   : > { %v2442_v51 = vsel %vm317_vm2, %v2440_v49, %v2441_v39 }
 0x2be   : > { %v2444_v15 = vadd.f32 %v2442_v51, %v2434_v30  ;;  %v2462_v24 = vsel %vm339_vm4, %v2460_v0, %v2461_v6  ;;  %v3028_v30 = vstv %s5909_s27  ;;  %v3038_v51 = vstv %s5917_s7  ;;  %s3711_s27 = sld [smem:[#allocation6 + $0x5a]] }
 0x2bf   : > { %s6023_s7 = sld [smem:[#allocation6 + $0x92]] }
 0x2c0   : > { %v2454_v29 = vadd.f32 %v2452_v57, %v2444_v15  ;;  %2937 = vrot.lane.b32.xlu2 %v2935_v8, %s3942_s9  ;;  %2927 = vrot.lane.b32.xlu1 %v2925_v58, %s3939_s28  ;;  %v3029_v58 = vmul.f32 %v3028_v30, %v5132_v41  ;;  %v3019_v57 = vmul.f32 %v3018_v34, %v5132_v41  ;;  %v3122_v34 = vstv %s5979_s19  ;;  %s6075_s19 = sld [smem:[#allocation6 + $0x97]] }
 0x2c1   : > { %2947 = vrot.lane.b32.xlu0 %v2945_v20, %s3938_s25  ;;  %v2546_v20 = vsel %vm339_vm4, %v5858_v32, %v2545_v5 }
 0x2c2   : > { %v2464_v16 = vadd.f32 %v2462_v24, %v2454_v29  ;;  %v5883_v40 = vpop.permute.xlu2 %2573  ;;  %v2470_v36 = vpop.permute.xlu1 %2469  ;;  %v3039_v29 = vmul.f32 %v3038_v51, %v5132_v41  ;;  %v3112_v51 = vstv %s5984_s21  ;;  %s6078_s21 = sld [smem:[#allocation6 + $0x9a]] }
 0x2c3   : > { %v2471_v60 = vrot.slane %v2470_v36, 1  ;;  %v2490_v43 = vpop.permute.xlu0 %2489  ;;  %v2575_v32 = vrot.slane %v5883_v40, 1 }
 0x2c4   : > { %v2491_v50 = vrot.slane %v2490_v43, 1 }
 0x2c5   : > { %v2472_v47 = vsel %vm350_vm5, %v2470_v36, %v2471_v60 }
 0x2c6   : > { %v2474_v59 = vadd.f32 %v2472_v47, %v2464_v16  ;;  %v2492_v26 = vsel %vm372_vm7, %v2490_v43, %v2491_v50  ;;  %v3068_v47 = vstv %s5939_s16  ;;  %s6046_s16 = sld [smem:[#allocation6 + $0x95]] }
 0x2c8   : > { %v2484_v35 = vadd.f32 %v2482_v31, %v2474_v59  ;;  %2967 = vrot.lane.b32.xlu2 %v2965_v63, %s3937_s24  ;;  %2957 = vrot.lane.b32.xlu1 %v2955_v42, %s3941_s6  ;;  %v2580_v59 = vstv %s5942_s10  ;;  %v3059_v42 = vmul.f32 %v3058_v12, %v5132_v41  ;;  %v3049_v31 = vmul.f32 %v3048_v9, %v5132_v41  ;;  %s6051_s10 = sld [smem:[#allocation6 + $0x94]] }
 0x2c9   : > { %2977 = vrot.lane.b32.xlu0 %v2975_v27, %s3940_s30  ;;  %v2576_v27 = vsel %vm372_vm7, %v5883_v40, %v2575_v32  ;;  %v3152_v9 = vstv %s5999_s23  ;;  %s6099_s23 = sld [smem:[#allocation6 + $0x9b]] }
 0x2ca   : > { %v2494_v10 = vadd.f32 %v2492_v26, %v2484_v35  ;;  %v5906_v21 = vpop.permute.xlu2 %2607  ;;  %v2504_v17 = vpop.permute.xlu1 %2503  ;;  %v3069_v35 = vmul.f32 %v3068_v47, %v5132_v41  ;;  %v3142_v47 = vstv %s6003_s26  ;;  %s6102_s26 = sld [smem:[#allocation6 + $0x9d]] }
 0x2cb   : > { %v2505_v7 = vrot.slane %v2504_v17, 1  ;;  %v2524_v38 = vpop.permute.xlu0 %2523  ;;  %v2609_v40 = vrot.slane %v5906_v21, 1 }
 0x2cc   : > { %v2498_v55 = vadd.f32 %v2497_v62, %v2494_v10  ;;  %v2525_v37 = vrot.slane %v2524_v38, 1  ;;  %v2581_v10 = vmul.f32 %v2580_v59, %v5236_v54 }
 0x2cd   : > { %v2506_v52 = vsel %vm295_vm0, %v2504_v17, %v2505_v7  ;;  %v3078_v7 = vstv %s5955_s12  ;;  %s6054_s12 = sld [smem:[#allocation6 + $0x96]] }
 0x2ce   : > { %v2508_v13 = vadd.f32 %v2506_v52, %v2498_v55  ;;  %v2526_v19 = vsel %vm317_vm2, %v2524_v38, %v2525_v37  ;;  %v3092_v55 = vstv %s5960_s13  ;;  %v3102_v52 = vstv %s5963_s17  ;;  %s6062_s13 = sld [smem:[#allocation6 + $0x63]] }
 0x2cf   : > { %s6070_s17 = sld [smem:[#allocation6 + $0x98]] }
 0x2d0   : > { %v2518_v49 = vadd.f32 %v2516_v53, %v2508_v13  ;;  %2997 = vrot.lane.b32.xlu2 %v2995_v45, %s3943_s11  ;;  %2987 = vrot.lane.b32.xlu1 %v2985_v56, %s3944_s14  ;;  %v3093_v56 = vmul.f32 %v3092_v55, %v5236_v54  ;;  %v3079_v53 = vmul.f32 %v3078_v7, %v5132_v41 }
 0x2d1   : > { %3011 = vrot.lane.b32.xlu0 %v3009_v28, %s3939_s28  ;;  %v2610_v28 = vsel %vm317_vm2, %v5906_v21, %v2609_v40 }
 0x2d2   : > { %v2528_v22 = vadd.f32 %v2526_v19, %v2518_v49  ;;  %v5929_v14 = vpop.permute.xlu2 %2637  ;;  %v2534_v39 = vpop.permute.xlu1 %2533  ;;  %v3103_v49 = vmul.f32 %v3102_v52, %v5236_v54  ;;  %v3176_v52 = vstv %s6027_s8  ;;  %s6126_s8 = sld [smem:[#allocation6 + $0xa0]] }
 0x2d3   : > { %v2535_v0 = vrot.slane %v2534_v39, 1  ;;  %v2554_v3 = vpop.permute.xlu0 %2553  ;;  %v2639_v21 = vrot.slane %v5929_v14, 1 }
 0x2d4   : > { %v2555_v15 = vrot.slane %v2554_v3, 1 }
 0x2d5   : > { %v2536_v6 = vsel %vm328_vm3, %v2534_v39, %v2535_v0 }
 0x2d6   : > { %v2538_v8 = vadd.f32 %v2536_v6, %v2528_v22  ;;  %v2556_v16 = vsel %vm350_vm5, %v2554_v3, %v2555_v15  ;;  %v3132_v6 = vstv %s5987_s20  ;;  %s6094_s20 = sld [smem:[#allocation6 + $0x9c]] }
 0x2d8   : > { %v2548_v24 = vadd.f32 %v2546_v20, %v2538_v8  ;;  %3031 = vrot.lane.b32.xlu2 %v3029_v58, %s3938_s25  ;;  %3021 = vrot.lane.b32.xlu1 %v3019_v57, %s3942_s9  ;;  %v3123_v57 = vmul.f32 %v3122_v34, %v5236_v54  ;;  %v3113_v20 = vmul.f32 %v3112_v51, %v5236_v54  ;;  %v3216_v51 = vstv %s6046_s16 }
 0x2d9   : > { %3041 = vrot.lane.b32.xlu0 %v3039_v29, %s3941_s6  ;;  %v2640_v29 = vsel %vm350_vm5, %v5929_v14, %v2639_v21 }
 0x2da   : > { %v2558_v36 = vadd.f32 %v2556_v16, %v2548_v24  ;;  %v5953_v48 = vpop.permute.xlu2 %2671  ;;  %v2564_v60 = vpop.permute.xlu1 %2563  ;;  %v3133_v24 = vmul.f32 %v3132_v6, %v5236_v54  ;;  %v3206_v6 = vstv %s6051_s10 }
 0x2db   : > { %v2565_v43 = vrot.slane %v2564_v60, 1  ;;  %v2588_v33 = vpop.permute.xlu0 %2587  ;;  %v2673_v59 = vrot.slane %v5953_v48, 1 }
 0x2dc   : > { %v2589_v11 = vrot.slane %v2588_v33, 1 }
 0x2dd   : > { %v2566_v50 = vsel %vm361_vm6, %v2564_v60, %v2565_v43 }
 0x2de   : > { %v2568_v63 = vadd.f32 %v2566_v50, %v2558_v36  ;;  %v2590_v38 = vsel %vm295_vm0, %v2588_v33, %v2589_v11  ;;  %v2664_v33 = vstv %s3711_s27  ;;  %v3162_v50 = vstv %s6009_s29  ;;  %s6112_s27 = sld [smem:[#allocation6 + $0x6c]] }
 0x2df   : > { %v3143_v11 = vmul.f32 %v3142_v47, %v5236_v54  ;;  %s6118_s29 = sld [smem:[#allocation6 + $0x9f]] }
 0x2e0   : > { %v2578_v26 = vadd.f32 %v2576_v27, %v2568_v63  ;;  %3061 = vrot.lane.b32.xlu2 %v3059_v42, %s3940_s30  ;;  %3051 = vrot.lane.b32.xlu1 %v3049_v31, %s3937_s24  ;;  %v2665_v42 = vmul.f32 %v2664_v33, %v5300_v18  ;;  %v3153_v27 = vmul.f32 %v3152_v9, %v5236_v54 }
 0x2e1   : > { %3071 = vrot.lane.b32.xlu0 %v3069_v35, %s3944_s14 }
 0x2e2   : > { %v2582_v62 = vadd.f32 %v2581_v10, %v2578_v26  ;;  %v5976_v17 = vpop.permute.xlu2 %2701  ;;  %v2598_v4 = vpop.permute.xlu1 %2597  ;;  %v3163_v26 = vmul.f32 %v3162_v50, %v5236_v54 }
 0x2e3   : > { %v2599_v23 = vrot.slane %v2598_v4, 1  ;;  %v2618_v1 = vpop.permute.xlu0 %2617 }
 0x2e4   : > { %v2592_v2 = vadd.f32 %v2590_v38, %v2582_v62  ;;  %v2619_v13 = vrot.slane %v2618_v1, 1  ;;  %v2674_v62 = vsel %vm295_vm0, %v5953_v48, %v2673_v59  ;;  %v3186_v38 = vstv %s6023_s7  ;;  %s6123_s7 = sld [smem:[#allocation6 + $0x9e]] }
 0x2e5   : > { %v2600_v37 = vsel %vm306_vm1, %v2598_v4, %v2599_v23  ;;  %v2703_v23 = vrot.slane %v5976_v17, 1  ;;  %v3196_v48 = vstv %s6030_s15  ;;  %v3246_v59 = vstv %s6070_s17  ;;  %s6128_s15 = sld [smem:[#allocation7 + $0x2]] }
 0x2e6   : > { %v2602_v45 = vadd.f32 %v2600_v37, %v2592_v2  ;;  %v2620_v22 = vsel %vm328_vm3, %v2618_v1, %v2619_v13 }
 0x2e8   : > { %v2612_v19 = vadd.f32 %v2610_v28, %v2602_v45  ;;  %3095 = vrot.lane.b32.xlu2 %v3093_v56, %s3939_s28  ;;  %3081 = vrot.lane.b32.xlu1 %v3079_v53, %s3943_s11  ;;  %v3187_v53 = vmul.f32 %v3186_v38, %v5300_v18  ;;  %v3177_v28 = vmul.f32 %v3176_v52, %v5300_v18 }
 0x2e9   : > { %3105 = vrot.lane.b32.xlu0 %v3103_v49, %s3942_s9  ;;  %v2704_v49 = vsel %vm328_vm3, %v5976_v17, %v2703_v23 }
 0x2ea   : > { %v2622_v39 = vadd.f32 %v2620_v22, %v2612_v19  ;;  %v6001_v5 = vpop.permute.xlu2 %2731  ;;  %v2628_v0 = vpop.permute.xlu1 %2627  ;;  %v3197_v19 = vmul.f32 %v3196_v48, %v5300_v18  ;;  %v3270_v48 = vstv %s6099_s23 }
 0x2eb   : > { %v2629_v3 = vrot.slane %v2628_v0, 1  ;;  %v2648_v30 = vpop.permute.xlu0 %2647  ;;  %v2733_v17 = vrot.slane %v6001_v5, 1 }
 0x2ec   : > { %v2649_v8 = vrot.slane %v2648_v30, 1 }
 0x2ed   : > { %v2630_v15 = vsel %vm339_vm4, %v2628_v0, %v2629_v3 }
 0x2ee   : > { %v2632_v58 = vadd.f32 %v2630_v15, %v2622_v39  ;;  %v2650_v36 = vsel %vm361_vm6, %v2648_v30, %v2649_v8  ;;  %v3226_v15 = vstv %s6054_s12 }
 0x2f0   : > { %v2642_v16 = vadd.f32 %v2640_v29, %v2632_v58  ;;  %3125 = vrot.lane.b32.xlu2 %v3123_v57, %s3941_s6  ;;  %3115 = vrot.lane.b32.xlu1 %v3113_v20, %s3938_s25  ;;  %v3217_v20 = vmul.f32 %v3216_v51, %v5300_v18  ;;  %v3207_v29 = vmul.f32 %v3206_v6, %v5300_v18 }
 0x2f1   : > { %3135 = vrot.lane.b32.xlu0 %v3133_v24, %s3937_s24  ;;  %v2734_v24 = vsel %vm361_vm6, %v6001_v5, %v2733_v17 }
 0x2f2   : > { %v2652_v60 = vadd.f32 %v2650_v36, %v2642_v16  ;;  %v6021_v32 = vpop.permute.xlu2 %2765  ;;  %v2658_v43 = vpop.permute.xlu1 %2657  ;;  %v3227_v16 = vmul.f32 %v3226_v15, %v5300_v18  ;;  %v2748_v36 = vstv %s6062_s13  ;;  %v3310_v15 = vstv %s6118_s29 }
 0x2f3   : > { %v2659_v14 = vrot.slane %v2658_v43, 1  ;;  %v2682_v12 = vpop.permute.xlu0 %2681  ;;  %v2749_v5 = vmul.f32 %v2748_v36, %v5395_v25  ;;  %v2767_v9 = vrot.slane %v6021_v32, 1  ;;  %v3311_v36 = vmul.f32 %v3310_v15, %v5395_v25 }
 0x2f4   : > { %v2683_v35 = vrot.slane %v2682_v12, 1 }
 0x2f5   : > { %v2660_v63 = vsel %vm372_vm7, %v2658_v43, %v2659_v14 }
 0x2f6   : > { %v2662_v31 = vadd.f32 %v2660_v63, %v2652_v60  ;;  %v2684_v1 = vsel %vm306_vm1, %v2682_v12, %v2683_v35  ;;  %v3236_v63 = vstv %s6075_s19 }
 0x2f8   : > { %v2666_v10 = vadd.f32 %v2665_v42, %v2662_v31  ;;  %3155 = vrot.lane.b32.xlu2 %v3153_v27, %s3944_s14  ;;  %3145 = vrot.lane.b32.xlu1 %v3143_v11, %s3940_s30  ;;  %v3260_v31 = vstv %s6078_s21 }
 0x2f9   : > { %3165 = vrot.lane.b32.xlu0 %v3163_v26, %s3943_s11  ;;  %v3247_v26 = vmul.f32 %v3246_v59, %v5300_v18 }
 0x2fa   : > { %v2676_v4 = vadd.f32 %v2674_v62, %v2666_v10  ;;  %v6043_v7 = vpop.permute.xlu2 %2795  ;;  %v2692_v40 = vpop.permute.xlu1 %2691  ;;  %v3237_v10 = vmul.f32 %v3236_v63, %v5300_v18  ;;  %v2768_v62 = vsel %vm306_vm1, %v6021_v32, %v2767_v9 }
 0x2fb   : > { %v2693_v55 = vrot.slane %v2692_v40, 1  ;;  %v2712_v2 = vpop.permute.xlu0 %2711  ;;  %v2797_v32 = vrot.slane %v6043_v7, 1 }
 0x2fc   : > { %v2686_v37 = vadd.f32 %v2684_v1, %v2676_v4  ;;  %v2713_v45 = vrot.slane %v2712_v2, 1  ;;  %v3261_v4 = vmul.f32 %v3260_v31, %v5395_v25 }
 0x2fd   : > { %v2694_v13 = vsel %vm317_vm2, %v2692_v40, %v2693_v55 }
 0x2fe   : > { %v2696_v56 = vadd.f32 %v2694_v13, %v2686_v37  ;;  %v2714_v39 = vsel %vm339_vm4, %v2712_v2, %v2713_v45  ;;  %v3280_v37 = vstv %s6094_s20  ;;  %v3290_v13 = vstv %s6102_s26 }
 0x300   : > { %v2706_v22 = vadd.f32 %v2704_v49, %v2696_v56  ;;  %3189 = vrot.lane.b32.xlu2 %v3187_v53, %s3942_s9  ;;  %3179 = vrot.lane.b32.xlu1 %v3177_v28, %s3939_s28  ;;  %v3281_v28 = vmul.f32 %v3280_v37, %v5395_v25  ;;  %v3271_v49 = vmul.f32 %v3270_v48, %v5395_v25 }
 0x301   : > { %3199 = vrot.lane.b32.xlu0 %v3197_v19, %s3938_s25  ;;  %v2798_v19 = vsel %vm339_vm4, %v6043_v7, %v2797_v32 }
 0x302   : > { %v2716_v0 = vadd.f32 %v2714_v39, %v2706_v22  ;;  %v6068_v21 = vpop.permute.xlu2 %2843  ;;  %v2722_v3 = vpop.permute.xlu1 %2721  ;;  %v3291_v22 = vmul.f32 %v3290_v13, %v5395_v25 }
 0x303   : > { %v2723_v30 = vrot.slane %v2722_v3, 1  ;;  %v2742_v34 = vpop.permute.xlu0 %2741  ;;  %v2845_v7 = vrot.slane %v6068_v21, 1 }
 0x304   : > { %v2743_v58 = vrot.slane %v2742_v34, 1 }
 0x305   : > { %v2724_v8 = vsel %vm350_vm5, %v2722_v3, %v2723_v30 }
 0x306   : > { %v2726_v57 = vadd.f32 %v2724_v8, %v2716_v0  ;;  %v2744_v43 = vsel %vm372_vm7, %v2742_v34, %v2743_v58  ;;  %v2836_v0 = vstv %s6112_s27  ;;  %v3300_v8 = vstv %s6123_s7 }
 0x307   : > { %v2837_v58 = vmul.f32 %v2836_v0, %v4904_v44 }
 0x308   : > { %v2736_v60 = vadd.f32 %v2734_v24, %v2726_v57  ;;  %3219 = vrot.lane.b32.xlu2 %v3217_v20, %s3937_s24  ;;  %3209 = vrot.lane.b32.xlu1 %v3207_v29, %s3941_s6  ;;  %v3320_v57 = vstv %s6126_s8  ;;  %v2834_v20 = vstv %s6128_s15 }
 0x309   : > { %3229 = vrot.lane.b32.xlu0 %v3227_v16, %s3940_s30 }
 0x30a   : > { %v2746_v33 = vadd.f32 %v2744_v43, %v2736_v60  ;;  %v6091_v14 = vpop.permute.xlu2 %2873  ;;  %v2756_v12 = vpop.permute.xlu1 %2755  ;;  %v3301_v60 = vmul.f32 %v3300_v8, %v5395_v25  ;;  %v2846_v43 = vsel %vm295_vm0, %v6068_v21, %v2845_v7 }
 0x30b   : > { %v2757_v47 = vrot.slane %v2756_v12, 1  ;;  %v2776_v50 = vpop.permute.xlu0 %2775 }
 0x30c   : > { %v2750_v42 = vadd.f32 %v2749_v5, %v2746_v33  ;;  %v2777_v11 = vrot.slane %v2776_v50, 1  ;;  %v3321_v33 = vmul.f32 %v3320_v57, %v5395_v25  ;;  %v2838_v5 = vadd.f32 %v2837_v58, %v2834_v20 }
 0x30d   : > { %v2758_v27 = vsel %vm295_vm0, %v2756_v12, %v2757_v47 }
 0x30e   : > { %v2760_v35 = vadd.f32 %v2758_v27, %v2750_v42  ;;  %v2778_v38 = vsel %vm317_vm2, %v2776_v50, %v2777_v11  ;;  %v2848_v12 = vadd.f32 %v2846_v43, %v2838_v5  ;;  %v2875_v50 = vrot.slane %v6091_v14, 1 }
 0x310   : > { %v2770_v40 = vadd.f32 %v2768_v62, %v2760_v35  ;;  %3249 = vrot.lane.b32.xlu2 %v3247_v26, %s3943_s11  ;;  %3239 = vrot.lane.b32.xlu1 %v3237_v10, %s3944_s14  ;;  %v2876_v10 = vsel %vm328_vm3, %v6091_v14, %v2875_v50 }
 0x311   : > { %3263 = vrot.lane.b32.xlu0 %v3261_v4, %s3939_s28  ;;  %s6143_s28 = sld [smem:[#allocation6 + $0xa1]] }
 0x312   : > { %v2780_v23 = vadd.f32 %v2778_v38, %v2770_v40  ;;  %v6116_v1 = vpop.permute.xlu2 %2903  ;;  %v2786_v55 = vpop.permute.xlu1 %2785 }
 0x313   : > { %v2787_v2 = vrot.slane %v2786_v55, 1  ;;  %v2806_v52 = vpop.permute.xlu0 %2805 }
 0x314   : > { %v2807_v56 = vrot.slane %v2806_v52, 1 }
 0x315   : > { %v2788_v45 = vsel %vm328_vm3, %v2786_v55, %v2787_v2 }
 0x316   : > { %v2790_v53 = vadd.f32 %v2788_v45, %v2780_v23  ;;  %v2808_v3 = vsel %vm350_vm5, %v2806_v52, %v2807_v56  ;;  %v2905_v23 = vrot.slane %v6116_v1, 1 }
 0x317   : > { %v3330_v42 = vstv %s6143_s28 }
 0x318   : > { %v2800_v39 = vadd.f32 %v2798_v19, %v2790_v53  ;;  %3283 = vrot.lane.b32.xlu2 %v3281_v28, %s3938_s25  ;;  %3273 = vrot.lane.b32.xlu1 %v3271_v49, %s3942_s9  ;;  %s3728_s25 = sld [smem:[#allocation6 + $0x6b]]  ;;  %v3331_v35 = vmul.f32 %v3330_v42, %v5395_v25  ;;  %v2906_v13 = vsel %vm361_vm6, %v6116_v1, %v2905_v23 }
 0x319   : > { %3293 = vrot.lane.b32.xlu0 %v3291_v22, %s3941_s6  ;;  %s3758_s6 = sld [smem:[#allocation6 + $0x87]] }
 0x31a   : > { %v2810_v17 = vadd.f32 %v2808_v3, %v2800_v39  ;;  %v6141_v30 = vpop.permute.xlu2 %2937  ;;  %v2816_v34 = vpop.permute.xlu1 %2815  ;;  %s3767_s9 = sld [smem:[#allocation6 + $0x90]] }
 0x31b   : > { %v2817_v51 = vrot.slane %v2816_v34, 1  ;;  %v2854_v6 = vpop.permute.xlu0 %2853  ;;  %v2939_v39 = vrot.slane %v6141_v30, 1 }
 0x31c   : > { %v2855_v24 = vrot.slane %v2854_v6, 1 }
 0x31d   : > { %v2818_v29 = vsel %vm361_vm6, %v2816_v34, %v2817_v51  ;;  %v2940_v1 = vsel %vm306_vm1, %v6141_v30, %v2939_v39 }
 0x31e   : > { %v6152_v16 = vadd.f32 %v2818_v29, %v2810_v17  ;;  %v2856_v44 = vsel %vm306_vm1, %v2854_v6, %v2855_v24  ;;  %v2822_v21 = vstv %s3728_s25 }
 0x31f   : > { %v2858_v31 = vadd.f32 %v2856_v44, %v2848_v12  ;;  %v2823_v26 = vmul.f32 %v2822_v21, %v5395_v25 }
 0x320   : > { %3313 = vrot.lane.b32.xlu2 %v3311_v36, %s3940_s30  ;;  %3303 = vrot.lane.b32.xlu1 %v3301_v60, %s3937_s24  ;;  %s3740_s24 = sld [smem:[#allocation6 + $0x75]] }
 0x321   : > { %3323 = vrot.lane.b32.xlu0 %v3321_v33, %s3944_s14  ;;  %s3749_s30 = sld [smem:[#allocation6 + $0x7e]] }
 0x322   : > { %v2968_v9 = vpop.permute.xlu2 %2967  ;;  %v2864_v47 = vpop.permute.xlu1 %2863 }
 0x323   : > { %v2865_v59 = vrot.slane %v2864_v47, 1  ;;  %v2884_v63 = vpop.permute.xlu0 %2883  ;;  %v2969_v58 = vrot.slane %v2968_v9, 1 }
 0x324   : > { %v2885_v62 = vrot.slane %v2884_v63, 1 }
 0x325   : > { %v2866_v27 = vsel %vm317_vm2, %v2864_v47, %v2865_v59  ;;  %v2970_v60 = vsel %vm339_vm4, %v2968_v9, %v2969_v58 }
 0x326   : > { %v2868_v11 = vadd.f32 %v2866_v27, %v2858_v31  ;;  %v2886_v55 = vsel %vm339_vm4, %v2884_v63, %v2885_v62  ;;  %v2920_v45 = vstv %s3740_s24 }
 0x327   : > { %v2921_v19 = vmul.f32 %v2920_v45, %v5020_v46  ;;  %v3004_v42 = vstv %s3749_s30 }
 0x328   : > { %v2878_v4 = vadd.f32 %v2876_v10, %v2868_v11  ;;  %3333 = vrot.lane.b32.xlu2 %v3331_v35, %s3943_s11  ;;  %2825 = vrot.lane.b32.xlu1 %v2823_v26, %s3943_s11  ;;  %v3005_v9 = vmul.f32 %v3004_v42, %v5132_v41  ;;  %s3776_s11 = sld [smem:[#allocation6 + $0x99]] }
 0x32a   : > { %v2998_v40 = vpop.permute.xlu2 %2997  ;;  %v2894_v38 = vpop.permute.xlu1 %2893  ;;  %v2888_v52 = vadd.f32 %v2886_v55, %v2878_v4 }
 0x32b   : > { %v2895_v32 = vrot.slane %v2894_v38, 1  ;;  %v2914_v2 = vpop.permute.xlu0 %2913  ;;  %v2999_v30 = vrot.slane %v2998_v40, 1 }
 0x32c   : > { %v2915_v48 = vrot.slane %v2914_v2, 1 }
 0x32d   : > { %v2896_v37 = vsel %vm350_vm5, %v2894_v38, %v2895_v32  ;;  %v3000_v31 = vsel %vm372_vm7, %v2998_v40, %v2999_v30 }
 0x32e   : > { %v2898_v14 = vadd.f32 %v2896_v37, %v2888_v52  ;;  %v2916_v53 = vsel %vm372_vm7, %v2914_v2, %v2915_v48 }
 0x330   : > { %v2908_v56 = vadd.f32 %v2906_v13, %v2898_v14 }
 0x332   : > { %v2918_v28 = vadd.f32 %v2916_v53, %v2908_v56  ;;  %v3032_v49 = vpop.permute.xlu2 %3031  ;;  %v2928_v22 = vpop.permute.xlu1 %2927 }
 0x333   : > { %v2929_v0 = vrot.slane %v2928_v22, 1  ;;  %v2948_v3 = vpop.permute.xlu0 %2947  ;;  %v3033_v10 = vrot.slane %v3032_v49, 1 }
 0x334   : > { %v2922_v17 = vadd.f32 %v2921_v19, %v2918_v28  ;;  %v2949_v51 = vrot.slane %v2948_v3, 1 }
 0x335   : > { %v2930_v34 = vsel %vm295_vm0, %v2928_v22, %v2929_v0  ;;  %v3034_v52 = vsel %vm317_vm2, %v3032_v49, %v3033_v10  ;;  %v3172_v10 = vstv %s3767_s9 }
 0x336   : > { %v2932_v7 = vadd.f32 %v2930_v34, %v2922_v17  ;;  %v2950_v57 = vsel %vm317_vm2, %v2948_v3, %v2949_v51  ;;  %v3088_v17 = vstv %s3758_s6 }
 0x338   : > { %v2942_v6 = vadd.f32 %v2940_v1, %v2932_v7 }
 0x33a   : > { %v3062_v15 = vpop.permute.xlu2 %3061  ;;  %v2958_v8 = vpop.permute.xlu1 %2957  ;;  %v2952_v29 = vadd.f32 %v2950_v57, %v2942_v6 }
 0x33b   : > { %v2959_v46 = vrot.slane %v2958_v8, 1  ;;  %v2978_v20 = vpop.permute.xlu0 %2977  ;;  %v3063_v14 = vrot.slane %v3062_v15, 1 }
 0x33c   : > { %v2979_v43 = vrot.slane %v2978_v20, 1 }
 0x33d   : > { %v2960_v24 = vsel %vm328_vm3, %v2958_v8, %v2959_v46  ;;  %v3064_v19 = vsel %vm350_vm5, %v3062_v15, %v3063_v14  ;;  %v3089_v8 = vmul.f32 %v3088_v17, %v5236_v54 }
 0x33e   : > { %v2962_v36 = vadd.f32 %v2960_v24, %v2952_v29  ;;  %v2980_v44 = vsel %vm350_vm5, %v2978_v20, %v2979_v43 }
 0x340   : > { %v2972_v33 = vadd.f32 %v2970_v60, %v2962_v36 }
 0x342   : > { %v2988_v5 = vpop.permute.xlu1 %2987  ;;  %v2982_v50 = vadd.f32 %v2980_v44, %v2972_v33  ;;  %v3096_v59 = vpop.permute.xlu2 %3095 }
 0x343   : > { %v2989_v12 = vrot.slane %v2988_v5, 1  ;;  %v3012_v47 = vpop.permute.xlu0 %3011  ;;  %v3097_v51 = vrot.slane %v3096_v59, 1 }
 0x344   : > { %v3013_v27 = vrot.slane %v3012_v47, 1 }
 0x345   : > { %v2990_v63 = vsel %vm361_vm6, %v2988_v5, %v2989_v12  ;;  %v3098_v15 = vsel %vm295_vm0, %v3096_v59, %v3097_v51 }
 0x346   : > { %v2992_v21 = vadd.f32 %v2990_v63, %v2982_v50  ;;  %v3014_v62 = vsel %vm295_vm0, %v3012_v47, %v3013_v27 }
 0x348   : > { %v3002_v11 = vadd.f32 %v3000_v31, %v2992_v21 }
 0x34a   : > { %v3006_v35 = vadd.f32 %v3005_v9, %v3002_v11  ;;  %v3022_v26 = vpop.permute.xlu1 %3021  ;;  %v3126_v32 = vpop.permute.xlu2 %3125 }
 0x34b   : > { %v3023_v4 = vrot.slane %v3022_v26, 1  ;;  %v3042_v38 = vpop.permute.xlu0 %3041  ;;  %v3127_v36 = vrot.slane %v3126_v32, 1 }
 0x34c   : > { %v3016_v23 = vadd.f32 %v3014_v62, %v3006_v35  ;;  %v3043_v37 = vrot.slane %v3042_v38, 1 }
 0x34d   : > { %v3024_v55 = vsel %vm306_vm1, %v3022_v26, %v3023_v4  ;;  %v3128_v12 = vsel %vm328_vm3, %v3126_v32, %v3127_v36 }
 0x34e   : > { %v3026_v2 = vadd.f32 %v3024_v55, %v3016_v23  ;;  %v3044_v41 = vsel %vm328_vm3, %v3042_v38, %v3043_v37  ;;  %v3173_v23 = vmul.f32 %v3172_v10, %v5300_v18 }
 0x350   : > { %v3036_v40 = vadd.f32 %v3034_v52, %v3026_v2 }
 0x352   : > { %v3052_v48 = vpop.permute.xlu1 %3051  ;;  %v3046_v56 = vadd.f32 %v3044_v41, %v3036_v40  ;;  %v3156_v39 = vpop.permute.xlu2 %3155 }
 0x353   : > { %v3053_v13 = vrot.slane %v3052_v48, 1  ;;  %v3072_v45 = vpop.permute.xlu0 %3071  ;;  %v3157_v63 = vrot.slane %v3156_v39, 1 }
 0x354   : > { %v3073_v22 = vrot.slane %v3072_v45, 1 }
 0x355   : > { %v3054_v53 = vsel %vm339_vm4, %v3052_v48, %v3053_v13  ;;  %v3158_v26 = vsel %vm361_vm6, %v3156_v39, %v3157_v63 }
 0x356   : > { %v3056_v28 = vadd.f32 %v3054_v53, %v3046_v56  ;;  %v3074_v49 = vsel %vm361_vm6, %v3072_v45, %v3073_v22 }
 0x358   : > { %v3066_v0 = vadd.f32 %v3064_v19, %v3056_v28 }
 0x35a   : > { %v3082_v3 = vpop.permute.xlu1 %3081  ;;  %v3076_v1 = vadd.f32 %v3074_v49, %v3066_v0  ;;  %v3190_v20 = vpop.permute.xlu2 %3189 }
 0x35b   : > { %v3083_v34 = vrot.slane %v3082_v3, 1  ;;  %v3106_v7 = vpop.permute.xlu0 %3105  ;;  %v3191_v32 = vrot.slane %v3190_v20, 1 }
 0x35c   : > { %v3107_v57 = vrot.slane %v3106_v7, 1 }
 0x35d   : > { %v3084_v6 = vsel %vm372_vm7, %v3082_v3, %v3083_v34  ;;  %v3192_v41 = vsel %vm306_vm1, %v3190_v20, %v3191_v32 }
 0x35e   : > { %v3086_v58 = vadd.f32 %v3084_v6, %v3076_v1  ;;  %v3108_v60 = vsel %vm306_vm1, %v3106_v7, %v3107_v57 }
 0x360   : > { %v3090_v46 = vadd.f32 %v3089_v8, %v3086_v58 }
 0x362   : > { %v3100_v29 = vadd.f32 %v3098_v15, %v3090_v46  ;;  %v3116_v24 = vpop.permute.xlu1 %3115  ;;  %v3220_v31 = vpop.permute.xlu2 %3219  ;;  %v3256_v46 = vstv %s3776_s11 }
 0x363   : > { %v3117_v43 = vrot.slane %v3116_v24, 1  ;;  %v3136_v33 = vpop.permute.xlu0 %3135  ;;  %v3221_v53 = vrot.slane %v3220_v31, 1  ;;  %v3257_v36 = vmul.f32 %v3256_v46, %v5395_v25 }
 0x364   : > { %v3110_v5 = vadd.f32 %v3108_v60, %v3100_v29  ;;  %v3137_v54 = vrot.slane %v3136_v33, 1 }
 0x365   : > { %v3118_v30 = vsel %vm317_vm2, %v3116_v24, %v3117_v43  ;;  %v3222_v3 = vsel %vm339_vm4, %v3220_v31, %v3221_v53 }
 0x366   : > { %v3120_v44 = vadd.f32 %v3118_v30, %v3110_v5  ;;  %v3138_v59 = vsel %vm339_vm4, %v3136_v33, %v3137_v54 }
 0x368   : > { %v3130_v47 = vadd.f32 %v3128_v12, %v3120_v44 }
 0x36a   : > { %v3146_v50 = vpop.permute.xlu1 %3145  ;;  %v3140_v27 = vadd.f32 %v3138_v59, %v3130_v47  ;;  %v3250_v48 = vpop.permute.xlu2 %3249 }
 0x36b   : > { %v3147_v42 = vrot.slane %v3146_v50, 1  ;;  %v3166_v21 = vpop.permute.xlu0 %3165  ;;  %v3251_v1 = vrot.slane %v3250_v48, 1 }
 0x36c   : > { %v3167_v9 = vrot.slane %v3166_v21, 1 }
 0x36d   : > { %v3148_v11 = vsel %vm350_vm5, %v3146_v50, %v3147_v42  ;;  %v3252_v20 = vsel %vm372_vm7, %v3250_v48, %v3251_v1 }
 0x36e   : > { %v3150_v35 = vadd.f32 %v3148_v11, %v3140_v27  ;;  %v3168_v4 = vsel %vm372_vm7, %v3166_v21, %v3167_v9 }
 0x370   : > { %v3160_v62 = vadd.f32 %v3158_v26, %v3150_v35 }
 0x372   : > { %v3170_v38 = vadd.f32 %v3168_v4, %v3160_v62  ;;  %v3180_v55 = vpop.permute.xlu1 %3179  ;;  %v3284_v17 = vpop.permute.xlu2 %3283 }
 0x373   : > { %v3181_v2 = vrot.slane %v3180_v55, 1  ;;  %v3200_v52 = vpop.permute.xlu0 %3199  ;;  %v3285_v5 = vrot.slane %v3284_v17, 1 }
 0x374   : > { %v3174_v37 = vadd.f32 %v3173_v23, %v3170_v38  ;;  %v3201_v13 = vrot.slane %v3200_v52, 1 }
 0x375   : > { %v3182_v40 = vsel %vm295_vm0, %v3180_v55, %v3181_v2  ;;  %v3286_v63 = vsel %vm317_vm2, %v3284_v17, %v3285_v5 }
 0x376   : > { %v3184_v14 = vadd.f32 %v3182_v40, %v3174_v37  ;;  %v3202_v28 = vsel %vm317_vm2, %v3200_v52, %v3201_v13 }
 0x378   : > { %v3194_v45 = vadd.f32 %v3192_v41, %v3184_v14 }
 0x37a   : > { %v3210_v56 = vpop.permute.xlu1 %3209  ;;  %v3204_v18 = vadd.f32 %v3202_v28, %v3194_v45  ;;  %v3314_v60 = vpop.permute.xlu2 %3313 }
 0x37b   : > { %v3211_v19 = vrot.slane %v3210_v56, 1  ;;  %v3230_v22 = vpop.permute.xlu0 %3229  ;;  %v3315_v31 = vrot.slane %v3314_v60, 1 }
 0x37c   : > { %v3231_v49 = vrot.slane %v3230_v22, 1 }
 0x37d   : > { %v3212_v39 = vsel %vm328_vm3, %v3210_v56, %v3211_v19  ;;  %v3316_v4 = vsel %vm350_vm5, %v3314_v60, %v3315_v31 }
 0x37e   : > { %v3214_v0 = vadd.f32 %v3212_v39, %v3204_v18  ;;  %v3232_v51 = vsel %vm350_vm5, %v3230_v22, %v3231_v49 }
 0x380   : > { %v3224_v34 = vadd.f32 %v3222_v3, %v3214_v0 }
 0x382   : > { %v3240_v7 = vpop.permute.xlu1 %3239  ;;  %v3234_v58 = vadd.f32 %v3232_v51, %v3224_v34  ;;  %v3334_v9 = vpop.permute.xlu2 %3333 }
 0x383   : > { %v3241_v6 = vrot.slane %v3240_v7, 1  ;;  %v3264_v8 = vpop.permute.xlu0 %3263  ;;  %v3335_v38 = vrot.slane %v3334_v9, 1 }
 0x384   : > { %v3265_v29 = vrot.slane %v3264_v8, 1 }
 0x385   : > { %v3242_v57 = vsel %vm361_vm6, %v3240_v7, %v3241_v6  ;;  %v3336_v52 = vsel %vm372_vm7, %v3334_v9, %v3335_v38 }
 0x386   : > { %v3244_v15 = vadd.f32 %v3242_v57, %v3234_v58  ;;  %v3266_v30 = vsel %vm295_vm0, %v3264_v8, %v3265_v29 }
 0x388   : > { %v3254_v24 = vadd.f32 %v3252_v20, %v3244_v15 }
 0x38a   : > { %v3258_v43 = vadd.f32 %v3257_v36, %v3254_v24  ;;  %v3274_v33 = vpop.permute.xlu1 %3273 }
 0x38b   : > { %v3275_v44 = vrot.slane %v3274_v33, 1  ;;  %v3294_v12 = vpop.permute.xlu0 %3293 }
 0x38c   : > { %v3268_v54 = vadd.f32 %v3266_v30, %v3258_v43  ;;  %v3295_v59 = vrot.slane %v3294_v12, 1 }
 0x38d   : > { %v3276_v47 = vsel %vm306_vm1, %v3274_v33, %v3275_v44 }
 0x38e   : > { %v3278_v50 = vadd.f32 %v3276_v47, %v3268_v54  ;;  %v3296_v25 = vsel %vm328_vm3, %v3294_v12, %v3295_v59 }
 0x390   : > { %v3288_v42 = vadd.f32 %v3286_v63, %v3278_v50 }
 0x392   : > { %v3304_v21 = vpop.permute.xlu1 %3303  ;;  %v3298_v35 = vadd.f32 %v3296_v25, %v3288_v42 }
 0x393   : > { %v3305_v27 = vrot.slane %v3304_v21, 1  ;;  %v3324_v11 = vpop.permute.xlu0 %3323 }
 0x394   : > { %v3325_v10 = vrot.slane %v3324_v11, 1 }
 0x395   : > { %v3306_v26 = vsel %vm339_vm4, %v3304_v21, %v3305_v27 }
 0x396   : > { %v3308_v62 = vadd.f32 %v3306_v26, %v3298_v35  ;;  %v3326_v55 = vsel %vm361_vm6, %v3324_v11, %v3325_v10 }
 0x398   : > { %v3318_v23 = vadd.f32 %v3316_v4, %v3308_v62 }
 0x39a   : > { %v3328_v32 = vadd.f32 %v3326_v55, %v3318_v23  ;;  %v2826_v2 = vpop.permute.xlu1 %2825 }
 0x39b   : > { %v2827_v37 = vrot.slane %v2826_v2, 1 }
 0x39c   : > { %v3338_v40 = vadd.f32 %v3336_v52, %v3328_v32 }
 0x39d   : > { %v2828_v48 = vsel %vm372_vm7, %v2826_v2, %v2827_v37 }
 0x39e   : > { %3785 = vst.msk [vmem:[%s5776_s22 + $0x2] ss:$4 sm:$0x3] %vm5778_vm8, %v3338_v40  ;;  %v2830_v14 = vadd.f32 %v2828_v48, %v6152_v16 }
 0x3a0   : > { %3729 = vst.msk [vmem:[%s5776_s22 + $0x1] ss:$4 sm:$0x3] %vm5778_vm8, %v2830_v14 }
 0x3a1 PF: > { %s18_s18 = sadd.s32 1, %s3931_s18  }
 0x3a2   : > { %p15_p7 = scmp.ge.s32.totalorder %s18_s18, 4  }
 0x3a4   :  { %17 = sbr.rel (!%p15_p7) target bundleno = 3 (0x3), region = 91 }
 0x3a9   :  { %3362 = vsyncpa [#allocation3], 1 }
 0x3aa   :  { %3364 = vsyncpa [#allocation3 + $0x1], 1 }
 0x3ab   :  { %3365 = vsyncpa [#allocation5], 1 }
 0x3ac   :  { %3366 = vsyncpa [#allocation8], 1 }

</bundles_post_ra>
